<compile_context>
chip_gen: v6e
topology: v6e:2x2x1
jax: 0.10.0
libtpu: 0.0.40
codegen_flags: <defaults>
</compile_context>

<pallas_src>
import jax
import jax.numpy as jnp
from jax.experimental import pallas as pl
from jax.experimental.pallas import tpu as pltpu

# ---------------------------------------------------------------- sizes -----
S_LEN = 10     # source sequence length
T_LEN = 8      # target sequence length
BATCH = 4
EMB = 32       # embedding size (encoder & decoder)
HID = 32       # GRU hidden size
V_IN = 16      # input vocabulary size
V_OUT = 12     # output vocabulary size == len(output_char_to_int)

N_ENC_PARAMS = 5
N_DEC_PARAMS = 11


# ------------------------------------------------------ shared math helpers --
def _dot(a, b):
    # Default MXU precision (single-pass) is ample for contraction dims of 12..96
    # and the 2e-3 test tolerance.
    return jnp.dot(a, b, preferred_element_type=jnp.float32)


# ------------------------------------------------------------ Pallas kernel --
def seq2seq_kernel(src_ref, tgt_ref, e_wix_ref, e_wh_ref, d_wiex_ref,
                   w_fused_ref, fc_w_ref, pack_ref, out_ref):
    S, T, B, H = S_LEN, T_LEN, BATCH, HID
    f32 = jnp.float32

    # ---------------- packed tiny parameters (one DMA, sliced statically) ----
    pack = pack_ref[...]                      # (8, 3H)
    e_bi = pack[0:1, :]                       # enc input bias, bh_r/bh_z folded in
    d_bi = pack[1:2, :]                       # dec input bias, bh_r/bh_z folded in
    e_bh_n = pack[2:3, :H]                    # enc hidden bias, n gate
    d_bh_n = pack[3:4, :H]                    # dec hidden bias, n gate
    a_wh = pack[4:5, :H]                      # attention energy weights (hidden)
    a_wenc = pack[5:6, :H]                    # attention energy weights (enc states)
    fc_b = pack[6:7, :V_OUT]                  # output projection bias
    a_b = pack[7:8, 0:1]                      # attention energy bias (scalar)

    # --------------- encoder: batched input-side gates (one matmul) ----------
    gx_all = _dot(src_ref[...], e_wix_ref[...]) + e_bi          # (S*B, 3H)

    e_wh = e_wh_ref[...]                                        # (H, 3H)
    h = jnp.zeros((B, H), f32)
    enc_list = []
    for t in range(S):                          # serial recurrence (unrolled)
        gx = gx_all[t * B:(t + 1) * B, :]
        gh = _dot(h, e_wh)
        r = jax.nn.sigmoid(gx[:, :H] + gh[:, :H])
        z = jax.nn.sigmoid(gx[:, H:2 * H] + gh[:, H:2 * H])
        n = jnp.tanh(gx[:, 2 * H:] + r * (gh[:, 2 * H:] + e_bh_n))
        h = (1.0 - z) * n + z * h
        enc_list.append(h)                      # kept in registers, no scratch

    # ---------- attention loop-invariant energy term in (B, S) layout --------
    lane = jax.lax.broadcasted_iota(jnp.int32, (B, S), 1)
    e_enc = jnp.zeros((B, S), f32) + a_b        # attention bias folded in
    for s in range(S):
        col = jnp.sum(enc_list[s] * a_wenc, axis=1, keepdims=True)   # (B, 1)
        e_enc = e_enc + col * (lane == s).astype(f32)

    # --------------- decoder: batched input-side gates (one matmul) ----------
    # teacher forcing = 1.0: input at step t is target[t-1]
    ge_all = _dot(tgt_ref[...], d_wiex_ref[...]) + d_bi         # ((T-1)*B, 3H)

    w_fused = w_fused_ref[...]                                  # (2H, 4H)
    hd = h                                      # decoder hidden = encoder final
    hs = []
    for t in range(T - 1):                      # unrolled decoder recurrence
        # attention: relu energy + softmax over S, all on one (B, S) vreg
        e_h = jnp.sum(hd * a_wh, axis=1, keepdims=True)         # (B, 1)
        energy = jax.nn.relu(e_enc + e_h)                       # (B, S)
        m = jnp.max(energy, axis=1, keepdims=True)
        p = jnp.exp(energy - m)
        attn = p / jnp.sum(p, axis=1, keepdims=True)            # (B, S)
        ctx = attn[:, 0:1] * enc_list[0]
        for s in range(1, S):
            ctx = ctx + attn[:, s:s + 1] * enc_list[s]          # (B, H)

        # fused GRU step: ONE (B,2H)@(2H,4H) matmul -> [rz_sum | n_ctx | n_hid]
        u = _dot(jnp.concatenate([ctx, hd], axis=1), w_fused)   # (B, 4H)
        ge = ge_all[t * B:(t + 1) * B, :]
        rz = jax.nn.sigmoid(u[:, :2 * H] + ge[:, :2 * H])
        r = rz[:, :H]
        z = rz[:, H:]
        n = jnp.tanh(u[:, 2 * H:3 * H] + ge[:, 2 * H:] + r * (u[:, 3 * H:] + d_bh_n))
        hd = (1.0 - z) * n + z * hd
        hs.append(hd)

    # ------------- batched fc projection + single slab output store ----------
    logits = _dot(jnp.concatenate(hs, axis=0), fc_w_ref[...]) + fc_b   # ((T-1)*B, V)
    out_ref[...] = jnp.concatenate(
        [jnp.zeros((B, V_OUT), f32), logits], axis=0)                  # (T*B, V)


# --------------------------------------------------------------- wrapper ----
@jax.jit
def seq2seq_forward(source, target, enc_params, dec_params):
    (e_emb, e_wi, e_wh, e_bi, e_bh) = enc_params
    (d_emb, a_wh, a_wenc, a_b,
     d_wic, d_wie, d_wh, d_bi, d_bh, fc_w, fc_b) = dec_params
    H = HID
    S, B = source.shape
    T = target.shape[0]
    f32 = jnp.float32
    hi = jax.lax.Precision.HIGHEST

    # token ids -> one-hot, flattened to time-major 2D slabs
    src_flat = jax.nn.one_hot(source, V_IN, dtype=f32).reshape(S * B, V_IN)
    tgt_flat = jax.nn.one_hot(target[:-1], V_OUT, dtype=f32).reshape((T - 1) * B, V_OUT)

    # ---- wrapper-side weight/bias fusion (computed once by XLA, off kernel path)
    e_wix = jnp.dot(e_emb, e_wi, precision=hi)                 # (V_IN, 3H)
    d_wiex = jnp.dot(d_emb, d_wie, precision=hi)               # (V_OUT, 3H)
    zH = jnp.zeros((1, H), f32)
    e_bi_c = e_bi + jnp.concatenate([e_bh[:, :2 * H], zH], axis=1)   # fold bh_r, bh_z
    d_bi_c = d_bi + jnp.concatenate([d_bh[:, :2 * H], zH], axis=1)
    zHH = jnp.zeros((H, H), f32)
    # [ctx, hd] @ w_fused -> [ctx@Wic_rz + hd@Wh_rz | ctx@Wic_n | hd@Wh_n]
    w_fused = jnp.concatenate([
        jnp.concatenate([d_wic[:, :2 * H], d_wic[:, 2 * H:], zHH], axis=1),
        jnp.concatenate([d_wh[:, :2 * H], zHH, d_wh[:, 2 * H:]], axis=1)],
        axis=0)                                                # (2H, 4H)

    # ---- pack all tiny parameters into one VMEM tile (one DMA) ----
    def row(v):
        v = v.reshape(1, -1)
        return jnp.pad(v, ((0, 0), (0, 3 * H - v.shape[1])))

    pack = jnp.concatenate([
        row(e_bi_c), row(d_bi_c), row(e_bh[:, 2 * H:]), row(d_bh[:, 2 * H:]),
        row(a_wh), row(a_wenc), row(fc_b), row(a_b)], axis=0)  # (8, 3H)

    args = (src_flat, tgt_flat, e_wix, e_wh, d_wiex, w_fused, fc_w, pack)
    out2d = pl.pallas_call(
        seq2seq_kernel,
        out_shape=jax.ShapeDtypeStruct((T * B, V_OUT), f32),
        in_specs=[pl.BlockSpec(memory_space=pltpu.MemorySpace.VMEM)] * len(args),
        out_specs=pl.BlockSpec(memory_space=pltpu.MemorySpace.VMEM),
    )(*args)
    return out2d.reshape(T, B, V_OUT)


# --------------------------------------------------------- pure-JAX reference
def reference_forward(source, target, enc_params, dec_params):
    (e_emb, e_wi, e_wh, e_bi, e_bh) = enc_params
    (d_emb, a_wh, a_wenc, a_b,
     d_wic, d_wie, d_wh, d_bi, d_bh, fc_w, fc_b) = dec_params
    H = HID
    src_oh = jax.nn.one_hot(source, V_IN, dtype=jnp.float32)
    tgt_oh = jax.nn.one_hot(target, V_OUT, dtype=jnp.float32)
    S, B = source.shape
    T = target.shape[0]

    def gru(gx, h, w_h, b_h):
        gh = jnp.dot(h, w_h, preferred_element_type=jnp.float32) + b_h
        r = jax.nn.sigmoid(gx[:, :H] + gh[:, :H])
        z = jax.nn.sigmoid(gx[:, H:2 * H] + gh[:, H:2 * H])
        n = jnp.tanh(gx[:, 2 * H:] + r * gh[:, 2 * H:])
        return (1.0 - z) * n + z * h

    h = jnp.zeros((B, H), jnp.float32)
    enc_list = []
    for t in range(S):
        emb = jnp.dot(src_oh[t], e_emb, preferred_element_type=jnp.float32)
        gx = jnp.dot(emb, e_wi, preferred_element_type=jnp.float32) + e_bi
        h = gru(gx, h, e_wh, e_bh)
        enc_list.append(h)
    enc = jnp.stack(enc_list, axis=0)                            # (S, B, H)

    outputs = [jnp.zeros((B, V_OUT), jnp.float32)]
    hd = h
    e_enc = jnp.sum(enc * a_wenc.reshape(1, 1, H), axis=-1, keepdims=True)
    for t in range(1, T):
        emb = jnp.dot(tgt_oh[t - 1], d_emb, preferred_element_type=jnp.float32)
        e_h = jnp.sum(hd * a_wh, axis=-1, keepdims=True)
        energy = jax.nn.relu(e_enc + e_h[None] + a_b[None])
        m = jnp.max(energy, axis=0, keepdims=True)
        p = jnp.exp(energy - m)
        attn = p / jnp.sum(p, axis=0, keepdims=True)
        ctx = jnp.sum(attn * enc, axis=0)
        gx = (jnp.dot(ctx, d_wic, preferred_element_type=jnp.float32)
              + jnp.dot(emb, d_wie, preferred_element_type=jnp.float32) + d_bi)
        hd = gru(gx, hd, d_wh, d_bh)
        outputs.append(jnp.dot(hd, fc_w, preferred_element_type=jnp.float32) + fc_b)
    return jnp.stack(outputs, axis=0)


# ------------------------------------------------------------ param init -----
def init_params(key):
    def nrm(k, shape, scale=0.1):
        return (scale * jax.random.normal(k, shape)).astype(jnp.float32)

    keys = iter(jax.random.split(key, 24))
    E, H = EMB, HID
    enc_params = (
        nrm(next(keys), (V_IN, E)),       # embedding
        nrm(next(keys), (E, 3 * H)),      # W_i  (r|z|n fused)
        nrm(next(keys), (H, 3 * H)),      # W_h  (r|z|n fused)
        nrm(next(keys), (1, 3 * H)),      # b_i
        nrm(next(keys), (1, 3 * H)),      # b_h
    )
    dec_params = (
        nrm(next(keys), (V_OUT, E)),      # embedding
        nrm(next(keys), (1, H)),          # energy weights (decoder hidden part)
        nrm(next(keys), (1, H)),          # energy weights (encoder states part)
        nrm(next(keys), (1, 1)),          # energy bias
        nrm(next(keys), (H, 3 * H)),      # W_i, context part (fused gates)
        nrm(next(keys), (E, 3 * H)),      # W_i, embedding part (fused gates)
        nrm(next(keys), (H, 3 * H)),      # W_h (fused gates)
        nrm(next(keys), (1, 3 * H)),      # b_i
        nrm(next(keys), (1, 3 * H)),      # b_h
        nrm(next(keys), (H, V_OUT)),      # fc weight
        nrm(next(keys), (1, V_OUT)),      # fc bias
    )
    assert len(enc_params) == N_ENC_PARAMS and len(dec_params) == N_DEC_PARAMS
    return enc_params, dec_params


# ------------------------------------------------------------------ main -----
if __name__ == "__main__":
    key = jax.random.PRNGKey(0)
    kp, ks, kt = jax.random.split(key, 3)
    enc_params, dec_params = init_params(kp)
    source = jax.random.randint(ks, (S_LEN, BATCH), 0, V_IN, dtype=jnp.int32)
    target = jax.random.randint(kt, (T_LEN, BATCH), 0, V_OUT, dtype=jnp.int32)

    out = seq2seq_forward(source, target, enc_params, dec_params)
    out = jax.block_until_ready(out)

    ref = reference_forward(source, target, enc_params, dec_params)
    assert out.shape == (T_LEN, BATCH, V_OUT), out.shape
    max_err = float(jnp.max(jnp.abs(out - ref)))
    assert jnp.allclose(out, ref, atol=2e-3, rtol=2e-3), max_err
    print("KERNEL_OK")
</pallas_src>

<mosaic_0001>
module attributes {stable_mosaic.version = 11 : i64} {
  func.func @seq2seq_kernel(%arg0: memref<40x16xf32, #tpu.memory_space<vmem>>, %arg1: memref<28x12xf32, #tpu.memory_space<vmem>>, %arg2: memref<16x96xf32, #tpu.memory_space<vmem>>, %arg3: memref<32x96xf32, #tpu.memory_space<vmem>>, %arg4: memref<12x96xf32, #tpu.memory_space<vmem>>, %arg5: memref<64x128xf32, #tpu.memory_space<vmem>>, %arg6: memref<32x12xf32, #tpu.memory_space<vmem>>, %arg7: memref<8x96xf32, #tpu.memory_space<vmem>>, %arg8: memref<32x12xf32, #tpu.memory_space<vmem>>) attributes {dimension_semantics = [], scalar_prefetch = 0 : i64, scratch_operands = 0 : i64, tpu.core_type = #tpu.core_type<tc>} {
    %c0 = arith.constant 0 : index
    %c0_0 = arith.constant 0 : index
    %0 = vector.load %arg7[%c0, %c0_0] : memref<8x96xf32, #tpu.memory_space<vmem>>, vector<8x96xf32>
    %1 = vector.extract_strided_slice %0 {offsets = [0, 0], sizes = [1, 96], strides = [1, 1]} : vector<8x96xf32> to vector<1x96xf32>
    %2 = vector.extract_strided_slice %0 {offsets = [1, 0], sizes = [1, 96], strides = [1, 1]} : vector<8x96xf32> to vector<1x96xf32>
    %3 = vector.extract_strided_slice %0 {offsets = [2, 0], sizes = [1, 32], strides = [1, 1]} : vector<8x96xf32> to vector<1x32xf32>
    %4 = vector.extract_strided_slice %0 {offsets = [3, 0], sizes = [1, 32], strides = [1, 1]} : vector<8x96xf32> to vector<1x32xf32>
    %5 = vector.extract_strided_slice %0 {offsets = [4, 0], sizes = [1, 32], strides = [1, 1]} : vector<8x96xf32> to vector<1x32xf32>
    %6 = vector.extract_strided_slice %0 {offsets = [5, 0], sizes = [1, 32], strides = [1, 1]} : vector<8x96xf32> to vector<1x32xf32>
    %7 = vector.extract_strided_slice %0 {offsets = [6, 0], sizes = [1, 12], strides = [1, 1]} : vector<8x96xf32> to vector<1x12xf32>
    %8 = vector.extract_strided_slice %0 {offsets = [7, 0], sizes = [1, 1], strides = [1, 1]} : vector<8x96xf32> to vector<1x1xf32>
    %c0_1 = arith.constant 0 : index
    %c0_2 = arith.constant 0 : index
    %9 = vector.load %arg0[%c0_1, %c0_2] : memref<40x16xf32, #tpu.memory_space<vmem>>, vector<40x16xf32>
    %c0_3 = arith.constant 0 : index
    %c0_4 = arith.constant 0 : index
    %10 = vector.load %arg2[%c0_3, %c0_4] : memref<16x96xf32, #tpu.memory_space<vmem>>, vector<16x96xf32>
    %cst = arith.constant dense<0.000000e+00> : vector<40x96xf32>
    %11 = tpu.matmul %9, %10, %cst {dimension_numbers = #tpu.dot_dimension_numbers<[1], [0], [0], [1], [0, 0, 1, 1], [], []>} : vector<40x16xf32>, vector<16x96xf32>, vector<40x96xf32> -> vector<40x96xf32>
    %12 = vector.broadcast %1 : vector<1x96xf32> to vector<40x96xf32>
    %13 = arith.addf %11, %12 : vector<40x96xf32>
    %c0_5 = arith.constant 0 : index
    %c0_6 = arith.constant 0 : index
    %14 = vector.load %arg3[%c0_5, %c0_6] : memref<32x96xf32, #tpu.memory_space<vmem>>, vector<32x96xf32>
    %cst_7 = arith.constant 0.000000e+00 : f32
    %15 = vector.broadcast %cst_7 : f32 to vector<4x32xf32>
    %16 = vector.extract_strided_slice %13 {offsets = [0, 0], sizes = [4, 96], strides = [1, 1]} : vector<40x96xf32> to vector<4x96xf32>
    %cst_8 = arith.constant dense<0.000000e+00> : vector<4x96xf32>
    %17 = tpu.matmul %15, %14, %cst_8 {dimension_numbers = #tpu.dot_dimension_numbers<[1], [0], [0], [1], [0, 0, 1, 1], [], []>} : vector<4x32xf32>, vector<32x96xf32>, vector<4x96xf32> -> vector<4x96xf32>
    %18 = vector.extract_strided_slice %16 {offsets = [0, 0], sizes = [4, 32], strides = [1, 1]} : vector<4x96xf32> to vector<4x32xf32>
    %19 = vector.extract_strided_slice %17 {offsets = [0, 0], sizes = [4, 32], strides = [1, 1]} : vector<4x96xf32> to vector<4x32xf32>
    %20 = arith.addf %18, %19 : vector<4x32xf32>
    %21 = arith.negf %20 : vector<4x32xf32>
    %22 = math.exp %21 : vector<4x32xf32>
    %cst_9 = arith.constant 1.000000e+00 : f32
    %23 = vector.broadcast %cst_9 : f32 to vector<4x32xf32>
    %24 = arith.addf %23, %22 : vector<4x32xf32>
    %25 = arith.divf %23, %24 : vector<4x32xf32>
    %26 = vector.extract_strided_slice %16 {offsets = [0, 32], sizes = [4, 32], strides = [1, 1]} : vector<4x96xf32> to vector<4x32xf32>
    %27 = vector.extract_strided_slice %17 {offsets = [0, 32], sizes = [4, 32], strides = [1, 1]} : vector<4x96xf32> to vector<4x32xf32>
    %28 = arith.addf %26, %27 : vector<4x32xf32>
    %29 = arith.negf %28 : vector<4x32xf32>
    %30 = math.exp %29 : vector<4x32xf32>
    %cst_10 = arith.constant 1.000000e+00 : f32
    %31 = vector.broadcast %cst_10 : f32 to vector<4x32xf32>
    %32 = arith.addf %31, %30 : vector<4x32xf32>
    %33 = arith.divf %31, %32 : vector<4x32xf32>
    %34 = vector.extract_strided_slice %16 {offsets = [0, 64], sizes = [4, 32], strides = [1, 1]} : vector<4x96xf32> to vector<4x32xf32>
    %35 = vector.extract_strided_slice %17 {offsets = [0, 64], sizes = [4, 32], strides = [1, 1]} : vector<4x96xf32> to vector<4x32xf32>
    %36 = vector.broadcast %3 : vector<1x32xf32> to vector<4x32xf32>
    %37 = arith.addf %35, %36 : vector<4x32xf32>
    %38 = arith.mulf %25, %37 : vector<4x32xf32>
    %39 = arith.addf %34, %38 : vector<4x32xf32>
    %40 = math.tanh %39 : vector<4x32xf32>
    %cst_11 = arith.constant 1.000000e+00 : f32
    %41 = vector.broadcast %cst_11 : f32 to vector<4x32xf32>
    %42 = arith.subf %41, %33 : vector<4x32xf32>
    %43 = arith.mulf %42, %40 : vector<4x32xf32>
    %44 = arith.mulf %33, %15 : vector<4x32xf32>
    %45 = arith.addf %43, %44 : vector<4x32xf32>
    %46 = vector.extract_strided_slice %13 {offsets = [4, 0], sizes = [4, 96], strides = [1, 1]} : vector<40x96xf32> to vector<4x96xf32>
    %cst_12 = arith.constant dense<0.000000e+00> : vector<4x96xf32>
    %47 = tpu.matmul %45, %14, %cst_12 {dimension_numbers = #tpu.dot_dimension_numbers<[1], [0], [0], [1], [0, 0, 1, 1], [], []>} : vector<4x32xf32>, vector<32x96xf32>, vector<4x96xf32> -> vector<4x96xf32>
    %48 = vector.extract_strided_slice %46 {offsets = [0, 0], sizes = [4, 32], strides = [1, 1]} : vector<4x96xf32> to vector<4x32xf32>
    %49 = vector.extract_strided_slice %47 {offsets = [0, 0], sizes = [4, 32], strides = [1, 1]} : vector<4x96xf32> to vector<4x32xf32>
    %50 = arith.addf %48, %49 : vector<4x32xf32>
    %51 = arith.negf %50 : vector<4x32xf32>
    %52 = math.exp %51 : vector<4x32xf32>
    %cst_13 = arith.constant 1.000000e+00 : f32
    %53 = vector.broadcast %cst_13 : f32 to vector<4x32xf32>
    %54 = arith.addf %53, %52 : vector<4x32xf32>
    %55 = arith.divf %53, %54 : vector<4x32xf32>
    %56 = vector.extract_strided_slice %46 {offsets = [0, 32], sizes = [4, 32], strides = [1, 1]} : vector<4x96xf32> to vector<4x32xf32>
    %57 = vector.extract_strided_slice %47 {offsets = [0, 32], sizes = [4, 32], strides = [1, 1]} : vector<4x96xf32> to vector<4x32xf32>
    %58 = arith.addf %56, %57 : vector<4x32xf32>
    %59 = arith.negf %58 : vector<4x32xf32>
    %60 = math.exp %59 : vector<4x32xf32>
    %cst_14 = arith.constant 1.000000e+00 : f32
    %61 = vector.broadcast %cst_14 : f32 to vector<4x32xf32>
    %62 = arith.addf %61, %60 : vector<4x32xf32>
    %63 = arith.divf %61, %62 : vector<4x32xf32>
    %64 = vector.extract_strided_slice %46 {offsets = [0, 64], sizes = [4, 32], strides = [1, 1]} : vector<4x96xf32> to vector<4x32xf32>
    %65 = vector.extract_strided_slice %47 {offsets = [0, 64], sizes = [4, 32], strides = [1, 1]} : vector<4x96xf32> to vector<4x32xf32>
    %66 = vector.broadcast %3 : vector<1x32xf32> to vector<4x32xf32>
    %67 = arith.addf %65, %66 : vector<4x32xf32>
    %68 = arith.mulf %55, %67 : vector<4x32xf32>
    %69 = arith.addf %64, %68 : vector<4x32xf32>
    %70 = math.tanh %69 : vector<4x32xf32>
    %cst_15 = arith.constant 1.000000e+00 : f32
    %71 = vector.broadcast %cst_15 : f32 to vector<4x32xf32>
    %72 = arith.subf %71, %63 : vector<4x32xf32>
    %73 = arith.mulf %72, %70 : vector<4x32xf32>
    %74 = arith.mulf %63, %45 : vector<4x32xf32>
    %75 = arith.addf %73, %74 : vector<4x32xf32>
    %76 = vector.extract_strided_slice %13 {offsets = [8, 0], sizes = [4, 96], strides = [1, 1]} : vector<40x96xf32> to vector<4x96xf32>
    %cst_16 = arith.constant dense<0.000000e+00> : vector<4x96xf32>
    %77 = tpu.matmul %75, %14, %cst_16 {dimension_numbers = #tpu.dot_dimension_numbers<[1], [0], [0], [1], [0, 0, 1, 1], [], []>} : vector<4x32xf32>, vector<32x96xf32>, vector<4x96xf32> -> vector<4x96xf32>
    %78 = vector.extract_strided_slice %76 {offsets = [0, 0], sizes = [4, 32], strides = [1, 1]} : vector<4x96xf32> to vector<4x32xf32>
    %79 = vector.extract_strided_slice %77 {offsets = [0, 0], sizes = [4, 32], strides = [1, 1]} : vector<4x96xf32> to vector<4x32xf32>
    %80 = arith.addf %78, %79 : vector<4x32xf32>
    %81 = arith.negf %80 : vector<4x32xf32>
    %82 = math.exp %81 : vector<4x32xf32>
    %cst_17 = arith.constant 1.000000e+00 : f32
    %83 = vector.broadcast %cst_17 : f32 to vector<4x32xf32>
    %84 = arith.addf %83, %82 : vector<4x32xf32>
    %85 = arith.divf %83, %84 : vector<4x32xf32>
    %86 = vector.extract_strided_slice %76 {offsets = [0, 32], sizes = [4, 32], strides = [1, 1]} : vector<4x96xf32> to vector<4x32xf32>
    %87 = vector.extract_strided_slice %77 {offsets = [0, 32], sizes = [4, 32], strides = [1, 1]} : vector<4x96xf32> to vector<4x32xf32>
    %88 = arith.addf %86, %87 : vector<4x32xf32>
    %89 = arith.negf %88 : vector<4x32xf32>
    %90 = math.exp %89 : vector<4x32xf32>
    %cst_18 = arith.constant 1.000000e+00 : f32
    %91 = vector.broadcast %cst_18 : f32 to vector<4x32xf32>
    %92 = arith.addf %91, %90 : vector<4x32xf32>
    %93 = arith.divf %91, %92 : vector<4x32xf32>
    %94 = vector.extract_strided_slice %76 {offsets = [0, 64], sizes = [4, 32], strides = [1, 1]} : vector<4x96xf32> to vector<4x32xf32>
    %95 = vector.extract_strided_slice %77 {offsets = [0, 64], sizes = [4, 32], strides = [1, 1]} : vector<4x96xf32> to vector<4x32xf32>
    %96 = vector.broadcast %3 : vector<1x32xf32> to vector<4x32xf32>
    %97 = arith.addf %95, %96 : vector<4x32xf32>
    %98 = arith.mulf %85, %97 : vector<4x32xf32>
    %99 = arith.addf %94, %98 : vector<4x32xf32>
    %100 = math.tanh %99 : vector<4x32xf32>
    %cst_19 = arith.constant 1.000000e+00 : f32
    %101 = vector.broadcast %cst_19 : f32 to vector<4x32xf32>
    %102 = arith.subf %101, %93 : vector<4x32xf32>
    %103 = arith.mulf %102, %100 : vector<4x32xf32>
    %104 = arith.mulf %93, %75 : vector<4x32xf32>
    %105 = arith.addf %103, %104 : vector<4x32xf32>
    %106 = vector.extract_strided_slice %13 {offsets = [12, 0], sizes = [4, 96], strides = [1, 1]} : vector<40x96xf32> to vector<4x96xf32>
    %cst_20 = arith.constant dense<0.000000e+00> : vector<4x96xf32>
    %107 = tpu.matmul %105, %14, %cst_20 {dimension_numbers = #tpu.dot_dimension_numbers<[1], [0], [0], [1], [0, 0, 1, 1], [], []>} : vector<4x32xf32>, vector<32x96xf32>, vector<4x96xf32> -> vector<4x96xf32>
    %108 = vector.extract_strided_slice %106 {offsets = [0, 0], sizes = [4, 32], strides = [1, 1]} : vector<4x96xf32> to vector<4x32xf32>
    %109 = vector.extract_strided_slice %107 {offsets = [0, 0], sizes = [4, 32], strides = [1, 1]} : vector<4x96xf32> to vector<4x32xf32>
    %110 = arith.addf %108, %109 : vector<4x32xf32>
    %111 = arith.negf %110 : vector<4x32xf32>
    %112 = math.exp %111 : vector<4x32xf32>
    %cst_21 = arith.constant 1.000000e+00 : f32
    %113 = vector.broadcast %cst_21 : f32 to vector<4x32xf32>
    %114 = arith.addf %113, %112 : vector<4x32xf32>
    %115 = arith.divf %113, %114 : vector<4x32xf32>
    %116 = vector.extract_strided_slice %106 {offsets = [0, 32], sizes = [4, 32], strides = [1, 1]} : vector<4x96xf32> to vector<4x32xf32>
    %117 = vector.extract_strided_slice %107 {offsets = [0, 32], sizes = [4, 32], strides = [1, 1]} : vector<4x96xf32> to vector<4x32xf32>
    %118 = arith.addf %116, %117 : vector<4x32xf32>
    %119 = arith.negf %118 : vector<4x32xf32>
    %120 = math.exp %119 : vector<4x32xf32>
    %cst_22 = arith.constant 1.000000e+00 : f32
    %121 = vector.broadcast %cst_22 : f32 to vector<4x32xf32>
    %122 = arith.addf %121, %120 : vector<4x32xf32>
    %123 = arith.divf %121, %122 : vector<4x32xf32>
    %124 = vector.extract_strided_slice %106 {offsets = [0, 64], sizes = [4, 32], strides = [1, 1]} : vector<4x96xf32> to vector<4x32xf32>
    %125 = vector.extract_strided_slice %107 {offsets = [0, 64], sizes = [4, 32], strides = [1, 1]} : vector<4x96xf32> to vector<4x32xf32>
    %126 = vector.broadcast %3 : vector<1x32xf32> to vector<4x32xf32>
    %127 = arith.addf %125, %126 : vector<4x32xf32>
    %128 = arith.mulf %115, %127 : vector<4x32xf32>
    %129 = arith.addf %124, %128 : vector<4x32xf32>
    %130 = math.tanh %129 : vector<4x32xf32>
    %cst_23 = arith.constant 1.000000e+00 : f32
    %131 = vector.broadcast %cst_23 : f32 to vector<4x32xf32>
    %132 = arith.subf %131, %123 : vector<4x32xf32>
    %133 = arith.mulf %132, %130 : vector<4x32xf32>
    %134 = arith.mulf %123, %105 : vector<4x32xf32>
    %135 = arith.addf %133, %134 : vector<4x32xf32>
    %136 = vector.extract_strided_slice %13 {offsets = [16, 0], sizes = [4, 96], strides = [1, 1]} : vector<40x96xf32> to vector<4x96xf32>
    %cst_24 = arith.constant dense<0.000000e+00> : vector<4x96xf32>
    %137 = tpu.matmul %135, %14, %cst_24 {dimension_numbers = #tpu.dot_dimension_numbers<[1], [0], [0], [1], [0, 0, 1, 1], [], []>} : vector<4x32xf32>, vector<32x96xf32>, vector<4x96xf32> -> vector<4x96xf32>
    %138 = vector.extract_strided_slice %136 {offsets = [0, 0], sizes = [4, 32], strides = [1, 1]} : vector<4x96xf32> to vector<4x32xf32>
    %139 = vector.extract_strided_slice %137 {offsets = [0, 0], sizes = [4, 32], strides = [1, 1]} : vector<4x96xf32> to vector<4x32xf32>
    %140 = arith.addf %138, %139 : vector<4x32xf32>
    %141 = arith.negf %140 : vector<4x32xf32>
    %142 = math.exp %141 : vector<4x32xf32>
    %cst_25 = arith.constant 1.000000e+00 : f32
    %143 = vector.broadcast %cst_25 : f32 to vector<4x32xf32>
    %144 = arith.addf %143, %142 : vector<4x32xf32>
    %145 = arith.divf %143, %144 : vector<4x32xf32>
    %146 = vector.extract_strided_slice %136 {offsets = [0, 32], sizes = [4, 32], strides = [1, 1]} : vector<4x96xf32> to vector<4x32xf32>
    %147 = vector.extract_strided_slice %137 {offsets = [0, 32], sizes = [4, 32], strides = [1, 1]} : vector<4x96xf32> to vector<4x32xf32>
    %148 = arith.addf %146, %147 : vector<4x32xf32>
    %149 = arith.negf %148 : vector<4x32xf32>
    %150 = math.exp %149 : vector<4x32xf32>
    %cst_26 = arith.constant 1.000000e+00 : f32
    %151 = vector.broadcast %cst_26 : f32 to vector<4x32xf32>
    %152 = arith.addf %151, %150 : vector<4x32xf32>
    %153 = arith.divf %151, %152 : vector<4x32xf32>
    %154 = vector.extract_strided_slice %136 {offsets = [0, 64], sizes = [4, 32], strides = [1, 1]} : vector<4x96xf32> to vector<4x32xf32>
    %155 = vector.extract_strided_slice %137 {offsets = [0, 64], sizes = [4, 32], strides = [1, 1]} : vector<4x96xf32> to vector<4x32xf32>
    %156 = vector.broadcast %3 : vector<1x32xf32> to vector<4x32xf32>
    %157 = arith.addf %155, %156 : vector<4x32xf32>
    %158 = arith.mulf %145, %157 : vector<4x32xf32>
    %159 = arith.addf %154, %158 : vector<4x32xf32>
    %160 = math.tanh %159 : vector<4x32xf32>
    %cst_27 = arith.constant 1.000000e+00 : f32
    %161 = vector.broadcast %cst_27 : f32 to vector<4x32xf32>
    %162 = arith.subf %161, %153 : vector<4x32xf32>
    %163 = arith.mulf %162, %160 : vector<4x32xf32>
    %164 = arith.mulf %153, %135 : vector<4x32xf32>
    %165 = arith.addf %163, %164 : vector<4x32xf32>
    %166 = vector.extract_strided_slice %13 {offsets = [20, 0], sizes = [4, 96], strides = [1, 1]} : vector<40x96xf32> to vector<4x96xf32>
    %cst_28 = arith.constant dense<0.000000e+00> : vector<4x96xf32>
    %167 = tpu.matmul %165, %14, %cst_28 {dimension_numbers = #tpu.dot_dimension_numbers<[1], [0], [0], [1], [0, 0, 1, 1], [], []>} : vector<4x32xf32>, vector<32x96xf32>, vector<4x96xf32> -> vector<4x96xf32>
    %168 = vector.extract_strided_slice %166 {offsets = [0, 0], sizes = [4, 32], strides = [1, 1]} : vector<4x96xf32> to vector<4x32xf32>
    %169 = vector.extract_strided_slice %167 {offsets = [0, 0], sizes = [4, 32], strides = [1, 1]} : vector<4x96xf32> to vector<4x32xf32>
    %170 = arith.addf %168, %169 : vector<4x32xf32>
    %171 = arith.negf %170 : vector<4x32xf32>
    %172 = math.exp %171 : vector<4x32xf32>
    %cst_29 = arith.constant 1.000000e+00 : f32
    %173 = vector.broadcast %cst_29 : f32 to vector<4x32xf32>
    %174 = arith.addf %173, %172 : vector<4x32xf32>
    %175 = arith.divf %173, %174 : vector<4x32xf32>
    %176 = vector.extract_strided_slice %166 {offsets = [0, 32], sizes = [4, 32], strides = [1, 1]} : vector<4x96xf32> to vector<4x32xf32>
    %177 = vector.extract_strided_slice %167 {offsets = [0, 32], sizes = [4, 32], strides = [1, 1]} : vector<4x96xf32> to vector<4x32xf32>
    %178 = arith.addf %176, %177 : vector<4x32xf32>
    %179 = arith.negf %178 : vector<4x32xf32>
    %180 = math.exp %179 : vector<4x32xf32>
    %cst_30 = arith.constant 1.000000e+00 : f32
    %181 = vector.broadcast %cst_30 : f32 to vector<4x32xf32>
    %182 = arith.addf %181, %180 : vector<4x32xf32>
    %183 = arith.divf %181, %182 : vector<4x32xf32>
    %184 = vector.extract_strided_slice %166 {offsets = [0, 64], sizes = [4, 32], strides = [1, 1]} : vector<4x96xf32> to vector<4x32xf32>
    %185 = vector.extract_strided_slice %167 {offsets = [0, 64], sizes = [4, 32], strides = [1, 1]} : vector<4x96xf32> to vector<4x32xf32>
    %186 = vector.broadcast %3 : vector<1x32xf32> to vector<4x32xf32>
    %187 = arith.addf %185, %186 : vector<4x32xf32>
    %188 = arith.mulf %175, %187 : vector<4x32xf32>
    %189 = arith.addf %184, %188 : vector<4x32xf32>
    %190 = math.tanh %189 : vector<4x32xf32>
    %cst_31 = arith.constant 1.000000e+00 : f32
    %191 = vector.broadcast %cst_31 : f32 to vector<4x32xf32>
    %192 = arith.subf %191, %183 : vector<4x32xf32>
    %193 = arith.mulf %192, %190 : vector<4x32xf32>
    %194 = arith.mulf %183, %165 : vector<4x32xf32>
    %195 = arith.addf %193, %194 : vector<4x32xf32>
    %196 = vector.extract_strided_slice %13 {offsets = [24, 0], sizes = [4, 96], strides = [1, 1]} : vector<40x96xf32> to vector<4x96xf32>
    %cst_32 = arith.constant dense<0.000000e+00> : vector<4x96xf32>
    %197 = tpu.matmul %195, %14, %cst_32 {dimension_numbers = #tpu.dot_dimension_numbers<[1], [0], [0], [1], [0, 0, 1, 1], [], []>} : vector<4x32xf32>, vector<32x96xf32>, vector<4x96xf32> -> vector<4x96xf32>
    %198 = vector.extract_strided_slice %196 {offsets = [0, 0], sizes = [4, 32], strides = [1, 1]} : vector<4x96xf32> to vector<4x32xf32>
    %199 = vector.extract_strided_slice %197 {offsets = [0, 0], sizes = [4, 32], strides = [1, 1]} : vector<4x96xf32> to vector<4x32xf32>
    %200 = arith.addf %198, %199 : vector<4x32xf32>
    %201 = arith.negf %200 : vector<4x32xf32>
    %202 = math.exp %201 : vector<4x32xf32>
    %cst_33 = arith.constant 1.000000e+00 : f32
    %203 = vector.broadcast %cst_33 : f32 to vector<4x32xf32>
    %204 = arith.addf %203, %202 : vector<4x32xf32>
    %205 = arith.divf %203, %204 : vector<4x32xf32>
    %206 = vector.extract_strided_slice %196 {offsets = [0, 32], sizes = [4, 32], strides = [1, 1]} : vector<4x96xf32> to vector<4x32xf32>
    %207 = vector.extract_strided_slice %197 {offsets = [0, 32], sizes = [4, 32], strides = [1, 1]} : vector<4x96xf32> to vector<4x32xf32>
    %208 = arith.addf %206, %207 : vector<4x32xf32>
    %209 = arith.negf %208 : vector<4x32xf32>
    %210 = math.exp %209 : vector<4x32xf32>
    %cst_34 = arith.constant 1.000000e+00 : f32
    %211 = vector.broadcast %cst_34 : f32 to vector<4x32xf32>
    %212 = arith.addf %211, %210 : vector<4x32xf32>
    %213 = arith.divf %211, %212 : vector<4x32xf32>
    %214 = vector.extract_strided_slice %196 {offsets = [0, 64], sizes = [4, 32], strides = [1, 1]} : vector<4x96xf32> to vector<4x32xf32>
    %215 = vector.extract_strided_slice %197 {offsets = [0, 64], sizes = [4, 32], strides = [1, 1]} : vector<4x96xf32> to vector<4x32xf32>
    %216 = vector.broadcast %3 : vector<1x32xf32> to vector<4x32xf32>
    %217 = arith.addf %215, %216 : vector<4x32xf32>
    %218 = arith.mulf %205, %217 : vector<4x32xf32>
    %219 = arith.addf %214, %218 : vector<4x32xf32>
    %220 = math.tanh %219 : vector<4x32xf32>
    %cst_35 = arith.constant 1.000000e+00 : f32
    %221 = vector.broadcast %cst_35 : f32 to vector<4x32xf32>
    %222 = arith.subf %221, %213 : vector<4x32xf32>
    %223 = arith.mulf %222, %220 : vector<4x32xf32>
    %224 = arith.mulf %213, %195 : vector<4x32xf32>
    %225 = arith.addf %223, %224 : vector<4x32xf32>
    %226 = vector.extract_strided_slice %13 {offsets = [28, 0], sizes = [4, 96], strides = [1, 1]} : vector<40x96xf32> to vector<4x96xf32>
    %cst_36 = arith.constant dense<0.000000e+00> : vector<4x96xf32>
    %227 = tpu.matmul %225, %14, %cst_36 {dimension_numbers = #tpu.dot_dimension_numbers<[1], [0], [0], [1], [0, 0, 1, 1], [], []>} : vector<4x32xf32>, vector<32x96xf32>, vector<4x96xf32> -> vector<4x96xf32>
    %228 = vector.extract_strided_slice %226 {offsets = [0, 0], sizes = [4, 32], strides = [1, 1]} : vector<4x96xf32> to vector<4x32xf32>
    %229 = vector.extract_strided_slice %227 {offsets = [0, 0], sizes = [4, 32], strides = [1, 1]} : vector<4x96xf32> to vector<4x32xf32>
    %230 = arith.addf %228, %229 : vector<4x32xf32>
    %231 = arith.negf %230 : vector<4x32xf32>
    %232 = math.exp %231 : vector<4x32xf32>
    %cst_37 = arith.constant 1.000000e+00 : f32
    %233 = vector.broadcast %cst_37 : f32 to vector<4x32xf32>
    %234 = arith.addf %233, %232 : vector<4x32xf32>
    %235 = arith.divf %233, %234 : vector<4x32xf32>
    %236 = vector.extract_strided_slice %226 {offsets = [0, 32], sizes = [4, 32], strides = [1, 1]} : vector<4x96xf32> to vector<4x32xf32>
    %237 = vector.extract_strided_slice %227 {offsets = [0, 32], sizes = [4, 32], strides = [1, 1]} : vector<4x96xf32> to vector<4x32xf32>
    %238 = arith.addf %236, %237 : vector<4x32xf32>
    %239 = arith.negf %238 : vector<4x32xf32>
    %240 = math.exp %239 : vector<4x32xf32>
    %cst_38 = arith.constant 1.000000e+00 : f32
    %241 = vector.broadcast %cst_38 : f32 to vector<4x32xf32>
    %242 = arith.addf %241, %240 : vector<4x32xf32>
    %243 = arith.divf %241, %242 : vector<4x32xf32>
    %244 = vector.extract_strided_slice %226 {offsets = [0, 64], sizes = [4, 32], strides = [1, 1]} : vector<4x96xf32> to vector<4x32xf32>
    %245 = vector.extract_strided_slice %227 {offsets = [0, 64], sizes = [4, 32], strides = [1, 1]} : vector<4x96xf32> to vector<4x32xf32>
    %246 = vector.broadcast %3 : vector<1x32xf32> to vector<4x32xf32>
    %247 = arith.addf %245, %246 : vector<4x32xf32>
    %248 = arith.mulf %235, %247 : vector<4x32xf32>
    %249 = arith.addf %244, %248 : vector<4x32xf32>
    %250 = math.tanh %249 : vector<4x32xf32>
    %cst_39 = arith.constant 1.000000e+00 : f32
    %251 = vector.broadcast %cst_39 : f32 to vector<4x32xf32>
    %252 = arith.subf %251, %243 : vector<4x32xf32>
    %253 = arith.mulf %252, %250 : vector<4x32xf32>
    %254 = arith.mulf %243, %225 : vector<4x32xf32>
    %255 = arith.addf %253, %254 : vector<4x32xf32>
    %256 = vector.extract_strided_slice %13 {offsets = [32, 0], sizes = [4, 96], strides = [1, 1]} : vector<40x96xf32> to vector<4x96xf32>
    %cst_40 = arith.constant dense<0.000000e+00> : vector<4x96xf32>
    %257 = tpu.matmul %255, %14, %cst_40 {dimension_numbers = #tpu.dot_dimension_numbers<[1], [0], [0], [1], [0, 0, 1, 1], [], []>} : vector<4x32xf32>, vector<32x96xf32>, vector<4x96xf32> -> vector<4x96xf32>
    %258 = vector.extract_strided_slice %256 {offsets = [0, 0], sizes = [4, 32], strides = [1, 1]} : vector<4x96xf32> to vector<4x32xf32>
    %259 = vector.extract_strided_slice %257 {offsets = [0, 0], sizes = [4, 32], strides = [1, 1]} : vector<4x96xf32> to vector<4x32xf32>
    %260 = arith.addf %258, %259 : vector<4x32xf32>
    %261 = arith.negf %260 : vector<4x32xf32>
    %262 = math.exp %261 : vector<4x32xf32>
    %cst_41 = arith.constant 1.000000e+00 : f32
    %263 = vector.broadcast %cst_41 : f32 to vector<4x32xf32>
    %264 = arith.addf %263, %262 : vector<4x32xf32>
    %265 = arith.divf %263, %264 : vector<4x32xf32>
    %266 = vector.extract_strided_slice %256 {offsets = [0, 32], sizes = [4, 32], strides = [1, 1]} : vector<4x96xf32> to vector<4x32xf32>
    %267 = vector.extract_strided_slice %257 {offsets = [0, 32], sizes = [4, 32], strides = [1, 1]} : vector<4x96xf32> to vector<4x32xf32>
    %268 = arith.addf %266, %267 : vector<4x32xf32>
    %269 = arith.negf %268 : vector<4x32xf32>
    %270 = math.exp %269 : vector<4x32xf32>
    %cst_42 = arith.constant 1.000000e+00 : f32
    %271 = vector.broadcast %cst_42 : f32 to vector<4x32xf32>
    %272 = arith.addf %271, %270 : vector<4x32xf32>
    %273 = arith.divf %271, %272 : vector<4x32xf32>
    %274 = vector.extract_strided_slice %256 {offsets = [0, 64], sizes = [4, 32], strides = [1, 1]} : vector<4x96xf32> to vector<4x32xf32>
    %275 = vector.extract_strided_slice %257 {offsets = [0, 64], sizes = [4, 32], strides = [1, 1]} : vector<4x96xf32> to vector<4x32xf32>
    %276 = vector.broadcast %3 : vector<1x32xf32> to vector<4x32xf32>
    %277 = arith.addf %275, %276 : vector<4x32xf32>
    %278 = arith.mulf %265, %277 : vector<4x32xf32>
    %279 = arith.addf %274, %278 : vector<4x32xf32>
    %280 = math.tanh %279 : vector<4x32xf32>
    %cst_43 = arith.constant 1.000000e+00 : f32
    %281 = vector.broadcast %cst_43 : f32 to vector<4x32xf32>
    %282 = arith.subf %281, %273 : vector<4x32xf32>
    %283 = arith.mulf %282, %280 : vector<4x32xf32>
    %284 = arith.mulf %273, %255 : vector<4x32xf32>
    %285 = arith.addf %283, %284 : vector<4x32xf32>
    %286 = vector.extract_strided_slice %13 {offsets = [36, 0], sizes = [4, 96], strides = [1, 1]} : vector<40x96xf32> to vector<4x96xf32>
    %cst_44 = arith.constant dense<0.000000e+00> : vector<4x96xf32>
    %287 = tpu.matmul %285, %14, %cst_44 {dimension_numbers = #tpu.dot_dimension_numbers<[1], [0], [0], [1], [0, 0, 1, 1], [], []>} : vector<4x32xf32>, vector<32x96xf32>, vector<4x96xf32> -> vector<4x96xf32>
    %288 = vector.extract_strided_slice %286 {offsets = [0, 0], sizes = [4, 32], strides = [1, 1]} : vector<4x96xf32> to vector<4x32xf32>
    %289 = vector.extract_strided_slice %287 {offsets = [0, 0], sizes = [4, 32], strides = [1, 1]} : vector<4x96xf32> to vector<4x32xf32>
    %290 = arith.addf %288, %289 : vector<4x32xf32>
    %291 = arith.negf %290 : vector<4x32xf32>
    %292 = math.exp %291 : vector<4x32xf32>
    %cst_45 = arith.constant 1.000000e+00 : f32
    %293 = vector.broadcast %cst_45 : f32 to vector<4x32xf32>
    %294 = arith.addf %293, %292 : vector<4x32xf32>
    %295 = arith.divf %293, %294 : vector<4x32xf32>
    %296 = vector.extract_strided_slice %286 {offsets = [0, 32], sizes = [4, 32], strides = [1, 1]} : vector<4x96xf32> to vector<4x32xf32>
    %297 = vector.extract_strided_slice %287 {offsets = [0, 32], sizes = [4, 32], strides = [1, 1]} : vector<4x96xf32> to vector<4x32xf32>
    %298 = arith.addf %296, %297 : vector<4x32xf32>
    %299 = arith.negf %298 : vector<4x32xf32>
    %300 = math.exp %299 : vector<4x32xf32>
    %cst_46 = arith.constant 1.000000e+00 : f32
    %301 = vector.broadcast %cst_46 : f32 to vector<4x32xf32>
    %302 = arith.addf %301, %300 : vector<4x32xf32>
    %303 = arith.divf %301, %302 : vector<4x32xf32>
    %304 = vector.extract_strided_slice %286 {offsets = [0, 64], sizes = [4, 32], strides = [1, 1]} : vector<4x96xf32> to vector<4x32xf32>
    %305 = vector.extract_strided_slice %287 {offsets = [0, 64], sizes = [4, 32], strides = [1, 1]} : vector<4x96xf32> to vector<4x32xf32>
    %306 = vector.broadcast %3 : vector<1x32xf32> to vector<4x32xf32>
    %307 = arith.addf %305, %306 : vector<4x32xf32>
    %308 = arith.mulf %295, %307 : vector<4x32xf32>
    %309 = arith.addf %304, %308 : vector<4x32xf32>
    %310 = math.tanh %309 : vector<4x32xf32>
    %cst_47 = arith.constant 1.000000e+00 : f32
    %311 = vector.broadcast %cst_47 : f32 to vector<4x32xf32>
    %312 = arith.subf %311, %303 : vector<4x32xf32>
    %313 = arith.mulf %312, %310 : vector<4x32xf32>
    %314 = arith.mulf %303, %285 : vector<4x32xf32>
    %315 = arith.addf %313, %314 : vector<4x32xf32>
    %316 = tpu.iota {dimensions = array<i32: 1>} : vector<4x10xi32>
    %cst_48 = arith.constant 0.000000e+00 : f32
    %317 = vector.broadcast %cst_48 : f32 to vector<4x10xf32>
    %318 = vector.broadcast %8 : vector<1x1xf32> to vector<4x10xf32>
    %319 = arith.addf %317, %318 : vector<4x10xf32>
    %320 = vector.broadcast %6 : vector<1x32xf32> to vector<4x32xf32>
    %321 = arith.mulf %45, %320 : vector<4x32xf32>
    %cst_49 = arith.constant dense<0.000000e+00> : vector<4xf32>
    %322 = vector.multi_reduction <add>, %321, %cst_49 [1] : vector<4x32xf32> to vector<4xf32>
    %323 = vector.shape_cast %322 : vector<4xf32> to vector<4x1xf32>
    %c0_i32 = arith.constant 0 : i32
    %324 = vector.broadcast %c0_i32 : i32 to vector<4x10xi32>
    %325 = arith.cmpi eq, %316, %324 : vector<4x10xi32>
    %326 = arith.extui %325 : vector<4x10xi1> to vector<4x10xi32>
    %327 = arith.sitofp %326 : vector<4x10xi32> to vector<4x10xf32>
    %328 = vector.broadcast %323 : vector<4x1xf32> to vector<4x10xf32>
    %329 = arith.mulf %328, %327 : vector<4x10xf32>
    %330 = arith.addf %319, %329 : vector<4x10xf32>
    %331 = vector.broadcast %6 : vector<1x32xf32> to vector<4x32xf32>
    %332 = arith.mulf %75, %331 : vector<4x32xf32>
    %cst_50 = arith.constant dense<0.000000e+00> : vector<4xf32>
    %333 = vector.multi_reduction <add>, %332, %cst_50 [1] : vector<4x32xf32> to vector<4xf32>
    %334 = vector.shape_cast %333 : vector<4xf32> to vector<4x1xf32>
    %c1_i32 = arith.constant 1 : i32
    %335 = vector.broadcast %c1_i32 : i32 to vector<4x10xi32>
    %336 = arith.cmpi eq, %316, %335 : vector<4x10xi32>
    %337 = arith.extui %336 : vector<4x10xi1> to vector<4x10xi32>
    %338 = arith.sitofp %337 : vector<4x10xi32> to vector<4x10xf32>
    %339 = vector.broadcast %334 : vector<4x1xf32> to vector<4x10xf32>
    %340 = arith.mulf %339, %338 : vector<4x10xf32>
    %341 = arith.addf %330, %340 : vector<4x10xf32>
    %342 = vector.broadcast %6 : vector<1x32xf32> to vector<4x32xf32>
    %343 = arith.mulf %105, %342 : vector<4x32xf32>
    %cst_51 = arith.constant dense<0.000000e+00> : vector<4xf32>
    %344 = vector.multi_reduction <add>, %343, %cst_51 [1] : vector<4x32xf32> to vector<4xf32>
    %345 = vector.shape_cast %344 : vector<4xf32> to vector<4x1xf32>
    %c2_i32 = arith.constant 2 : i32
    %346 = vector.broadcast %c2_i32 : i32 to vector<4x10xi32>
    %347 = arith.cmpi eq, %316, %346 : vector<4x10xi32>
    %348 = arith.extui %347 : vector<4x10xi1> to vector<4x10xi32>
    %349 = arith.sitofp %348 : vector<4x10xi32> to vector<4x10xf32>
    %350 = vector.broadcast %345 : vector<4x1xf32> to vector<4x10xf32>
    %351 = arith.mulf %350, %349 : vector<4x10xf32>
    %352 = arith.addf %341, %351 : vector<4x10xf32>
    %353 = vector.broadcast %6 : vector<1x32xf32> to vector<4x32xf32>
    %354 = arith.mulf %135, %353 : vector<4x32xf32>
    %cst_52 = arith.constant dense<0.000000e+00> : vector<4xf32>
    %355 = vector.multi_reduction <add>, %354, %cst_52 [1] : vector<4x32xf32> to vector<4xf32>
    %356 = vector.shape_cast %355 : vector<4xf32> to vector<4x1xf32>
    %c3_i32 = arith.constant 3 : i32
    %357 = vector.broadcast %c3_i32 : i32 to vector<4x10xi32>
    %358 = arith.cmpi eq, %316, %357 : vector<4x10xi32>
    %359 = arith.extui %358 : vector<4x10xi1> to vector<4x10xi32>
    %360 = arith.sitofp %359 : vector<4x10xi32> to vector<4x10xf32>
    %361 = vector.broadcast %356 : vector<4x1xf32> to vector<4x10xf32>
    %362 = arith.mulf %361, %360 : vector<4x10xf32>
    %363 = arith.addf %352, %362 : vector<4x10xf32>
    %364 = vector.broadcast %6 : vector<1x32xf32> to vector<4x32xf32>
    %365 = arith.mulf %165, %364 : vector<4x32xf32>
    %cst_53 = arith.constant dense<0.000000e+00> : vector<4xf32>
    %366 = vector.multi_reduction <add>, %365, %cst_53 [1] : vector<4x32xf32> to vector<4xf32>
    %367 = vector.shape_cast %366 : vector<4xf32> to vector<4x1xf32>
    %c4_i32 = arith.constant 4 : i32
    %368 = vector.broadcast %c4_i32 : i32 to vector<4x10xi32>
    %369 = arith.cmpi eq, %316, %368 : vector<4x10xi32>
    %370 = arith.extui %369 : vector<4x10xi1> to vector<4x10xi32>
    %371 = arith.sitofp %370 : vector<4x10xi32> to vector<4x10xf32>
    %372 = vector.broadcast %367 : vector<4x1xf32> to vector<4x10xf32>
    %373 = arith.mulf %372, %371 : vector<4x10xf32>
    %374 = arith.addf %363, %373 : vector<4x10xf32>
    %375 = vector.broadcast %6 : vector<1x32xf32> to vector<4x32xf32>
    %376 = arith.mulf %195, %375 : vector<4x32xf32>
    %cst_54 = arith.constant dense<0.000000e+00> : vector<4xf32>
    %377 = vector.multi_reduction <add>, %376, %cst_54 [1] : vector<4x32xf32> to vector<4xf32>
    %378 = vector.shape_cast %377 : vector<4xf32> to vector<4x1xf32>
    %c5_i32 = arith.constant 5 : i32
    %379 = vector.broadcast %c5_i32 : i32 to vector<4x10xi32>
    %380 = arith.cmpi eq, %316, %379 : vector<4x10xi32>
    %381 = arith.extui %380 : vector<4x10xi1> to vector<4x10xi32>
    %382 = arith.sitofp %381 : vector<4x10xi32> to vector<4x10xf32>
    %383 = vector.broadcast %378 : vector<4x1xf32> to vector<4x10xf32>
    %384 = arith.mulf %383, %382 : vector<4x10xf32>
    %385 = arith.addf %374, %384 : vector<4x10xf32>
    %386 = vector.broadcast %6 : vector<1x32xf32> to vector<4x32xf32>
    %387 = arith.mulf %225, %386 : vector<4x32xf32>
    %cst_55 = arith.constant dense<0.000000e+00> : vector<4xf32>
    %388 = vector.multi_reduction <add>, %387, %cst_55 [1] : vector<4x32xf32> to vector<4xf32>
    %389 = vector.shape_cast %388 : vector<4xf32> to vector<4x1xf32>
    %c6_i32 = arith.constant 6 : i32
    %390 = vector.broadcast %c6_i32 : i32 to vector<4x10xi32>
    %391 = arith.cmpi eq, %316, %390 : vector<4x10xi32>
    %392 = arith.extui %391 : vector<4x10xi1> to vector<4x10xi32>
    %393 = arith.sitofp %392 : vector<4x10xi32> to vector<4x10xf32>
    %394 = vector.broadcast %389 : vector<4x1xf32> to vector<4x10xf32>
    %395 = arith.mulf %394, %393 : vector<4x10xf32>
    %396 = arith.addf %385, %395 : vector<4x10xf32>
    %397 = vector.broadcast %6 : vector<1x32xf32> to vector<4x32xf32>
    %398 = arith.mulf %255, %397 : vector<4x32xf32>
    %cst_56 = arith.constant dense<0.000000e+00> : vector<4xf32>
    %399 = vector.multi_reduction <add>, %398, %cst_56 [1] : vector<4x32xf32> to vector<4xf32>
    %400 = vector.shape_cast %399 : vector<4xf32> to vector<4x1xf32>
    %c7_i32 = arith.constant 7 : i32
    %401 = vector.broadcast %c7_i32 : i32 to vector<4x10xi32>
    %402 = arith.cmpi eq, %316, %401 : vector<4x10xi32>
    %403 = arith.extui %402 : vector<4x10xi1> to vector<4x10xi32>
    %404 = arith.sitofp %403 : vector<4x10xi32> to vector<4x10xf32>
    %405 = vector.broadcast %400 : vector<4x1xf32> to vector<4x10xf32>
    %406 = arith.mulf %405, %404 : vector<4x10xf32>
    %407 = arith.addf %396, %406 : vector<4x10xf32>
    %408 = vector.broadcast %6 : vector<1x32xf32> to vector<4x32xf32>
    %409 = arith.mulf %285, %408 : vector<4x32xf32>
    %cst_57 = arith.constant dense<0.000000e+00> : vector<4xf32>
    %410 = vector.multi_reduction <add>, %409, %cst_57 [1] : vector<4x32xf32> to vector<4xf32>
    %411 = vector.shape_cast %410 : vector<4xf32> to vector<4x1xf32>
    %c8_i32 = arith.constant 8 : i32
    %412 = vector.broadcast %c8_i32 : i32 to vector<4x10xi32>
    %413 = arith.cmpi eq, %316, %412 : vector<4x10xi32>
    %414 = arith.extui %413 : vector<4x10xi1> to vector<4x10xi32>
    %415 = arith.sitofp %414 : vector<4x10xi32> to vector<4x10xf32>
    %416 = vector.broadcast %411 : vector<4x1xf32> to vector<4x10xf32>
    %417 = arith.mulf %416, %415 : vector<4x10xf32>
    %418 = arith.addf %407, %417 : vector<4x10xf32>
    %419 = vector.broadcast %6 : vector<1x32xf32> to vector<4x32xf32>
    %420 = arith.mulf %315, %419 : vector<4x32xf32>
    %cst_58 = arith.constant dense<0.000000e+00> : vector<4xf32>
    %421 = vector.multi_reduction <add>, %420, %cst_58 [1] : vector<4x32xf32> to vector<4xf32>
    %422 = vector.shape_cast %421 : vector<4xf32> to vector<4x1xf32>
    %c9_i32 = arith.constant 9 : i32
    %423 = vector.broadcast %c9_i32 : i32 to vector<4x10xi32>
    %424 = arith.cmpi eq, %316, %423 : vector<4x10xi32>
    %425 = arith.extui %424 : vector<4x10xi1> to vector<4x10xi32>
    %426 = arith.sitofp %425 : vector<4x10xi32> to vector<4x10xf32>
    %427 = vector.broadcast %422 : vector<4x1xf32> to vector<4x10xf32>
    %428 = arith.mulf %427, %426 : vector<4x10xf32>
    %429 = arith.addf %418, %428 : vector<4x10xf32>
    %c0_59 = arith.constant 0 : index
    %c0_60 = arith.constant 0 : index
    %430 = vector.load %arg1[%c0_59, %c0_60] : memref<28x12xf32, #tpu.memory_space<vmem>>, vector<28x12xf32>
    %c0_61 = arith.constant 0 : index
    %c0_62 = arith.constant 0 : index
    %431 = vector.load %arg4[%c0_61, %c0_62] : memref<12x96xf32, #tpu.memory_space<vmem>>, vector<12x96xf32>
    %cst_63 = arith.constant dense<0.000000e+00> : vector<28x96xf32>
    %432 = tpu.matmul %430, %431, %cst_63 {dimension_numbers = #tpu.dot_dimension_numbers<[1], [0], [0], [1], [0, 0, 1, 1], [], []>} : vector<28x12xf32>, vector<12x96xf32>, vector<28x96xf32> -> vector<28x96xf32>
    %433 = vector.broadcast %2 : vector<1x96xf32> to vector<28x96xf32>
    %434 = arith.addf %432, %433 : vector<28x96xf32>
    %c0_64 = arith.constant 0 : index
    %c0_65 = arith.constant 0 : index
    %435 = vector.load %arg5[%c0_64, %c0_65] : memref<64x128xf32, #tpu.memory_space<vmem>>, vector<64x128xf32>
    %436 = vector.broadcast %5 : vector<1x32xf32> to vector<4x32xf32>
    %437 = arith.mulf %315, %436 : vector<4x32xf32>
    %cst_66 = arith.constant dense<0.000000e+00> : vector<4xf32>
    %438 = vector.multi_reduction <add>, %437, %cst_66 [1] : vector<4x32xf32> to vector<4xf32>
    %439 = vector.shape_cast %438 : vector<4xf32> to vector<4x1xf32>
    %440 = vector.broadcast %439 : vector<4x1xf32> to vector<4x10xf32>
    %441 = arith.addf %429, %440 : vector<4x10xf32>
    %cst_67 = arith.constant 0.000000e+00 : f32
    %442 = vector.broadcast %cst_67 : f32 to vector<4x10xf32>
    %443 = arith.maximumf %441, %442 : vector<4x10xf32>
    %cst_68 = arith.constant dense<0xFF800000> : vector<4xf32>
    %444 = vector.multi_reduction <maximumf>, %443, %cst_68 [1] : vector<4x10xf32> to vector<4xf32>
    %445 = vector.shape_cast %444 : vector<4xf32> to vector<4x1xf32>
    %446 = vector.broadcast %445 : vector<4x1xf32> to vector<4x10xf32>
    %447 = arith.subf %443, %446 : vector<4x10xf32>
    %448 = math.exp %447 : vector<4x10xf32>
    %cst_69 = arith.constant dense<0.000000e+00> : vector<4xf32>
    %449 = vector.multi_reduction <add>, %448, %cst_69 [1] : vector<4x10xf32> to vector<4xf32>
    %450 = vector.shape_cast %449 : vector<4xf32> to vector<4x1xf32>
    %451 = vector.broadcast %450 : vector<4x1xf32> to vector<4x10xf32>
    %452 = arith.divf %448, %451 : vector<4x10xf32>
    %453 = vector.extract_strided_slice %452 {offsets = [0, 0], sizes = [4, 1], strides = [1, 1]} : vector<4x10xf32> to vector<4x1xf32>
    %454 = vector.broadcast %453 : vector<4x1xf32> to vector<4x32xf32>
    %455 = arith.mulf %454, %45 : vector<4x32xf32>
    %456 = vector.extract_strided_slice %452 {offsets = [0, 1], sizes = [4, 1], strides = [1, 1]} : vector<4x10xf32> to vector<4x1xf32>
    %457 = vector.broadcast %456 : vector<4x1xf32> to vector<4x32xf32>
    %458 = arith.mulf %457, %75 : vector<4x32xf32>
    %459 = arith.addf %455, %458 : vector<4x32xf32>
    %460 = vector.extract_strided_slice %452 {offsets = [0, 2], sizes = [4, 1], strides = [1, 1]} : vector<4x10xf32> to vector<4x1xf32>
    %461 = vector.broadcast %460 : vector<4x1xf32> to vector<4x32xf32>
    %462 = arith.mulf %461, %105 : vector<4x32xf32>
    %463 = arith.addf %459, %462 : vector<4x32xf32>
    %464 = vector.extract_strided_slice %452 {offsets = [0, 3], sizes = [4, 1], strides = [1, 1]} : vector<4x10xf32> to vector<4x1xf32>
    %465 = vector.broadcast %464 : vector<4x1xf32> to vector<4x32xf32>
    %466 = arith.mulf %465, %135 : vector<4x32xf32>
    %467 = arith.addf %463, %466 : vector<4x32xf32>
    %468 = vector.extract_strided_slice %452 {offsets = [0, 4], sizes = [4, 1], strides = [1, 1]} : vector<4x10xf32> to vector<4x1xf32>
    %469 = vector.broadcast %468 : vector<4x1xf32> to vector<4x32xf32>
    %470 = arith.mulf %469, %165 : vector<4x32xf32>
    %471 = arith.addf %467, %470 : vector<4x32xf32>
    %472 = vector.extract_strided_slice %452 {offsets = [0, 5], sizes = [4, 1], strides = [1, 1]} : vector<4x10xf32> to vector<4x1xf32>
    %473 = vector.broadcast %472 : vector<4x1xf32> to vector<4x32xf32>
    %474 = arith.mulf %473, %195 : vector<4x32xf32>
    %475 = arith.addf %471, %474 : vector<4x32xf32>
    %476 = vector.extract_strided_slice %452 {offsets = [0, 6], sizes = [4, 1], strides = [1, 1]} : vector<4x10xf32> to vector<4x1xf32>
    %477 = vector.broadcast %476 : vector<4x1xf32> to vector<4x32xf32>
    %478 = arith.mulf %477, %225 : vector<4x32xf32>
    %479 = arith.addf %475, %478 : vector<4x32xf32>
    %480 = vector.extract_strided_slice %452 {offsets = [0, 7], sizes = [4, 1], strides = [1, 1]} : vector<4x10xf32> to vector<4x1xf32>
    %481 = vector.broadcast %480 : vector<4x1xf32> to vector<4x32xf32>
    %482 = arith.mulf %481, %255 : vector<4x32xf32>
    %483 = arith.addf %479, %482 : vector<4x32xf32>
    %484 = vector.extract_strided_slice %452 {offsets = [0, 8], sizes = [4, 1], strides = [1, 1]} : vector<4x10xf32> to vector<4x1xf32>
    %485 = vector.broadcast %484 : vector<4x1xf32> to vector<4x32xf32>
    %486 = arith.mulf %485, %285 : vector<4x32xf32>
    %487 = arith.addf %483, %486 : vector<4x32xf32>
    %488 = vector.extract_strided_slice %452 {offsets = [0, 9], sizes = [4, 1], strides = [1, 1]} : vector<4x10xf32> to vector<4x1xf32>
    %489 = vector.broadcast %488 : vector<4x1xf32> to vector<4x32xf32>
    %490 = arith.mulf %489, %315 : vector<4x32xf32>
    %491 = arith.addf %487, %490 : vector<4x32xf32>
    %492 = tpu.concatenate %491, %315 in 1 : vector<4x32xf32>, vector<4x32xf32> -> vector<4x64xf32>
    %cst_70 = arith.constant dense<0.000000e+00> : vector<4x128xf32>
    %493 = tpu.matmul %492, %435, %cst_70 {dimension_numbers = #tpu.dot_dimension_numbers<[1], [0], [0], [1], [0, 0, 1, 1], [], []>} : vector<4x64xf32>, vector<64x128xf32>, vector<4x128xf32> -> vector<4x128xf32>
    %494 = vector.extract_strided_slice %434 {offsets = [0, 0], sizes = [4, 96], strides = [1, 1]} : vector<28x96xf32> to vector<4x96xf32>
    %495 = vector.extract_strided_slice %493 {offsets = [0, 0], sizes = [4, 64], strides = [1, 1]} : vector<4x128xf32> to vector<4x64xf32>
    %496 = vector.extract_strided_slice %494 {offsets = [0, 0], sizes = [4, 64], strides = [1, 1]} : vector<4x96xf32> to vector<4x64xf32>
    %497 = arith.addf %495, %496 : vector<4x64xf32>
    %498 = arith.negf %497 : vector<4x64xf32>
    %499 = math.exp %498 : vector<4x64xf32>
    %cst_71 = arith.constant 1.000000e+00 : f32
    %500 = vector.broadcast %cst_71 : f32 to vector<4x64xf32>
    %501 = arith.addf %500, %499 : vector<4x64xf32>
    %502 = arith.divf %500, %501 : vector<4x64xf32>
    %503 = vector.extract_strided_slice %502 {offsets = [0, 0], sizes = [4, 32], strides = [1, 1]} : vector<4x64xf32> to vector<4x32xf32>
    %504 = vector.extract_strided_slice %502 {offsets = [0, 32], sizes = [4, 32], strides = [1, 1]} : vector<4x64xf32> to vector<4x32xf32>
    %505 = vector.extract_strided_slice %493 {offsets = [0, 64], sizes = [4, 32], strides = [1, 1]} : vector<4x128xf32> to vector<4x32xf32>
    %506 = vector.extract_strided_slice %494 {offsets = [0, 64], sizes = [4, 32], strides = [1, 1]} : vector<4x96xf32> to vector<4x32xf32>
    %507 = arith.addf %505, %506 : vector<4x32xf32>
    %508 = vector.extract_strided_slice %493 {offsets = [0, 96], sizes = [4, 32], strides = [1, 1]} : vector<4x128xf32> to vector<4x32xf32>
    %509 = vector.broadcast %4 : vector<1x32xf32> to vector<4x32xf32>
    %510 = arith.addf %508, %509 : vector<4x32xf32>
    %511 = arith.mulf %503, %510 : vector<4x32xf32>
    %512 = arith.addf %507, %511 : vector<4x32xf32>
    %513 = math.tanh %512 : vector<4x32xf32>
    %cst_72 = arith.constant 1.000000e+00 : f32
    %514 = vector.broadcast %cst_72 : f32 to vector<4x32xf32>
    %515 = arith.subf %514, %504 : vector<4x32xf32>
    %516 = arith.mulf %515, %513 : vector<4x32xf32>
    %517 = arith.mulf %504, %315 : vector<4x32xf32>
    %518 = arith.addf %516, %517 : vector<4x32xf32>
    %519 = vector.broadcast %5 : vector<1x32xf32> to vector<4x32xf32>
    %520 = arith.mulf %518, %519 : vector<4x32xf32>
    %cst_73 = arith.constant dense<0.000000e+00> : vector<4xf32>
    %521 = vector.multi_reduction <add>, %520, %cst_73 [1] : vector<4x32xf32> to vector<4xf32>
    %522 = vector.shape_cast %521 : vector<4xf32> to vector<4x1xf32>
    %523 = vector.broadcast %522 : vector<4x1xf32> to vector<4x10xf32>
    %524 = arith.addf %429, %523 : vector<4x10xf32>
    %cst_74 = arith.constant 0.000000e+00 : f32
    %525 = vector.broadcast %cst_74 : f32 to vector<4x10xf32>
    %526 = arith.maximumf %524, %525 : vector<4x10xf32>
    %cst_75 = arith.constant dense<0xFF800000> : vector<4xf32>
    %527 = vector.multi_reduction <maximumf>, %526, %cst_75 [1] : vector<4x10xf32> to vector<4xf32>
    %528 = vector.shape_cast %527 : vector<4xf32> to vector<4x1xf32>
    %529 = vector.broadcast %528 : vector<4x1xf32> to vector<4x10xf32>
    %530 = arith.subf %526, %529 : vector<4x10xf32>
    %531 = math.exp %530 : vector<4x10xf32>
    %cst_76 = arith.constant dense<0.000000e+00> : vector<4xf32>
    %532 = vector.multi_reduction <add>, %531, %cst_76 [1] : vector<4x10xf32> to vector<4xf32>
    %533 = vector.shape_cast %532 : vector<4xf32> to vector<4x1xf32>
    %534 = vector.broadcast %533 : vector<4x1xf32> to vector<4x10xf32>
    %535 = arith.divf %531, %534 : vector<4x10xf32>
    %536 = vector.extract_strided_slice %535 {offsets = [0, 0], sizes = [4, 1], strides = [1, 1]} : vector<4x10xf32> to vector<4x1xf32>
    %537 = vector.broadcast %536 : vector<4x1xf32> to vector<4x32xf32>
    %538 = arith.mulf %537, %45 : vector<4x32xf32>
    %539 = vector.extract_strided_slice %535 {offsets = [0, 1], sizes = [4, 1], strides = [1, 1]} : vector<4x10xf32> to vector<4x1xf32>
    %540 = vector.broadcast %539 : vector<4x1xf32> to vector<4x32xf32>
    %541 = arith.mulf %540, %75 : vector<4x32xf32>
    %542 = arith.addf %538, %541 : vector<4x32xf32>
    %543 = vector.extract_strided_slice %535 {offsets = [0, 2], sizes = [4, 1], strides = [1, 1]} : vector<4x10xf32> to vector<4x1xf32>
    %544 = vector.broadcast %543 : vector<4x1xf32> to vector<4x32xf32>
    %545 = arith.mulf %544, %105 : vector<4x32xf32>
    %546 = arith.addf %542, %545 : vector<4x32xf32>
    %547 = vector.extract_strided_slice %535 {offsets = [0, 3], sizes = [4, 1], strides = [1, 1]} : vector<4x10xf32> to vector<4x1xf32>
    %548 = vector.broadcast %547 : vector<4x1xf32> to vector<4x32xf32>
    %549 = arith.mulf %548, %135 : vector<4x32xf32>
    %550 = arith.addf %546, %549 : vector<4x32xf32>
    %551 = vector.extract_strided_slice %535 {offsets = [0, 4], sizes = [4, 1], strides = [1, 1]} : vector<4x10xf32> to vector<4x1xf32>
    %552 = vector.broadcast %551 : vector<4x1xf32> to vector<4x32xf32>
    %553 = arith.mulf %552, %165 : vector<4x32xf32>
    %554 = arith.addf %550, %553 : vector<4x32xf32>
    %555 = vector.extract_strided_slice %535 {offsets = [0, 5], sizes = [4, 1], strides = [1, 1]} : vector<4x10xf32> to vector<4x1xf32>
    %556 = vector.broadcast %555 : vector<4x1xf32> to vector<4x32xf32>
    %557 = arith.mulf %556, %195 : vector<4x32xf32>
    %558 = arith.addf %554, %557 : vector<4x32xf32>
    %559 = vector.extract_strided_slice %535 {offsets = [0, 6], sizes = [4, 1], strides = [1, 1]} : vector<4x10xf32> to vector<4x1xf32>
    %560 = vector.broadcast %559 : vector<4x1xf32> to vector<4x32xf32>
    %561 = arith.mulf %560, %225 : vector<4x32xf32>
    %562 = arith.addf %558, %561 : vector<4x32xf32>
    %563 = vector.extract_strided_slice %535 {offsets = [0, 7], sizes = [4, 1], strides = [1, 1]} : vector<4x10xf32> to vector<4x1xf32>
    %564 = vector.broadcast %563 : vector<4x1xf32> to vector<4x32xf32>
    %565 = arith.mulf %564, %255 : vector<4x32xf32>
    %566 = arith.addf %562, %565 : vector<4x32xf32>
    %567 = vector.extract_strided_slice %535 {offsets = [0, 8], sizes = [4, 1], strides = [1, 1]} : vector<4x10xf32> to vector<4x1xf32>
    %568 = vector.broadcast %567 : vector<4x1xf32> to vector<4x32xf32>
    %569 = arith.mulf %568, %285 : vector<4x32xf32>
    %570 = arith.addf %566, %569 : vector<4x32xf32>
    %571 = vector.extract_strided_slice %535 {offsets = [0, 9], sizes = [4, 1], strides = [1, 1]} : vector<4x10xf32> to vector<4x1xf32>
    %572 = vector.broadcast %571 : vector<4x1xf32> to vector<4x32xf32>
    %573 = arith.mulf %572, %315 : vector<4x32xf32>
    %574 = arith.addf %570, %573 : vector<4x32xf32>
    %575 = tpu.concatenate %574, %518 in 1 : vector<4x32xf32>, vector<4x32xf32> -> vector<4x64xf32>
    %cst_77 = arith.constant dense<0.000000e+00> : vector<4x128xf32>
    %576 = tpu.matmul %575, %435, %cst_77 {dimension_numbers = #tpu.dot_dimension_numbers<[1], [0], [0], [1], [0, 0, 1, 1], [], []>} : vector<4x64xf32>, vector<64x128xf32>, vector<4x128xf32> -> vector<4x128xf32>
    %577 = vector.extract_strided_slice %434 {offsets = [4, 0], sizes = [4, 96], strides = [1, 1]} : vector<28x96xf32> to vector<4x96xf32>
    %578 = vector.extract_strided_slice %576 {offsets = [0, 0], sizes = [4, 64], strides = [1, 1]} : vector<4x128xf32> to vector<4x64xf32>
    %579 = vector.extract_strided_slice %577 {offsets = [0, 0], sizes = [4, 64], strides = [1, 1]} : vector<4x96xf32> to vector<4x64xf32>
    %580 = arith.addf %578, %579 : vector<4x64xf32>
    %581 = arith.negf %580 : vector<4x64xf32>
    %582 = math.exp %581 : vector<4x64xf32>
    %cst_78 = arith.constant 1.000000e+00 : f32
    %583 = vector.broadcast %cst_78 : f32 to vector<4x64xf32>
    %584 = arith.addf %583, %582 : vector<4x64xf32>
    %585 = arith.divf %583, %584 : vector<4x64xf32>
    %586 = vector.extract_strided_slice %585 {offsets = [0, 0], sizes = [4, 32], strides = [1, 1]} : vector<4x64xf32> to vector<4x32xf32>
    %587 = vector.extract_strided_slice %585 {offsets = [0, 32], sizes = [4, 32], strides = [1, 1]} : vector<4x64xf32> to vector<4x32xf32>
    %588 = vector.extract_strided_slice %576 {offsets = [0, 64], sizes = [4, 32], strides = [1, 1]} : vector<4x128xf32> to vector<4x32xf32>
    %589 = vector.extract_strided_slice %577 {offsets = [0, 64], sizes = [4, 32], strides = [1, 1]} : vector<4x96xf32> to vector<4x32xf32>
    %590 = arith.addf %588, %589 : vector<4x32xf32>
    %591 = vector.extract_strided_slice %576 {offsets = [0, 96], sizes = [4, 32], strides = [1, 1]} : vector<4x128xf32> to vector<4x32xf32>
    %592 = vector.broadcast %4 : vector<1x32xf32> to vector<4x32xf32>
    %593 = arith.addf %591, %592 : vector<4x32xf32>
    %594 = arith.mulf %586, %593 : vector<4x32xf32>
    %595 = arith.addf %590, %594 : vector<4x32xf32>
    %596 = math.tanh %595 : vector<4x32xf32>
    %cst_79 = arith.constant 1.000000e+00 : f32
    %597 = vector.broadcast %cst_79 : f32 to vector<4x32xf32>
    %598 = arith.subf %597, %587 : vector<4x32xf32>
    %599 = arith.mulf %598, %596 : vector<4x32xf32>
    %600 = arith.mulf %587, %518 : vector<4x32xf32>
    %601 = arith.addf %599, %600 : vector<4x32xf32>
    %602 = vector.broadcast %5 : vector<1x32xf32> to vector<4x32xf32>
    %603 = arith.mulf %601, %602 : vector<4x32xf32>
    %cst_80 = arith.constant dense<0.000000e+00> : vector<4xf32>
    %604 = vector.multi_reduction <add>, %603, %cst_80 [1] : vector<4x32xf32> to vector<4xf32>
    %605 = vector.shape_cast %604 : vector<4xf32> to vector<4x1xf32>
    %606 = vector.broadcast %605 : vector<4x1xf32> to vector<4x10xf32>
    %607 = arith.addf %429, %606 : vector<4x10xf32>
    %cst_81 = arith.constant 0.000000e+00 : f32
    %608 = vector.broadcast %cst_81 : f32 to vector<4x10xf32>
    %609 = arith.maximumf %607, %608 : vector<4x10xf32>
    %cst_82 = arith.constant dense<0xFF800000> : vector<4xf32>
    %610 = vector.multi_reduction <maximumf>, %609, %cst_82 [1] : vector<4x10xf32> to vector<4xf32>
    %611 = vector.shape_cast %610 : vector<4xf32> to vector<4x1xf32>
    %612 = vector.broadcast %611 : vector<4x1xf32> to vector<4x10xf32>
    %613 = arith.subf %609, %612 : vector<4x10xf32>
    %614 = math.exp %613 : vector<4x10xf32>
    %cst_83 = arith.constant dense<0.000000e+00> : vector<4xf32>
    %615 = vector.multi_reduction <add>, %614, %cst_83 [1] : vector<4x10xf32> to vector<4xf32>
    %616 = vector.shape_cast %615 : vector<4xf32> to vector<4x1xf32>
    %617 = vector.broadcast %616 : vector<4x1xf32> to vector<4x10xf32>
    %618 = arith.divf %614, %617 : vector<4x10xf32>
    %619 = vector.extract_strided_slice %618 {offsets = [0, 0], sizes = [4, 1], strides = [1, 1]} : vector<4x10xf32> to vector<4x1xf32>
    %620 = vector.broadcast %619 : vector<4x1xf32> to vector<4x32xf32>
    %621 = arith.mulf %620, %45 : vector<4x32xf32>
    %622 = vector.extract_strided_slice %618 {offsets = [0, 1], sizes = [4, 1], strides = [1, 1]} : vector<4x10xf32> to vector<4x1xf32>
    %623 = vector.broadcast %622 : vector<4x1xf32> to vector<4x32xf32>
    %624 = arith.mulf %623, %75 : vector<4x32xf32>
    %625 = arith.addf %621, %624 : vector<4x32xf32>
    %626 = vector.extract_strided_slice %618 {offsets = [0, 2], sizes = [4, 1], strides = [1, 1]} : vector<4x10xf32> to vector<4x1xf32>
    %627 = vector.broadcast %626 : vector<4x1xf32> to vector<4x32xf32>
    %628 = arith.mulf %627, %105 : vector<4x32xf32>
    %629 = arith.addf %625, %628 : vector<4x32xf32>
    %630 = vector.extract_strided_slice %618 {offsets = [0, 3], sizes = [4, 1], strides = [1, 1]} : vector<4x10xf32> to vector<4x1xf32>
    %631 = vector.broadcast %630 : vector<4x1xf32> to vector<4x32xf32>
    %632 = arith.mulf %631, %135 : vector<4x32xf32>
    %633 = arith.addf %629, %632 : vector<4x32xf32>
    %634 = vector.extract_strided_slice %618 {offsets = [0, 4], sizes = [4, 1], strides = [1, 1]} : vector<4x10xf32> to vector<4x1xf32>
    %635 = vector.broadcast %634 : vector<4x1xf32> to vector<4x32xf32>
    %636 = arith.mulf %635, %165 : vector<4x32xf32>
    %637 = arith.addf %633, %636 : vector<4x32xf32>
    %638 = vector.extract_strided_slice %618 {offsets = [0, 5], sizes = [4, 1], strides = [1, 1]} : vector<4x10xf32> to vector<4x1xf32>
    %639 = vector.broadcast %638 : vector<4x1xf32> to vector<4x32xf32>
    %640 = arith.mulf %639, %195 : vector<4x32xf32>
    %641 = arith.addf %637, %640 : vector<4x32xf32>
    %642 = vector.extract_strided_slice %618 {offsets = [0, 6], sizes = [4, 1], strides = [1, 1]} : vector<4x10xf32> to vector<4x1xf32>
    %643 = vector.broadcast %642 : vector<4x1xf32> to vector<4x32xf32>
    %644 = arith.mulf %643, %225 : vector<4x32xf32>
    %645 = arith.addf %641, %644 : vector<4x32xf32>
    %646 = vector.extract_strided_slice %618 {offsets = [0, 7], sizes = [4, 1], strides = [1, 1]} : vector<4x10xf32> to vector<4x1xf32>
    %647 = vector.broadcast %646 : vector<4x1xf32> to vector<4x32xf32>
    %648 = arith.mulf %647, %255 : vector<4x32xf32>
    %649 = arith.addf %645, %648 : vector<4x32xf32>
    %650 = vector.extract_strided_slice %618 {offsets = [0, 8], sizes = [4, 1], strides = [1, 1]} : vector<4x10xf32> to vector<4x1xf32>
    %651 = vector.broadcast %650 : vector<4x1xf32> to vector<4x32xf32>
    %652 = arith.mulf %651, %285 : vector<4x32xf32>
    %653 = arith.addf %649, %652 : vector<4x32xf32>
    %654 = vector.extract_strided_slice %618 {offsets = [0, 9], sizes = [4, 1], strides = [1, 1]} : vector<4x10xf32> to vector<4x1xf32>
    %655 = vector.broadcast %654 : vector<4x1xf32> to vector<4x32xf32>
    %656 = arith.mulf %655, %315 : vector<4x32xf32>
    %657 = arith.addf %653, %656 : vector<4x32xf32>
    %658 = tpu.concatenate %657, %601 in 1 : vector<4x32xf32>, vector<4x32xf32> -> vector<4x64xf32>
    %cst_84 = arith.constant dense<0.000000e+00> : vector<4x128xf32>
    %659 = tpu.matmul %658, %435, %cst_84 {dimension_numbers = #tpu.dot_dimension_numbers<[1], [0], [0], [1], [0, 0, 1, 1], [], []>} : vector<4x64xf32>, vector<64x128xf32>, vector<4x128xf32> -> vector<4x128xf32>
    %660 = vector.extract_strided_slice %434 {offsets = [8, 0], sizes = [4, 96], strides = [1, 1]} : vector<28x96xf32> to vector<4x96xf32>
    %661 = vector.extract_strided_slice %659 {offsets = [0, 0], sizes = [4, 64], strides = [1, 1]} : vector<4x128xf32> to vector<4x64xf32>
    %662 = vector.extract_strided_slice %660 {offsets = [0, 0], sizes = [4, 64], strides = [1, 1]} : vector<4x96xf32> to vector<4x64xf32>
    %663 = arith.addf %661, %662 : vector<4x64xf32>
    %664 = arith.negf %663 : vector<4x64xf32>
    %665 = math.exp %664 : vector<4x64xf32>
    %cst_85 = arith.constant 1.000000e+00 : f32
    %666 = vector.broadcast %cst_85 : f32 to vector<4x64xf32>
    %667 = arith.addf %666, %665 : vector<4x64xf32>
    %668 = arith.divf %666, %667 : vector<4x64xf32>
    %669 = vector.extract_strided_slice %668 {offsets = [0, 0], sizes = [4, 32], strides = [1, 1]} : vector<4x64xf32> to vector<4x32xf32>
    %670 = vector.extract_strided_slice %668 {offsets = [0, 32], sizes = [4, 32], strides = [1, 1]} : vector<4x64xf32> to vector<4x32xf32>
    %671 = vector.extract_strided_slice %659 {offsets = [0, 64], sizes = [4, 32], strides = [1, 1]} : vector<4x128xf32> to vector<4x32xf32>
    %672 = vector.extract_strided_slice %660 {offsets = [0, 64], sizes = [4, 32], strides = [1, 1]} : vector<4x96xf32> to vector<4x32xf32>
    %673 = arith.addf %671, %672 : vector<4x32xf32>
    %674 = vector.extract_strided_slice %659 {offsets = [0, 96], sizes = [4, 32], strides = [1, 1]} : vector<4x128xf32> to vector<4x32xf32>
    %675 = vector.broadcast %4 : vector<1x32xf32> to vector<4x32xf32>
    %676 = arith.addf %674, %675 : vector<4x32xf32>
    %677 = arith.mulf %669, %676 : vector<4x32xf32>
    %678 = arith.addf %673, %677 : vector<4x32xf32>
    %679 = math.tanh %678 : vector<4x32xf32>
    %cst_86 = arith.constant 1.000000e+00 : f32
    %680 = vector.broadcast %cst_86 : f32 to vector<4x32xf32>
    %681 = arith.subf %680, %670 : vector<4x32xf32>
    %682 = arith.mulf %681, %679 : vector<4x32xf32>
    %683 = arith.mulf %670, %601 : vector<4x32xf32>
    %684 = arith.addf %682, %683 : vector<4x32xf32>
    %685 = vector.broadcast %5 : vector<1x32xf32> to vector<4x32xf32>
    %686 = arith.mulf %684, %685 : vector<4x32xf32>
    %cst_87 = arith.constant dense<0.000000e+00> : vector<4xf32>
    %687 = vector.multi_reduction <add>, %686, %cst_87 [1] : vector<4x32xf32> to vector<4xf32>
    %688 = vector.shape_cast %687 : vector<4xf32> to vector<4x1xf32>
    %689 = vector.broadcast %688 : vector<4x1xf32> to vector<4x10xf32>
    %690 = arith.addf %429, %689 : vector<4x10xf32>
    %cst_88 = arith.constant 0.000000e+00 : f32
    %691 = vector.broadcast %cst_88 : f32 to vector<4x10xf32>
    %692 = arith.maximumf %690, %691 : vector<4x10xf32>
    %cst_89 = arith.constant dense<0xFF800000> : vector<4xf32>
    %693 = vector.multi_reduction <maximumf>, %692, %cst_89 [1] : vector<4x10xf32> to vector<4xf32>
    %694 = vector.shape_cast %693 : vector<4xf32> to vector<4x1xf32>
    %695 = vector.broadcast %694 : vector<4x1xf32> to vector<4x10xf32>
    %696 = arith.subf %692, %695 : vector<4x10xf32>
    %697 = math.exp %696 : vector<4x10xf32>
    %cst_90 = arith.constant dense<0.000000e+00> : vector<4xf32>
    %698 = vector.multi_reduction <add>, %697, %cst_90 [1] : vector<4x10xf32> to vector<4xf32>
    %699 = vector.shape_cast %698 : vector<4xf32> to vector<4x1xf32>
    %700 = vector.broadcast %699 : vector<4x1xf32> to vector<4x10xf32>
    %701 = arith.divf %697, %700 : vector<4x10xf32>
    %702 = vector.extract_strided_slice %701 {offsets = [0, 0], sizes = [4, 1], strides = [1, 1]} : vector<4x10xf32> to vector<4x1xf32>
    %703 = vector.broadcast %702 : vector<4x1xf32> to vector<4x32xf32>
    %704 = arith.mulf %703, %45 : vector<4x32xf32>
    %705 = vector.extract_strided_slice %701 {offsets = [0, 1], sizes = [4, 1], strides = [1, 1]} : vector<4x10xf32> to vector<4x1xf32>
    %706 = vector.broadcast %705 : vector<4x1xf32> to vector<4x32xf32>
    %707 = arith.mulf %706, %75 : vector<4x32xf32>
    %708 = arith.addf %704, %707 : vector<4x32xf32>
    %709 = vector.extract_strided_slice %701 {offsets = [0, 2], sizes = [4, 1], strides = [1, 1]} : vector<4x10xf32> to vector<4x1xf32>
    %710 = vector.broadcast %709 : vector<4x1xf32> to vector<4x32xf32>
    %711 = arith.mulf %710, %105 : vector<4x32xf32>
    %712 = arith.addf %708, %711 : vector<4x32xf32>
    %713 = vector.extract_strided_slice %701 {offsets = [0, 3], sizes = [4, 1], strides = [1, 1]} : vector<4x10xf32> to vector<4x1xf32>
    %714 = vector.broadcast %713 : vector<4x1xf32> to vector<4x32xf32>
    %715 = arith.mulf %714, %135 : vector<4x32xf32>
    %716 = arith.addf %712, %715 : vector<4x32xf32>
    %717 = vector.extract_strided_slice %701 {offsets = [0, 4], sizes = [4, 1], strides = [1, 1]} : vector<4x10xf32> to vector<4x1xf32>
    %718 = vector.broadcast %717 : vector<4x1xf32> to vector<4x32xf32>
    %719 = arith.mulf %718, %165 : vector<4x32xf32>
    %720 = arith.addf %716, %719 : vector<4x32xf32>
    %721 = vector.extract_strided_slice %701 {offsets = [0, 5], sizes = [4, 1], strides = [1, 1]} : vector<4x10xf32> to vector<4x1xf32>
    %722 = vector.broadcast %721 : vector<4x1xf32> to vector<4x32xf32>
    %723 = arith.mulf %722, %195 : vector<4x32xf32>
    %724 = arith.addf %720, %723 : vector<4x32xf32>
    %725 = vector.extract_strided_slice %701 {offsets = [0, 6], sizes = [4, 1], strides = [1, 1]} : vector<4x10xf32> to vector<4x1xf32>
    %726 = vector.broadcast %725 : vector<4x1xf32> to vector<4x32xf32>
    %727 = arith.mulf %726, %225 : vector<4x32xf32>
    %728 = arith.addf %724, %727 : vector<4x32xf32>
    %729 = vector.extract_strided_slice %701 {offsets = [0, 7], sizes = [4, 1], strides = [1, 1]} : vector<4x10xf32> to vector<4x1xf32>
    %730 = vector.broadcast %729 : vector<4x1xf32> to vector<4x32xf32>
    %731 = arith.mulf %730, %255 : vector<4x32xf32>
    %732 = arith.addf %728, %731 : vector<4x32xf32>
    %733 = vector.extract_strided_slice %701 {offsets = [0, 8], sizes = [4, 1], strides = [1, 1]} : vector<4x10xf32> to vector<4x1xf32>
    %734 = vector.broadcast %733 : vector<4x1xf32> to vector<4x32xf32>
    %735 = arith.mulf %734, %285 : vector<4x32xf32>
    %736 = arith.addf %732, %735 : vector<4x32xf32>
    %737 = vector.extract_strided_slice %701 {offsets = [0, 9], sizes = [4, 1], strides = [1, 1]} : vector<4x10xf32> to vector<4x1xf32>
    %738 = vector.broadcast %737 : vector<4x1xf32> to vector<4x32xf32>
    %739 = arith.mulf %738, %315 : vector<4x32xf32>
    %740 = arith.addf %736, %739 : vector<4x32xf32>
    %741 = tpu.concatenate %740, %684 in 1 : vector<4x32xf32>, vector<4x32xf32> -> vector<4x64xf32>
    %cst_91 = arith.constant dense<0.000000e+00> : vector<4x128xf32>
    %742 = tpu.matmul %741, %435, %cst_91 {dimension_numbers = #tpu.dot_dimension_numbers<[1], [0], [0], [1], [0, 0, 1, 1], [], []>} : vector<4x64xf32>, vector<64x128xf32>, vector<4x128xf32> -> vector<4x128xf32>
    %743 = vector.extract_strided_slice %434 {offsets = [12, 0], sizes = [4, 96], strides = [1, 1]} : vector<28x96xf32> to vector<4x96xf32>
    %744 = vector.extract_strided_slice %742 {offsets = [0, 0], sizes = [4, 64], strides = [1, 1]} : vector<4x128xf32> to vector<4x64xf32>
    %745 = vector.extract_strided_slice %743 {offsets = [0, 0], sizes = [4, 64], strides = [1, 1]} : vector<4x96xf32> to vector<4x64xf32>
    %746 = arith.addf %744, %745 : vector<4x64xf32>
    %747 = arith.negf %746 : vector<4x64xf32>
    %748 = math.exp %747 : vector<4x64xf32>
    %cst_92 = arith.constant 1.000000e+00 : f32
    %749 = vector.broadcast %cst_92 : f32 to vector<4x64xf32>
    %750 = arith.addf %749, %748 : vector<4x64xf32>
    %751 = arith.divf %749, %750 : vector<4x64xf32>
    %752 = vector.extract_strided_slice %751 {offsets = [0, 0], sizes = [4, 32], strides = [1, 1]} : vector<4x64xf32> to vector<4x32xf32>
    %753 = vector.extract_strided_slice %751 {offsets = [0, 32], sizes = [4, 32], strides = [1, 1]} : vector<4x64xf32> to vector<4x32xf32>
    %754 = vector.extract_strided_slice %742 {offsets = [0, 64], sizes = [4, 32], strides = [1, 1]} : vector<4x128xf32> to vector<4x32xf32>
    %755 = vector.extract_strided_slice %743 {offsets = [0, 64], sizes = [4, 32], strides = [1, 1]} : vector<4x96xf32> to vector<4x32xf32>
    %756 = arith.addf %754, %755 : vector<4x32xf32>
    %757 = vector.extract_strided_slice %742 {offsets = [0, 96], sizes = [4, 32], strides = [1, 1]} : vector<4x128xf32> to vector<4x32xf32>
    %758 = vector.broadcast %4 : vector<1x32xf32> to vector<4x32xf32>
    %759 = arith.addf %757, %758 : vector<4x32xf32>
    %760 = arith.mulf %752, %759 : vector<4x32xf32>
    %761 = arith.addf %756, %760 : vector<4x32xf32>
    %762 = math.tanh %761 : vector<4x32xf32>
    %cst_93 = arith.constant 1.000000e+00 : f32
    %763 = vector.broadcast %cst_93 : f32 to vector<4x32xf32>
    %764 = arith.subf %763, %753 : vector<4x32xf32>
    %765 = arith.mulf %764, %762 : vector<4x32xf32>
    %766 = arith.mulf %753, %684 : vector<4x32xf32>
    %767 = arith.addf %765, %766 : vector<4x32xf32>
    %768 = vector.broadcast %5 : vector<1x32xf32> to vector<4x32xf32>
    %769 = arith.mulf %767, %768 : vector<4x32xf32>
    %cst_94 = arith.constant dense<0.000000e+00> : vector<4xf32>
    %770 = vector.multi_reduction <add>, %769, %cst_94 [1] : vector<4x32xf32> to vector<4xf32>
    %771 = vector.shape_cast %770 : vector<4xf32> to vector<4x1xf32>
    %772 = vector.broadcast %771 : vector<4x1xf32> to vector<4x10xf32>
    %773 = arith.addf %429, %772 : vector<4x10xf32>
    %cst_95 = arith.constant 0.000000e+00 : f32
    %774 = vector.broadcast %cst_95 : f32 to vector<4x10xf32>
    %775 = arith.maximumf %773, %774 : vector<4x10xf32>
    %cst_96 = arith.constant dense<0xFF800000> : vector<4xf32>
    %776 = vector.multi_reduction <maximumf>, %775, %cst_96 [1] : vector<4x10xf32> to vector<4xf32>
    %777 = vector.shape_cast %776 : vector<4xf32> to vector<4x1xf32>
    %778 = vector.broadcast %777 : vector<4x1xf32> to vector<4x10xf32>
    %779 = arith.subf %775, %778 : vector<4x10xf32>
    %780 = math.exp %779 : vector<4x10xf32>
    %cst_97 = arith.constant dense<0.000000e+00> : vector<4xf32>
    %781 = vector.multi_reduction <add>, %780, %cst_97 [1] : vector<4x10xf32> to vector<4xf32>
    %782 = vector.shape_cast %781 : vector<4xf32> to vector<4x1xf32>
    %783 = vector.broadcast %782 : vector<4x1xf32> to vector<4x10xf32>
    %784 = arith.divf %780, %783 : vector<4x10xf32>
    %785 = vector.extract_strided_slice %784 {offsets = [0, 0], sizes = [4, 1], strides = [1, 1]} : vector<4x10xf32> to vector<4x1xf32>
    %786 = vector.broadcast %785 : vector<4x1xf32> to vector<4x32xf32>
    %787 = arith.mulf %786, %45 : vector<4x32xf32>
    %788 = vector.extract_strided_slice %784 {offsets = [0, 1], sizes = [4, 1], strides = [1, 1]} : vector<4x10xf32> to vector<4x1xf32>
    %789 = vector.broadcast %788 : vector<4x1xf32> to vector<4x32xf32>
    %790 = arith.mulf %789, %75 : vector<4x32xf32>
    %791 = arith.addf %787, %790 : vector<4x32xf32>
    %792 = vector.extract_strided_slice %784 {offsets = [0, 2], sizes = [4, 1], strides = [1, 1]} : vector<4x10xf32> to vector<4x1xf32>
    %793 = vector.broadcast %792 : vector<4x1xf32> to vector<4x32xf32>
    %794 = arith.mulf %793, %105 : vector<4x32xf32>
    %795 = arith.addf %791, %794 : vector<4x32xf32>
    %796 = vector.extract_strided_slice %784 {offsets = [0, 3], sizes = [4, 1], strides = [1, 1]} : vector<4x10xf32> to vector<4x1xf32>
    %797 = vector.broadcast %796 : vector<4x1xf32> to vector<4x32xf32>
    %798 = arith.mulf %797, %135 : vector<4x32xf32>
    %799 = arith.addf %795, %798 : vector<4x32xf32>
    %800 = vector.extract_strided_slice %784 {offsets = [0, 4], sizes = [4, 1], strides = [1, 1]} : vector<4x10xf32> to vector<4x1xf32>
    %801 = vector.broadcast %800 : vector<4x1xf32> to vector<4x32xf32>
    %802 = arith.mulf %801, %165 : vector<4x32xf32>
    %803 = arith.addf %799, %802 : vector<4x32xf32>
    %804 = vector.extract_strided_slice %784 {offsets = [0, 5], sizes = [4, 1], strides = [1, 1]} : vector<4x10xf32> to vector<4x1xf32>
    %805 = vector.broadcast %804 : vector<4x1xf32> to vector<4x32xf32>
    %806 = arith.mulf %805, %195 : vector<4x32xf32>
    %807 = arith.addf %803, %806 : vector<4x32xf32>
    %808 = vector.extract_strided_slice %784 {offsets = [0, 6], sizes = [4, 1], strides = [1, 1]} : vector<4x10xf32> to vector<4x1xf32>
    %809 = vector.broadcast %808 : vector<4x1xf32> to vector<4x32xf32>
    %810 = arith.mulf %809, %225 : vector<4x32xf32>
    %811 = arith.addf %807, %810 : vector<4x32xf32>
    %812 = vector.extract_strided_slice %784 {offsets = [0, 7], sizes = [4, 1], strides = [1, 1]} : vector<4x10xf32> to vector<4x1xf32>
    %813 = vector.broadcast %812 : vector<4x1xf32> to vector<4x32xf32>
    %814 = arith.mulf %813, %255 : vector<4x32xf32>
    %815 = arith.addf %811, %814 : vector<4x32xf32>
    %816 = vector.extract_strided_slice %784 {offsets = [0, 8], sizes = [4, 1], strides = [1, 1]} : vector<4x10xf32> to vector<4x1xf32>
    %817 = vector.broadcast %816 : vector<4x1xf32> to vector<4x32xf32>
    %818 = arith.mulf %817, %285 : vector<4x32xf32>
    %819 = arith.addf %815, %818 : vector<4x32xf32>
    %820 = vector.extract_strided_slice %784 {offsets = [0, 9], sizes = [4, 1], strides = [1, 1]} : vector<4x10xf32> to vector<4x1xf32>
    %821 = vector.broadcast %820 : vector<4x1xf32> to vector<4x32xf32>
    %822 = arith.mulf %821, %315 : vector<4x32xf32>
    %823 = arith.addf %819, %822 : vector<4x32xf32>
    %824 = tpu.concatenate %823, %767 in 1 : vector<4x32xf32>, vector<4x32xf32> -> vector<4x64xf32>
    %cst_98 = arith.constant dense<0.000000e+00> : vector<4x128xf32>
    %825 = tpu.matmul %824, %435, %cst_98 {dimension_numbers = #tpu.dot_dimension_numbers<[1], [0], [0], [1], [0, 0, 1, 1], [], []>} : vector<4x64xf32>, vector<64x128xf32>, vector<4x128xf32> -> vector<4x128xf32>
    %826 = vector.extract_strided_slice %434 {offsets = [16, 0], sizes = [4, 96], strides = [1, 1]} : vector<28x96xf32> to vector<4x96xf32>
    %827 = vector.extract_strided_slice %825 {offsets = [0, 0], sizes = [4, 64], strides = [1, 1]} : vector<4x128xf32> to vector<4x64xf32>
    %828 = vector.extract_strided_slice %826 {offsets = [0, 0], sizes = [4, 64], strides = [1, 1]} : vector<4x96xf32> to vector<4x64xf32>
    %829 = arith.addf %827, %828 : vector<4x64xf32>
    %830 = arith.negf %829 : vector<4x64xf32>
    %831 = math.exp %830 : vector<4x64xf32>
    %cst_99 = arith.constant 1.000000e+00 : f32
    %832 = vector.broadcast %cst_99 : f32 to vector<4x64xf32>
    %833 = arith.addf %832, %831 : vector<4x64xf32>
    %834 = arith.divf %832, %833 : vector<4x64xf32>
    %835 = vector.extract_strided_slice %834 {offsets = [0, 0], sizes = [4, 32], strides = [1, 1]} : vector<4x64xf32> to vector<4x32xf32>
    %836 = vector.extract_strided_slice %834 {offsets = [0, 32], sizes = [4, 32], strides = [1, 1]} : vector<4x64xf32> to vector<4x32xf32>
    %837 = vector.extract_strided_slice %825 {offsets = [0, 64], sizes = [4, 32], strides = [1, 1]} : vector<4x128xf32> to vector<4x32xf32>
    %838 = vector.extract_strided_slice %826 {offsets = [0, 64], sizes = [4, 32], strides = [1, 1]} : vector<4x96xf32> to vector<4x32xf32>
    %839 = arith.addf %837, %838 : vector<4x32xf32>
    %840 = vector.extract_strided_slice %825 {offsets = [0, 96], sizes = [4, 32], strides = [1, 1]} : vector<4x128xf32> to vector<4x32xf32>
    %841 = vector.broadcast %4 : vector<1x32xf32> to vector<4x32xf32>
    %842 = arith.addf %840, %841 : vector<4x32xf32>
    %843 = arith.mulf %835, %842 : vector<4x32xf32>
    %844 = arith.addf %839, %843 : vector<4x32xf32>
    %845 = math.tanh %844 : vector<4x32xf32>
    %cst_100 = arith.constant 1.000000e+00 : f32
    %846 = vector.broadcast %cst_100 : f32 to vector<4x32xf32>
    %847 = arith.subf %846, %836 : vector<4x32xf32>
    %848 = arith.mulf %847, %845 : vector<4x32xf32>
    %849 = arith.mulf %836, %767 : vector<4x32xf32>
    %850 = arith.addf %848, %849 : vector<4x32xf32>
    %851 = vector.broadcast %5 : vector<1x32xf32> to vector<4x32xf32>
    %852 = arith.mulf %850, %851 : vector<4x32xf32>
    %cst_101 = arith.constant dense<0.000000e+00> : vector<4xf32>
    %853 = vector.multi_reduction <add>, %852, %cst_101 [1] : vector<4x32xf32> to vector<4xf32>
    %854 = vector.shape_cast %853 : vector<4xf32> to vector<4x1xf32>
    %855 = vector.broadcast %854 : vector<4x1xf32> to vector<4x10xf32>
    %856 = arith.addf %429, %855 : vector<4x10xf32>
    %cst_102 = arith.constant 0.000000e+00 : f32
    %857 = vector.broadcast %cst_102 : f32 to vector<4x10xf32>
    %858 = arith.maximumf %856, %857 : vector<4x10xf32>
    %cst_103 = arith.constant dense<0xFF800000> : vector<4xf32>
    %859 = vector.multi_reduction <maximumf>, %858, %cst_103 [1] : vector<4x10xf32> to vector<4xf32>
    %860 = vector.shape_cast %859 : vector<4xf32> to vector<4x1xf32>
    %861 = vector.broadcast %860 : vector<4x1xf32> to vector<4x10xf32>
    %862 = arith.subf %858, %861 : vector<4x10xf32>
    %863 = math.exp %862 : vector<4x10xf32>
    %cst_104 = arith.constant dense<0.000000e+00> : vector<4xf32>
    %864 = vector.multi_reduction <add>, %863, %cst_104 [1] : vector<4x10xf32> to vector<4xf32>
    %865 = vector.shape_cast %864 : vector<4xf32> to vector<4x1xf32>
    %866 = vector.broadcast %865 : vector<4x1xf32> to vector<4x10xf32>
    %867 = arith.divf %863, %866 : vector<4x10xf32>
    %868 = vector.extract_strided_slice %867 {offsets = [0, 0], sizes = [4, 1], strides = [1, 1]} : vector<4x10xf32> to vector<4x1xf32>
    %869 = vector.broadcast %868 : vector<4x1xf32> to vector<4x32xf32>
    %870 = arith.mulf %869, %45 : vector<4x32xf32>
    %871 = vector.extract_strided_slice %867 {offsets = [0, 1], sizes = [4, 1], strides = [1, 1]} : vector<4x10xf32> to vector<4x1xf32>
    %872 = vector.broadcast %871 : vector<4x1xf32> to vector<4x32xf32>
    %873 = arith.mulf %872, %75 : vector<4x32xf32>
    %874 = arith.addf %870, %873 : vector<4x32xf32>
    %875 = vector.extract_strided_slice %867 {offsets = [0, 2], sizes = [4, 1], strides = [1, 1]} : vector<4x10xf32> to vector<4x1xf32>
    %876 = vector.broadcast %875 : vector<4x1xf32> to vector<4x32xf32>
    %877 = arith.mulf %876, %105 : vector<4x32xf32>
    %878 = arith.addf %874, %877 : vector<4x32xf32>
    %879 = vector.extract_strided_slice %867 {offsets = [0, 3], sizes = [4, 1], strides = [1, 1]} : vector<4x10xf32> to vector<4x1xf32>
    %880 = vector.broadcast %879 : vector<4x1xf32> to vector<4x32xf32>
    %881 = arith.mulf %880, %135 : vector<4x32xf32>
    %882 = arith.addf %878, %881 : vector<4x32xf32>
    %883 = vector.extract_strided_slice %867 {offsets = [0, 4], sizes = [4, 1], strides = [1, 1]} : vector<4x10xf32> to vector<4x1xf32>
    %884 = vector.broadcast %883 : vector<4x1xf32> to vector<4x32xf32>
    %885 = arith.mulf %884, %165 : vector<4x32xf32>
    %886 = arith.addf %882, %885 : vector<4x32xf32>
    %887 = vector.extract_strided_slice %867 {offsets = [0, 5], sizes = [4, 1], strides = [1, 1]} : vector<4x10xf32> to vector<4x1xf32>
    %888 = vector.broadcast %887 : vector<4x1xf32> to vector<4x32xf32>
    %889 = arith.mulf %888, %195 : vector<4x32xf32>
    %890 = arith.addf %886, %889 : vector<4x32xf32>
    %891 = vector.extract_strided_slice %867 {offsets = [0, 6], sizes = [4, 1], strides = [1, 1]} : vector<4x10xf32> to vector<4x1xf32>
    %892 = vector.broadcast %891 : vector<4x1xf32> to vector<4x32xf32>
    %893 = arith.mulf %892, %225 : vector<4x32xf32>
    %894 = arith.addf %890, %893 : vector<4x32xf32>
    %895 = vector.extract_strided_slice %867 {offsets = [0, 7], sizes = [4, 1], strides = [1, 1]} : vector<4x10xf32> to vector<4x1xf32>
    %896 = vector.broadcast %895 : vector<4x1xf32> to vector<4x32xf32>
    %897 = arith.mulf %896, %255 : vector<4x32xf32>
    %898 = arith.addf %894, %897 : vector<4x32xf32>
    %899 = vector.extract_strided_slice %867 {offsets = [0, 8], sizes = [4, 1], strides = [1, 1]} : vector<4x10xf32> to vector<4x1xf32>
    %900 = vector.broadcast %899 : vector<4x1xf32> to vector<4x32xf32>
    %901 = arith.mulf %900, %285 : vector<4x32xf32>
    %902 = arith.addf %898, %901 : vector<4x32xf32>
    %903 = vector.extract_strided_slice %867 {offsets = [0, 9], sizes = [4, 1], strides = [1, 1]} : vector<4x10xf32> to vector<4x1xf32>
    %904 = vector.broadcast %903 : vector<4x1xf32> to vector<4x32xf32>
    %905 = arith.mulf %904, %315 : vector<4x32xf32>
    %906 = arith.addf %902, %905 : vector<4x32xf32>
    %907 = tpu.concatenate %906, %850 in 1 : vector<4x32xf32>, vector<4x32xf32> -> vector<4x64xf32>
    %cst_105 = arith.constant dense<0.000000e+00> : vector<4x128xf32>
    %908 = tpu.matmul %907, %435, %cst_105 {dimension_numbers = #tpu.dot_dimension_numbers<[1], [0], [0], [1], [0, 0, 1, 1], [], []>} : vector<4x64xf32>, vector<64x128xf32>, vector<4x128xf32> -> vector<4x128xf32>
    %909 = vector.extract_strided_slice %434 {offsets = [20, 0], sizes = [4, 96], strides = [1, 1]} : vector<28x96xf32> to vector<4x96xf32>
    %910 = vector.extract_strided_slice %908 {offsets = [0, 0], sizes = [4, 64], strides = [1, 1]} : vector<4x128xf32> to vector<4x64xf32>
    %911 = vector.extract_strided_slice %909 {offsets = [0, 0], sizes = [4, 64], strides = [1, 1]} : vector<4x96xf32> to vector<4x64xf32>
    %912 = arith.addf %910, %911 : vector<4x64xf32>
    %913 = arith.negf %912 : vector<4x64xf32>
    %914 = math.exp %913 : vector<4x64xf32>
    %cst_106 = arith.constant 1.000000e+00 : f32
    %915 = vector.broadcast %cst_106 : f32 to vector<4x64xf32>
    %916 = arith.addf %915, %914 : vector<4x64xf32>
    %917 = arith.divf %915, %916 : vector<4x64xf32>
    %918 = vector.extract_strided_slice %917 {offsets = [0, 0], sizes = [4, 32], strides = [1, 1]} : vector<4x64xf32> to vector<4x32xf32>
    %919 = vector.extract_strided_slice %917 {offsets = [0, 32], sizes = [4, 32], strides = [1, 1]} : vector<4x64xf32> to vector<4x32xf32>
    %920 = vector.extract_strided_slice %908 {offsets = [0, 64], sizes = [4, 32], strides = [1, 1]} : vector<4x128xf32> to vector<4x32xf32>
    %921 = vector.extract_strided_slice %909 {offsets = [0, 64], sizes = [4, 32], strides = [1, 1]} : vector<4x96xf32> to vector<4x32xf32>
    %922 = arith.addf %920, %921 : vector<4x32xf32>
    %923 = vector.extract_strided_slice %908 {offsets = [0, 96], sizes = [4, 32], strides = [1, 1]} : vector<4x128xf32> to vector<4x32xf32>
    %924 = vector.broadcast %4 : vector<1x32xf32> to vector<4x32xf32>
    %925 = arith.addf %923, %924 : vector<4x32xf32>
    %926 = arith.mulf %918, %925 : vector<4x32xf32>
    %927 = arith.addf %922, %926 : vector<4x32xf32>
    %928 = math.tanh %927 : vector<4x32xf32>
    %cst_107 = arith.constant 1.000000e+00 : f32
    %929 = vector.broadcast %cst_107 : f32 to vector<4x32xf32>
    %930 = arith.subf %929, %919 : vector<4x32xf32>
    %931 = arith.mulf %930, %928 : vector<4x32xf32>
    %932 = arith.mulf %919, %850 : vector<4x32xf32>
    %933 = arith.addf %931, %932 : vector<4x32xf32>
    %934 = vector.broadcast %5 : vector<1x32xf32> to vector<4x32xf32>
    %935 = arith.mulf %933, %934 : vector<4x32xf32>
    %cst_108 = arith.constant dense<0.000000e+00> : vector<4xf32>
    %936 = vector.multi_reduction <add>, %935, %cst_108 [1] : vector<4x32xf32> to vector<4xf32>
    %937 = vector.shape_cast %936 : vector<4xf32> to vector<4x1xf32>
    %938 = vector.broadcast %937 : vector<4x1xf32> to vector<4x10xf32>
    %939 = arith.addf %429, %938 : vector<4x10xf32>
    %cst_109 = arith.constant 0.000000e+00 : f32
    %940 = vector.broadcast %cst_109 : f32 to vector<4x10xf32>
    %941 = arith.maximumf %939, %940 : vector<4x10xf32>
    %cst_110 = arith.constant dense<0xFF800000> : vector<4xf32>
    %942 = vector.multi_reduction <maximumf>, %941, %cst_110 [1] : vector<4x10xf32> to vector<4xf32>
    %943 = vector.shape_cast %942 : vector<4xf32> to vector<4x1xf32>
    %944 = vector.broadcast %943 : vector<4x1xf32> to vector<4x10xf32>
    %945 = arith.subf %941, %944 : vector<4x10xf32>
    %946 = math.exp %945 : vector<4x10xf32>
    %cst_111 = arith.constant dense<0.000000e+00> : vector<4xf32>
    %947 = vector.multi_reduction <add>, %946, %cst_111 [1] : vector<4x10xf32> to vector<4xf32>
    %948 = vector.shape_cast %947 : vector<4xf32> to vector<4x1xf32>
    %949 = vector.broadcast %948 : vector<4x1xf32> to vector<4x10xf32>
    %950 = arith.divf %946, %949 : vector<4x10xf32>
    %951 = vector.extract_strided_slice %950 {offsets = [0, 0], sizes = [4, 1], strides = [1, 1]} : vector<4x10xf32> to vector<4x1xf32>
    %952 = vector.broadcast %951 : vector<4x1xf32> to vector<4x32xf32>
    %953 = arith.mulf %952, %45 : vector<4x32xf32>
    %954 = vector.extract_strided_slice %950 {offsets = [0, 1], sizes = [4, 1], strides = [1, 1]} : vector<4x10xf32> to vector<4x1xf32>
    %955 = vector.broadcast %954 : vector<4x1xf32> to vector<4x32xf32>
    %956 = arith.mulf %955, %75 : vector<4x32xf32>
    %957 = arith.addf %953, %956 : vector<4x32xf32>
    %958 = vector.extract_strided_slice %950 {offsets = [0, 2], sizes = [4, 1], strides = [1, 1]} : vector<4x10xf32> to vector<4x1xf32>
    %959 = vector.broadcast %958 : vector<4x1xf32> to vector<4x32xf32>
    %960 = arith.mulf %959, %105 : vector<4x32xf32>
    %961 = arith.addf %957, %960 : vector<4x32xf32>
    %962 = vector.extract_strided_slice %950 {offsets = [0, 3], sizes = [4, 1], strides = [1, 1]} : vector<4x10xf32> to vector<4x1xf32>
    %963 = vector.broadcast %962 : vector<4x1xf32> to vector<4x32xf32>
    %964 = arith.mulf %963, %135 : vector<4x32xf32>
    %965 = arith.addf %961, %964 : vector<4x32xf32>
    %966 = vector.extract_strided_slice %950 {offsets = [0, 4], sizes = [4, 1], strides = [1, 1]} : vector<4x10xf32> to vector<4x1xf32>
    %967 = vector.broadcast %966 : vector<4x1xf32> to vector<4x32xf32>
    %968 = arith.mulf %967, %165 : vector<4x32xf32>
    %969 = arith.addf %965, %968 : vector<4x32xf32>
    %970 = vector.extract_strided_slice %950 {offsets = [0, 5], sizes = [4, 1], strides = [1, 1]} : vector<4x10xf32> to vector<4x1xf32>
    %971 = vector.broadcast %970 : vector<4x1xf32> to vector<4x32xf32>
    %972 = arith.mulf %971, %195 : vector<4x32xf32>
    %973 = arith.addf %969, %972 : vector<4x32xf32>
    %974 = vector.extract_strided_slice %950 {offsets = [0, 6], sizes = [4, 1], strides = [1, 1]} : vector<4x10xf32> to vector<4x1xf32>
    %975 = vector.broadcast %974 : vector<4x1xf32> to vector<4x32xf32>
    %976 = arith.mulf %975, %225 : vector<4x32xf32>
    %977 = arith.addf %973, %976 : vector<4x32xf32>
    %978 = vector.extract_strided_slice %950 {offsets = [0, 7], sizes = [4, 1], strides = [1, 1]} : vector<4x10xf32> to vector<4x1xf32>
    %979 = vector.broadcast %978 : vector<4x1xf32> to vector<4x32xf32>
    %980 = arith.mulf %979, %255 : vector<4x32xf32>
    %981 = arith.addf %977, %980 : vector<4x32xf32>
    %982 = vector.extract_strided_slice %950 {offsets = [0, 8], sizes = [4, 1], strides = [1, 1]} : vector<4x10xf32> to vector<4x1xf32>
    %983 = vector.broadcast %982 : vector<4x1xf32> to vector<4x32xf32>
    %984 = arith.mulf %983, %285 : vector<4x32xf32>
    %985 = arith.addf %981, %984 : vector<4x32xf32>
    %986 = vector.extract_strided_slice %950 {offsets = [0, 9], sizes = [4, 1], strides = [1, 1]} : vector<4x10xf32> to vector<4x1xf32>
    %987 = vector.broadcast %986 : vector<4x1xf32> to vector<4x32xf32>
    %988 = arith.mulf %987, %315 : vector<4x32xf32>
    %989 = arith.addf %985, %988 : vector<4x32xf32>
    %990 = tpu.concatenate %989, %933 in 1 : vector<4x32xf32>, vector<4x32xf32> -> vector<4x64xf32>
    %cst_112 = arith.constant dense<0.000000e+00> : vector<4x128xf32>
    %991 = tpu.matmul %990, %435, %cst_112 {dimension_numbers = #tpu.dot_dimension_numbers<[1], [0], [0], [1], [0, 0, 1, 1], [], []>} : vector<4x64xf32>, vector<64x128xf32>, vector<4x128xf32> -> vector<4x128xf32>
    %992 = vector.extract_strided_slice %434 {offsets = [24, 0], sizes = [4, 96], strides = [1, 1]} : vector<28x96xf32> to vector<4x96xf32>
    %993 = vector.extract_strided_slice %991 {offsets = [0, 0], sizes = [4, 64], strides = [1, 1]} : vector<4x128xf32> to vector<4x64xf32>
    %994 = vector.extract_strided_slice %992 {offsets = [0, 0], sizes = [4, 64], strides = [1, 1]} : vector<4x96xf32> to vector<4x64xf32>
    %995 = arith.addf %993, %994 : vector<4x64xf32>
    %996 = arith.negf %995 : vector<4x64xf32>
    %997 = math.exp %996 : vector<4x64xf32>
    %cst_113 = arith.constant 1.000000e+00 : f32
    %998 = vector.broadcast %cst_113 : f32 to vector<4x64xf32>
    %999 = arith.addf %998, %997 : vector<4x64xf32>
    %1000 = arith.divf %998, %999 : vector<4x64xf32>
    %1001 = vector.extract_strided_slice %1000 {offsets = [0, 0], sizes = [4, 32], strides = [1, 1]} : vector<4x64xf32> to vector<4x32xf32>
    %1002 = vector.extract_strided_slice %1000 {offsets = [0, 32], sizes = [4, 32], strides = [1, 1]} : vector<4x64xf32> to vector<4x32xf32>
    %1003 = vector.extract_strided_slice %991 {offsets = [0, 64], sizes = [4, 32], strides = [1, 1]} : vector<4x128xf32> to vector<4x32xf32>
    %1004 = vector.extract_strided_slice %992 {offsets = [0, 64], sizes = [4, 32], strides = [1, 1]} : vector<4x96xf32> to vector<4x32xf32>
    %1005 = arith.addf %1003, %1004 : vector<4x32xf32>
    %1006 = vector.extract_strided_slice %991 {offsets = [0, 96], sizes = [4, 32], strides = [1, 1]} : vector<4x128xf32> to vector<4x32xf32>
    %1007 = vector.broadcast %4 : vector<1x32xf32> to vector<4x32xf32>
    %1008 = arith.addf %1006, %1007 : vector<4x32xf32>
    %1009 = arith.mulf %1001, %1008 : vector<4x32xf32>
    %1010 = arith.addf %1005, %1009 : vector<4x32xf32>
    %1011 = math.tanh %1010 : vector<4x32xf32>
    %cst_114 = arith.constant 1.000000e+00 : f32
    %1012 = vector.broadcast %cst_114 : f32 to vector<4x32xf32>
    %1013 = arith.subf %1012, %1002 : vector<4x32xf32>
    %1014 = arith.mulf %1013, %1011 : vector<4x32xf32>
    %1015 = arith.mulf %1002, %933 : vector<4x32xf32>
    %1016 = arith.addf %1014, %1015 : vector<4x32xf32>
    %1017 = tpu.concatenate %518, %601, %684, %767, %850, %933, %1016 in 0 : vector<4x32xf32>, vector<4x32xf32>, vector<4x32xf32>, vector<4x32xf32>, vector<4x32xf32>, vector<4x32xf32>, vector<4x32xf32> -> vector<28x32xf32>
    %c0_115 = arith.constant 0 : index
    %c0_116 = arith.constant 0 : index
    %1018 = vector.load %arg6[%c0_115, %c0_116] : memref<32x12xf32, #tpu.memory_space<vmem>>, vector<32x12xf32>
    %cst_117 = arith.constant dense<0.000000e+00> : vector<28x12xf32>
    %1019 = tpu.matmul %1017, %1018, %cst_117 {dimension_numbers = #tpu.dot_dimension_numbers<[1], [0], [0], [1], [0, 0, 1, 1], [], []>} : vector<28x32xf32>, vector<32x12xf32>, vector<28x12xf32> -> vector<28x12xf32>
    %1020 = vector.broadcast %7 : vector<1x12xf32> to vector<28x12xf32>
    %1021 = arith.addf %1019, %1020 : vector<28x12xf32>
    %cst_118 = arith.constant 0.000000e+00 : f32
    %1022 = vector.broadcast %cst_118 : f32 to vector<4x12xf32>
    %1023 = tpu.concatenate %1022, %1021 in 0 : vector<4x12xf32>, vector<28x12xf32> -> vector<32x12xf32>
    %c0_119 = arith.constant 0 : index
    %c0_120 = arith.constant 0 : index
    %1024 = vector.load %arg8[%c0_119, %c0_120] : memref<32x12xf32, #tpu.memory_space<vmem>>, vector<32x12xf32>
    tpu.vector_store %arg8[%c0_119, %c0_120], %1023 {strides = array<i32>} : memref<32x12xf32, #tpu.memory_space<vmem>>, vector<32x12xf32>,
    return
  }
}

</mosaic_0001>

<bundles_post_ra>
// kernel: seq2seq_forward.1
= control target key start
LH: loop header
LB: loop body
LE: loop exit
PB: predicated region body
PF: predicated region fallthrough
CT: control target
= control target key end

     0   :  { %v38_v2 = vlaneseq  ;;  %v3872_v3 = vmov 0.0   ;;  %s4872_s0 = inlined_call_operand.vmem [shape: f32[40,16], index: 0, kind: input, shape index: {}]   ;;  %s4873_s1 = inlined_call_operand.vmem [shape: f32[28,12], index: 1, kind: input, shape index: {}]   ;;  %s4874_s2 = inlined_call_operand.vmem [shape: f32[16,96], index: 2, kind: input, shape index: {}]   ;;  %s4875_s3 = inlined_call_operand.vmem [shape: f32[32,96], index: 3, kind: input, shape index: {}]   ;;  %s4876_s4 = inlined_call_operand.vmem [shape: f32[12,96], index: 4, kind: input, shape index: {}]   ;;  %s4877_s5 = inlined_call_operand.vmem [shape: f32[64,128], index: 5, kind: input, shape index: {}]   ;;  %s4878_s6 = inlined_call_operand.vmem [shape: f32[32,12], index: 6, kind: input, shape index: {}]   ;;  %s4879_s7 = inlined_call_operand.vmem [shape: f32[8,96], index: 7, kind: input, shape index: {}]   ;;  %s4880_s8 = inlined_call_operand.hbm [shape: f32[32,12], index: 8, kind: output, shape index: {}]  }
   0x1   :  { %v3938_v0 = vld [vmem:[%s4875_s3 + $0x18] sm:$0xff]  ;;  %v37_v1 = vld [vmem:[%s4874_s2 + $0x8] sm:$0xff]  ;;  %3353 = vmatprep.subr.mxu1 %v3872_v3  ;;  %3334 = vmatprep.subr.mxu0 %v3872_v3  ;;  %v3948_v4 = vld [vmem:[%s4875_s3 + $0x10] sm:$0xff] }
   0x2   :  { %v36_v5 = vld [vmem:[%s4874_s2] sm:$0xff]  ;;  %3354 = vmatpush3.msra.mxu1 %v3938_v0  ;;  %3335 = vmatpush3.msra.mxu0 %v37_v1  ;;  %v3955_v6 = vshrl.u32 %v38_v2, 7 }
   0x3   :  { %13 = vsyncpa [#allocation3], 0  ;;  %3355 = vmatprep.subr.mxu1 %v3872_v3  ;;  %3336 = vmatprep.subr.mxu0 %v3872_v3  ;;  %v3962_v7 = vld [vmem:[%s4875_s3 + $0x8] sm:$0xff]  ;;  %v31_v8 = vld [vmem:[%s4872_s0] sm:$0xff]  ;;  %vm42_vm0 = vcmask 130048   ;;  %vm3873_vm1 = vmmov 0  }
   0x4   :  { %v3970_v9 = vld [vmem:[%s4879_s7] sm:$0xff]  ;;  %3356 = vmatpush3.msra.mxu1 %v3948_v4  ;;  %3337 = vmatpush3.msra.mxu0 %v36_v5  ;;  %v235_v10 = vsub.s32 2, %v3955_v6  ;;  %s3874_s20 = smov 64   ;;  %v40_v19 = vsub.s32 0, %v3955_v6  ;;  %vm152_vm2 = vcmask 261120   ;;  %v32_v52 = vld [vmem:[%s4872_s0 + $0x8] sm:$0xff] }
   0x5   :  { %3357 = vmatprep.subr.mxu1 %v3872_v3  ;;  %3338 = vmatprep.mubr.msk.f32.mxu0 %vm3873_vm1, %v3872_v3  ;;  %v3980_v11 = vld [vmem:[%s4875_s3] sm:$0xff]  ;;  %s3875_s3 = smov 96   ;;  %v33_v53 = vld [vmem:[%s4872_s0 + $0x10] sm:$0xff]  ;;  %v34_v55 = vld [vmem:[%s4872_s0 + $0x18] sm:$0xff]  ;;  %vm1252_vm3 = vcmask 261124   ;;  %vm1238_vm4 = vcmask 257024  }
   0x6   :  { %3358 = vmatpush3.msra.mxu1 %v3962_v7  ;;  %3339 = vmatmul.mubr.msk.f32.vlgmr.msra.gmra.mxu0 %vm42_vm0, %v31_v8  ;;  %v236_v12 = vrot.slane %v3970_v9, %v235_v10  ;;  %v4019_v20 = vrot.slane %v3970_v9, %v40_v19  ;;  %v35_v56 = vld [vmem:[%s4872_s0 + $0x20] sm:$0xff]  ;;  %s3876_s0 = smov 32   ;;  %vm1521_vm15 = vcmask 76800  }
   0x7   :  { %3359 = vmatprep.subr.mxu1 %v3872_v3  ;;  %3361 = vmatprep.mubr.msk.f32.mxu1 %vm3873_vm1, %v3872_v3 }
   0x8   :  { %3360 = vmatpush3.msra.mxu1 %v3980_v11  ;;  %238 = vrot.lane.b32.xlu0 %v236_v12, %s3874_s20 }
   0x9   :  { %3362 = vmatmul.mubr.f32.vlgmr.msra.gmra.mxu1 %v3872_v3  ;;  %3364 = vmatprep.subr.mxu1 %v3872_v3 }
   0xa   :  { %3365 = vmatpush3.msra.mxu1 %v3938_v0  ;;  %3372 = vmatprep.mubr.msk.f32.mxu1 %vm3873_vm1, %v3872_v3 }
   0xb   :  { %3366 = vmatprep.subr.mxu1 %v3872_v3  ;;  %3375 = vmatprep.subr.mxu0 %v3872_v3 }
   0xc   :  { %3367 = vmatpush3.msra.mxu1 %v3948_v4  ;;  %3376 = vmatpush3.msra.mxu0 %v3938_v0 }
   0xd   :  { %3368 = vmatprep.subr.mxu1 %v3872_v3  ;;  %3341 = vmatprep.mubr.msk.f32.mxu0 %vm3873_vm1, %v3872_v3 }
   0xe   :  { %3369 = vmatpush3.msra.mxu1 %v3962_v7  ;;  %3377 = vmatprep.subr.mxu0 %v3872_v3 }
   0xf   :  { %3370 = vmatprep.subr.mxu1 %v3872_v3  ;;  %3378 = vmatpush3.msra.mxu0 %v3948_v4 }
  0x10   :  { %3371 = vmatpush3.msra.mxu1 %v3980_v11  ;;  %3379 = vmatprep.subr.mxu0 %v3872_v3 }
  0x11   :  { %3380 = vmatpush3.msra.mxu0 %v3962_v7  ;;  %3386 = vmatprep.subr.mxu1 %v3872_v3 }
  0x12   :  { %3381 = vmatprep.subr.mxu0 %v3872_v3  ;;  %3342 = vmatmul.mubr.msk.f32.gmra.mxu0 %vm42_vm0, %v32_v52 }
  0x13   :  { %3382 = vmatpush3.msra.mxu0 %v3980_v11  ;;  %3344 = vmatprep.mubr.msk.f32.mxu0 %vm3873_vm1, %v3872_v3 }
  0x14   :  { %3397 = vmatprep.subr.mxu0 %v3872_v3 }
  0x16   :  { %3345 = vmatmul.mubr.msk.f32.gmra.mxu0 %vm42_vm0, %v33_v53 }
  0x17   :  { %3347 = vmatprep.mubr.msk.f32.mxu0 %vm3873_vm1, %v3872_v3 }
  0x1a   :  { %3348 = vmatmul.mubr.msk.f32.gmra.mxu0 %vm42_vm0, %v34_v55 }
  0x1b   :  { %3350 = vmatprep.mubr.msk.f32.mxu0 %vm3873_vm1, %v3872_v3 }
  0x1e   :  { %3351 = vmatmul.mubr.msk.f32.gmra.mxu0 %vm42_vm0, %v35_v56  ;;  %vm1403_vm0 = vcmask 1043456  }
  0x1f   :  { %3383 = vmatprep.mubr.msk.f32.mxu0 %vm3873_vm1, %v3872_v3 }
  0x7a   :  { %v4013_v14 = vpop.permute.xlu0 %238 }
  0xc6   :  { %v124_v13 = vpop.f32.mrf.mxu0 }
  0xc7   :  { %v125_v21 = vadd.f32 %v124_v13, %v4019_v20 }
  0xc8   :  { %v3340_v15 = vpop.f32.mrf.mxu0 }
  0xc9   :  { %v222_v16 = vpop.f32.mrf.mxu1 }
  0xca   :  { %v241_v17 = vadd.f32 %v4013_v14, %v222_v16  ;;  %v226_v22 = vadd.f32 %v222_v16, %v125_v21 }
  0xcb   :  { %v3363_v18 = vpop.f32.mrf.mxu1 }
  0xcc   :  { %243 = vrot.lane.b32.xlu0 %v241_v17, %s3874_s20  ;;  %v3148_v23 = vmul.f32 -1.442695, %v226_v22 }
  0xce   :  { %3710 = vpow2.f32 %v3148_v23 }
  0xd2   :  { %v129_v1 = vpop.f32.mrf.mxu0 }
  0xd3   :  { %v130_v22 = vadd.f32 %v129_v1, %v4019_v20 }
  0xd4   :  { %v3343_v5 = vpop.f32.mrf.mxu0 }
  0xd6   :  { %v4072_v8 = vpop.f32.mrf.mxu0 }
  0xd8   :  { %v3346_v10 = vpop.f32.mrf.mxu0 }
  0xda   :  { %v4074_v12 = vpop.f32.mrf.mxu0 }
  0xdb   :  { %v3711_v24 = vpop.eup %3710 }
  0xdc   :  { %v230_v25 = vadd.f32 1.0, %v3711_v24  ;;  %v3349_v13 = vpop.f32.mrf.mxu0 }
  0xdd   :  { %v135_v13 = vadd.f32 %v4072_v8, %v4019_v20 }
  0xde   :  { %3712 = vrcp.f32 %v230_v25  ;;  %v4076_v15 = vpop.f32.mrf.mxu0 }
  0xe0   :  { %v3352_v16 = vpop.f32.mrf.mxu0 }
  0xeb   :  { %v3713_v26 = vpop.eup %3712 }
  0xec   :  { %v253_v32 = vsub.f32 1.0, %v3713_v26  ;;  %v259_v34 = vmul.f32 0.0, %v3713_v26 }
 0x13e   :  { %v244_v27 = vpop.permute.xlu0 %243 }
 0x13f   :  { %v246_v28 = vmul.f32 %v3713_v26, %v244_v27 }
 0x141   :  { %248 = vrot.lane.b32.xlu1 %v246_v28, %s3874_s20 }
 0x1b3   :  { %v249_v29 = vpop.permute.xlu1 %248 }
 0x1b4   :  { %v251_v30 = vadd.f32 %v249_v29, %v125_v21 }
 0x1b6   :  { %3714 = vtanh.f32 %v251_v30 }
 0x1c3   :  { %v3715_v31 = vpop.eup %3714 }
 0x1c4   :  { %255 = vrot.lane.b32.xlu1 %v3715_v31, %s3875_s3 }
 0x236   :  { %v256_v33 = vpop.permute.xlu1 %255 }
 0x237   :  { %v258_v35 = vmul.f32 %v256_v33, %v253_v32 }
 0x239   :  { %v4024_v36 = vadd.f32 %v259_v34, %v258_v35 }
 0x23b   :  { %262 = vrot.lane.b32.xlu0 %v4024_v36, %s3875_s3  ;;  %v365_v58 = vrot.slane %v4024_v36, 4 }
 0x2ad   :  { %v263_v37 = vpop.permute.xlu0 %262 }
 0x2ae   :  { %3373 = vmatmul.mubr.msk.f32.vlgmr.msra.gmra.mxu1 %vm152_vm2, %v263_v37 }
 0x2af   :  { %3387 = vmatpush3.msra.mxu1 %v3938_v0  ;;  %3394 = vmatprep.mubr.msk.f32.mxu1 %vm3873_vm1, %v3872_v3 }
 0x2b0   :  { %3388 = vmatprep.subr.mxu1 %v3872_v3 }
 0x2b1   :  { %3389 = vmatpush3.msra.mxu1 %v3948_v4 }
 0x2b2   :  { %3390 = vmatprep.subr.mxu1 %v3872_v3 }
 0x2b3   :  { %3391 = vmatpush3.msra.mxu1 %v3962_v7 }
 0x2b4   :  { %3392 = vmatprep.subr.mxu1 %v3872_v3 }
 0x2b5   :  { %3393 = vmatpush3.msra.mxu1 %v3980_v11 }
 0x2b6   :  { %3408 = vmatprep.subr.mxu1 %v3872_v3 }
 0x36e   :  { %v332_v38 = vpop.f32.mrf.mxu1 }
 0x36f   :  { %v346_v39 = vadd.f32 %v332_v38, %v4013_v14  ;;  %v337_v42 = vrot.slane %v332_v38, 4 }
 0x370   :  { %v3374_v40 = vpop.f32.mrf.mxu1 }
 0x371   :  { %v348_v41 = vrot.slane %v346_v39, 4  ;;  %v339_v43 = vadd.f32 %v337_v42, %v125_v21 }
 0x373   :  { %349 = vrot.lane.b32.xlu1 %v348_v41, %s3874_s20  ;;  %v3150_v44 = vmul.f32 -1.442695, %v339_v43 }
 0x375   :  { %3716 = vpow2.f32 %v3150_v44 }
 0x382   :  { %v3717_v45 = vpop.eup %3716 }
 0x383   :  { %v343_v46 = vadd.f32 1.0, %v3717_v45 }
 0x385   :  { %3718 = vrcp.f32 %v343_v46 }
 0x392   :  { %v3719_v47 = vpop.eup %3718 }
 0x393   :  { %v359_v57 = vsub.f32 1.0, %v3719_v47  ;;  %v367_v61 = vmul.f32 %v3719_v47, %v365_v58 }
 0x3e5   :  { %v350_v48 = vpop.permute.xlu1 %349 }
 0x3e6   :  { %v352_v49 = vmul.f32 %v3719_v47, %v350_v48 }
 0x3e8   :  { %354 = vrot.lane.b32.xlu0 %v352_v49, %s3874_s20 }
 0x45a   :  { %v355_v50 = vpop.permute.xlu0 %354 }
 0x45b   :  { %v357_v51 = vadd.f32 %v355_v50, %v125_v21 }
 0x45d   :  { %3720 = vtanh.f32 %v357_v51 }
 0x46a   :  { %v3721_v54 = vpop.eup %3720 }
 0x46b   :  { %361 = vrot.lane.b32.xlu1 %v3721_v54, %s3875_s3 }
 0x4dd   :  { %v362_v59 = vpop.permute.xlu1 %361 }
 0x4de   :  { %v364_v60 = vmul.f32 %v362_v59, %v359_v57 }
 0x4e0   :  { %v4068_v62 = vadd.f32 %v367_v61, %v364_v60 }
 0x4e2   :  { %v370_v63 = vrot.slane %v4068_v62, 4 }
 0x4e4   :  { %371 = vrot.lane.b32.xlu0 %v370_v63, %s3875_s3 }
 0x556   :  { %v4078_v17 = vpop.permute.xlu0 %371 }
 0x557   :  { %3384 = vmatmul.mubr.msk.f32.vlgmr.msra.gmra.mxu0 %vm152_vm2, %v4078_v17 }
 0x558   :  { %3398 = vmatpush3.msra.mxu0 %v3938_v0  ;;  %3405 = vmatprep.mubr.msk.f32.mxu0 %vm3873_vm1, %v3872_v3 }
 0x559   :  { %3399 = vmatprep.subr.mxu0 %v3872_v3 }
 0x55a   :  { %3400 = vmatpush3.msra.mxu0 %v3948_v4 }
 0x55b   :  { %3401 = vmatprep.subr.mxu0 %v3872_v3 }
 0x55c   :  { %3402 = vmatpush3.msra.mxu0 %v3962_v7 }
 0x55d   :  { %3403 = vmatprep.subr.mxu0 %v3872_v3 }
 0x55e   :  { %3404 = vmatpush3.msra.mxu0 %v3980_v11 }
 0x55f   :  { %3419 = vmatprep.subr.mxu0 %v3872_v3 }
 0x617   :  { %v441_v18 = vpop.f32.mrf.mxu0 }
 0x618   :  { %v452_v19 = vadd.f32 %v441_v18, %v4013_v14  ;;  %v445_v23 = vadd.f32 %v441_v18, %v130_v22 }
 0x619   :  { %v3385_v21 = vpop.f32.mrf.mxu0 }
 0x61a   :  { %454 = vrot.lane.b32.xlu1 %v452_v19, %s3874_s20  ;;  %v3152_v24 = vmul.f32 -1.442695, %v445_v23 }
 0x61c   :  { %3722 = vpow2.f32 %v3152_v24 }
 0x629   :  { %v3723_v25 = vpop.eup %3722 }
 0x62a   :  { %v449_v26 = vadd.f32 1.0, %v3723_v25 }
 0x62c   :  { %3724 = vrcp.f32 %v449_v26 }
 0x639   :  { %v3725_v27 = vpop.eup %3724 }
 0x63a   :  { %v464_v33 = vsub.f32 1.0, %v3725_v27  ;;  %v471_v35 = vmul.f32 %v3725_v27, %v370_v63 }
 0x68c   :  { %v455_v28 = vpop.permute.xlu1 %454 }
 0x68d   :  { %v457_v29 = vmul.f32 %v3725_v27, %v455_v28 }
 0x68f   :  { %459 = vrot.lane.b32.xlu0 %v457_v29, %s3874_s20 }
 0x701   :  { %v460_v30 = vpop.permute.xlu0 %459 }
 0x702   :  { %v462_v31 = vadd.f32 %v460_v30, %v130_v22 }
 0x704   :  { %3726 = vtanh.f32 %v462_v31 }
 0x711   :  { %v3727_v32 = vpop.eup %3726 }
 0x712   :  { %466 = vrot.lane.b32.xlu1 %v3727_v32, %s3875_s3 }
 0x784   :  { %v467_v34 = vpop.permute.xlu1 %466 }
 0x785   :  { %v469_v37 = vmul.f32 %v467_v34, %v464_v33 }
 0x787   :  { %v4097_v38 = vadd.f32 %v471_v35, %v469_v37 }
 0x789   :  { %474 = vrot.lane.b32.xlu0 %v4097_v38, %s3875_s3  ;;  %v577_v56 = vrot.slane %v4097_v38, 4 }
 0x7fb   :  { %v475_v39 = vpop.permute.xlu0 %474 }
 0x7fc   :  { %3395 = vmatmul.mubr.msk.f32.vlgmr.msra.gmra.mxu1 %vm152_vm2, %v475_v39 }
 0x7fd   :  { %3409 = vmatpush3.msra.mxu1 %v3938_v0  ;;  %3416 = vmatprep.mubr.msk.f32.mxu1 %vm3873_vm1, %v3872_v3 }
 0x7fe   :  { %3410 = vmatprep.subr.mxu1 %v3872_v3 }
 0x7ff   :  { %3411 = vmatpush3.msra.mxu1 %v3948_v4 }
 0x800   :  { %3412 = vmatprep.subr.mxu1 %v3872_v3 }
 0x801   :  { %3413 = vmatpush3.msra.mxu1 %v3962_v7 }
 0x802   :  { %3414 = vmatprep.subr.mxu1 %v3872_v3 }
 0x803   :  { %3415 = vmatpush3.msra.mxu1 %v3980_v11 }
 0x804   :  { %3430 = vmatprep.subr.mxu1 %v3872_v3 }
 0x8bc   :  { %v544_v40 = vpop.f32.mrf.mxu1 }
 0x8bd   :  { %v558_v41 = vadd.f32 %v544_v40, %v4013_v14  ;;  %v549_v44 = vrot.slane %v544_v40, 4 }
 0x8be   :  { %v3396_v42 = vpop.f32.mrf.mxu1 }
 0x8bf   :  { %v560_v43 = vrot.slane %v558_v41, 4  ;;  %v551_v45 = vadd.f32 %v549_v44, %v130_v22 }
 0x8c1   :  { %561 = vrot.lane.b32.xlu1 %v560_v43, %s3874_s20  ;;  %v3154_v46 = vmul.f32 -1.442695, %v551_v45 }
 0x8c3   :  { %3728 = vpow2.f32 %v3154_v46 }
 0x8d0   :  { %v3729_v47 = vpop.eup %3728 }
 0x8d1   :  { %v555_v48 = vadd.f32 1.0, %v3729_v47 }
 0x8d3   :  { %3730 = vrcp.f32 %v555_v48 }
 0x8e0   :  { %v3731_v49 = vpop.eup %3730 }
 0x8e1   :  { %v571_v55 = vsub.f32 1.0, %v3731_v49  ;;  %v579_v59 = vmul.f32 %v3731_v49, %v577_v56 }
 0x933   :  { %v562_v50 = vpop.permute.xlu1 %561 }
 0x934   :  { %v564_v51 = vmul.f32 %v3731_v49, %v562_v50 }
 0x936   :  { %566 = vrot.lane.b32.xlu0 %v564_v51, %s3874_s20 }
 0x9a8   :  { %v567_v52 = vpop.permute.xlu0 %566 }
 0x9a9   :  { %v569_v53 = vadd.f32 %v567_v52, %v130_v22 }
 0x9ab   :  { %3732 = vtanh.f32 %v569_v53 }
 0x9b8   :  { %v3733_v54 = vpop.eup %3732 }
 0x9b9   :  { %573 = vrot.lane.b32.xlu1 %v3733_v54, %s3875_s3 }
 0xa2b   :  { %v574_v57 = vpop.permute.xlu1 %573 }
 0xa2c   :  { %v576_v58 = vmul.f32 %v574_v57, %v571_v55 }
 0xa2e   :  { %v4117_v60 = vadd.f32 %v579_v59, %v576_v58 }
 0xa30   :  { %v582_v61 = vrot.slane %v4117_v60, 4 }
 0xa32   :  { %583 = vrot.lane.b32.xlu0 %v582_v61, %s3875_s3 }
 0xaa4   :  { %v4121_v63 = vpop.permute.xlu0 %583 }
 0xaa5   :  { %3406 = vmatmul.mubr.msk.f32.vlgmr.msra.gmra.mxu0 %vm152_vm2, %v4121_v63 }
 0xaa6   :  { %3420 = vmatpush3.msra.mxu0 %v3938_v0  ;;  %3427 = vmatprep.mubr.msk.f32.mxu0 %vm3873_vm1, %v3872_v3 }
 0xaa7   :  { %3421 = vmatprep.subr.mxu0 %v3872_v3 }
 0xaa8   :  { %3422 = vmatpush3.msra.mxu0 %v3948_v4 }
 0xaa9   :  { %3423 = vmatprep.subr.mxu0 %v3872_v3 }
 0xaaa   :  { %3424 = vmatpush3.msra.mxu0 %v3962_v7 }
 0xaab   :  { %3425 = vmatprep.subr.mxu0 %v3872_v3 }
 0xaac   :  { %3426 = vmatpush3.msra.mxu0 %v3980_v11 }
 0xaad   :  { %3441 = vmatprep.subr.mxu0 %v3872_v3 }
 0xb65   :  { %v653_v1 = vpop.f32.mrf.mxu0 }
 0xb66   :  { %v664_v5 = vadd.f32 %v653_v1, %v4013_v14  ;;  %v657_v16 = vadd.f32 %v653_v1, %v135_v13  ;;  %v140_v1 = vadd.f32 %v4074_v12, %v4019_v20 }
 0xb67   :  { %v3407_v10 = vpop.f32.mrf.mxu0 }
 0xb68   :  { %666 = vrot.lane.b32.xlu1 %v664_v5, %s3874_s20  ;;  %v3156_v18 = vmul.f32 -1.442695, %v657_v16 }
 0xb6a   :  { %3734 = vpow2.f32 %v3156_v18 }
 0xb77   :  { %v3735_v19 = vpop.eup %3734 }
 0xb78   :  { %v661_v21 = vadd.f32 1.0, %v3735_v19 }
 0xb7a   :  { %3736 = vrcp.f32 %v661_v21 }
 0xb87   :  { %v3737_v22 = vpop.eup %3736 }
 0xb88   :  { %v676_v28 = vsub.f32 1.0, %v3737_v22  ;;  %v683_v8 = vmul.f32 %v3737_v22, %v582_v61 }
 0xbda   :  { %v667_v23 = vpop.permute.xlu1 %666 }
 0xbdb   :  { %v669_v24 = vmul.f32 %v3737_v22, %v667_v23 }
 0xbdd   :  { %671 = vrot.lane.b32.xlu0 %v669_v24, %s3874_s20 }
 0xc4f   :  { %v672_v25 = vpop.permute.xlu0 %671 }
 0xc50   :  { %v674_v26 = vadd.f32 %v672_v25, %v135_v13 }
 0xc52   :  { %3738 = vtanh.f32 %v674_v26 }
 0xc5f   :  { %v3739_v27 = vpop.eup %3738 }
 0xc60   :  { %678 = vrot.lane.b32.xlu1 %v3739_v27, %s3875_s3 }
 0xcd2   :  { %v679_v29 = vpop.permute.xlu1 %678 }
 0xcd3   :  { %v681_v30 = vmul.f32 %v679_v29, %v676_v28 }
 0xcd5   :  { %v4141_v31 = vadd.f32 %v683_v8, %v681_v30 }
 0xcd7   :  { %686 = vrot.lane.b32.xlu0 %v4141_v31, %s3875_s3  ;;  %v789_v51 = vrot.slane %v4141_v31, 4 }
 0xd49   :  { %v687_v32 = vpop.permute.xlu0 %686 }
 0xd4a   :  { %3417 = vmatmul.mubr.msk.f32.vlgmr.msra.gmra.mxu1 %vm152_vm2, %v687_v32 }
 0xd4b   :  { %3431 = vmatpush3.msra.mxu1 %v3938_v0  ;;  %3438 = vmatprep.mubr.msk.f32.mxu1 %vm3873_vm1, %v3872_v3 }
 0xd4c   :  { %3432 = vmatprep.subr.mxu1 %v3872_v3 }
 0xd4d   :  { %3433 = vmatpush3.msra.mxu1 %v3948_v4 }
 0xd4e   :  { %3434 = vmatprep.subr.mxu1 %v3872_v3 }
 0xd4f   :  { %3435 = vmatpush3.msra.mxu1 %v3962_v7 }
 0xd50   :  { %3436 = vmatprep.subr.mxu1 %v3872_v3 }
 0xd51   :  { %3437 = vmatpush3.msra.mxu1 %v3980_v11 }
 0xd52   :  { %3452 = vmatprep.subr.mxu1 %v3872_v3 }
 0xe0a   :  { %v756_v33 = vpop.f32.mrf.mxu1 }
 0xe0b   :  { %v770_v34 = vadd.f32 %v756_v33, %v4013_v14  ;;  %v761_v39 = vrot.slane %v756_v33, 4 }
 0xe0c   :  { %v3418_v35 = vpop.f32.mrf.mxu1 }
 0xe0d   :  { %v772_v37 = vrot.slane %v770_v34, 4  ;;  %v763_v40 = vadd.f32 %v761_v39, %v135_v13 }
 0xe0f   :  { %773 = vrot.lane.b32.xlu1 %v772_v37, %s3874_s20  ;;  %v3158_v41 = vmul.f32 -1.442695, %v763_v40 }
 0xe11   :  { %3740 = vpow2.f32 %v3158_v41 }
 0xe1e   :  { %v3741_v42 = vpop.eup %3740 }
 0xe1f   :  { %v767_v43 = vadd.f32 1.0, %v3741_v42 }
 0xe21   :  { %3742 = vrcp.f32 %v767_v43 }
 0xe2e   :  { %v3743_v44 = vpop.eup %3742 }
 0xe2f   :  { %v783_v50 = vsub.f32 1.0, %v3743_v44  ;;  %v791_v54 = vmul.f32 %v3743_v44, %v789_v51 }
 0xe81   :  { %v774_v45 = vpop.permute.xlu1 %773 }
 0xe82   :  { %v776_v46 = vmul.f32 %v3743_v44, %v774_v45 }
 0xe84   :  { %778 = vrot.lane.b32.xlu0 %v776_v46, %s3874_s20 }
 0xef6   :  { %v779_v47 = vpop.permute.xlu0 %778 }
 0xef7   :  { %v781_v48 = vadd.f32 %v779_v47, %v135_v13 }
 0xef9   :  { %3744 = vtanh.f32 %v781_v48 }
 0xf06   :  { %v3745_v49 = vpop.eup %3744 }
 0xf07   :  { %785 = vrot.lane.b32.xlu1 %v3745_v49, %s3875_s3 }
 0xf79   :  { %v786_v52 = vpop.permute.xlu1 %785 }
 0xf7a   :  { %v788_v53 = vmul.f32 %v786_v52, %v783_v50 }
 0xf7c   :  { %v4161_v55 = vadd.f32 %v791_v54, %v788_v53  ;;  %v145_v54 = vadd.f32 %v4076_v15, %v4019_v20 }
 0xf7e   :  { %v794_v56 = vrot.slane %v4161_v55, 4 }
 0xf80   :  { %795 = vrot.lane.b32.xlu0 %v794_v56, %s3875_s3 }
 0xff2   :  { %v4165_v57 = vpop.permute.xlu0 %795 }
 0xff3   :  { %3428 = vmatmul.mubr.msk.f32.vlgmr.msra.gmra.mxu0 %vm152_vm2, %v4165_v57 }
 0xff4   :  { %3442 = vmatpush3.msra.mxu0 %v3938_v0  ;;  %3449 = vmatprep.mubr.msk.f32.mxu0 %vm3873_vm1, %v3872_v3 }
 0xff5   :  { %3443 = vmatprep.subr.mxu0 %v3872_v3 }
 0xff6   :  { %3444 = vmatpush3.msra.mxu0 %v3948_v4 }
 0xff7   :  { %3445 = vmatprep.subr.mxu0 %v3872_v3 }
 0xff8   :  { %3446 = vmatpush3.msra.mxu0 %v3962_v7 }
 0xff9   :  { %3447 = vmatprep.subr.mxu0 %v3872_v3 }
 0xffa   :  { %3448 = vmatpush3.msra.mxu0 %v3980_v11 }
0x10b3   :  { %v865_v58 = vpop.f32.mrf.mxu0 }
0x10b4   :  { %v876_v59 = vadd.f32 %v865_v58, %v4013_v14  ;;  %v869_v5 = vadd.f32 %v865_v58, %v140_v1 }
0x10b5   :  { %v3429_v61 = vpop.f32.mrf.mxu0 }
0x10b6   :  { %878 = vrot.lane.b32.xlu1 %v876_v59, %s3874_s20  ;;  %v3160_v10 = vmul.f32 -1.442695, %v869_v5 }
0x10b8   :  { %3746 = vpow2.f32 %v3160_v10 }
0x10c5   :  { %v3747_v13 = vpop.eup %3746 }
0x10c6   :  { %v873_v16 = vadd.f32 1.0, %v3747_v13 }
0x10c8   :  { %3748 = vrcp.f32 %v873_v16 }
0x10d5   :  { %v3749_v18 = vpop.eup %3748 }
0x10d6   :  { %v888_v25 = vsub.f32 1.0, %v3749_v18  ;;  %v895_v12 = vmul.f32 %v3749_v18, %v794_v56 }
0x1128   :  { %v879_v19 = vpop.permute.xlu1 %878 }
0x1129   :  { %v881_v21 = vmul.f32 %v3749_v18, %v879_v19 }
0x112b   :  { %883 = vrot.lane.b32.xlu0 %v881_v21, %s3874_s20 }
0x119d   :  { %v884_v22 = vpop.permute.xlu0 %883 }
0x119e   :  { %v886_v23 = vadd.f32 %v884_v22, %v140_v1 }
0x11a0   :  { %3750 = vtanh.f32 %v886_v23 }
0x11ad   :  { %v3751_v24 = vpop.eup %3750 }
0x11ae   :  { %890 = vrot.lane.b32.xlu1 %v3751_v24, %s3875_s3 }
0x1220   :  { %v891_v26 = vpop.permute.xlu1 %890 }
0x1221   :  { %v893_v27 = vmul.f32 %v891_v26, %v888_v25  ;;  %v1227_v26 = vsub.s32 5, %v3955_v6 }
0x1223   :  { %v4184_v28 = vadd.f32 %v895_v12, %v893_v27 }
0x1225   :  { %898 = vrot.lane.b32.xlu0 %v4184_v28, %s3875_s3  ;;  %v1001_v44 = vrot.slane %v4184_v28, 4 }
0x1297   :  { %v899_v29 = vpop.permute.xlu0 %898 }
0x1298   :  { %3439 = vmatmul.mubr.msk.f32.vlgmr.msra.gmra.mxu1 %vm152_vm2, %v899_v29  ;;  %v1228_v29 = vrot.slane %v3970_v9, %v1227_v26 }
0x1299   :  { %3453 = vmatpush3.msra.mxu1 %v3938_v0  ;;  %3460 = vmatprep.mubr.msk.f32.mxu1 %vm3873_vm1, %v3872_v3 }
0x129a   :  { %3454 = vmatprep.subr.mxu1 %v3872_v3 }
0x129b   :  { %3455 = vmatpush3.msra.mxu1 %v3948_v4 }
0x129c   :  { %3456 = vmatprep.subr.mxu1 %v3872_v3 }
0x129d   :  { %3457 = vmatpush3.msra.mxu1 %v3962_v7 }
0x129e   :  { %3458 = vmatprep.subr.mxu1 %v3872_v3 }
0x129f   :  { %3459 = vmatpush3.msra.mxu1 %v3980_v11 }
0x12a0   :  { %3473 = vmatprep.subr.mxu1 %v3872_v3 }
0x1358   :  { %v968_v8 = vpop.f32.mrf.mxu1 }
0x1359   :  { %v982_v0 = vadd.f32 %v968_v8, %v4013_v14  ;;  %v973_v33 = vrot.slane %v968_v8, 4  ;;  %v1502_v8 = vsub.s32 4, %v3955_v6 }
0x135a   :  { %v3440_v30 = vpop.f32.mrf.mxu1 }
0x135b   :  { %v984_v32 = vrot.slane %v982_v0, 4  ;;  %v975_v34 = vadd.f32 %v973_v33, %v140_v1  ;;  %v1503_v0 = vrot.slane %v3970_v9, %v1502_v8 }
0x135d   :  { %985 = vrot.lane.b32.xlu1 %v984_v32, %s3874_s20  ;;  %v3162_v4 = vmul.f32 -1.442695, %v975_v34 }
0x135f   :  { %3752 = vpow2.f32 %v3162_v4 }
0x136c   :  { %v3753_v35 = vpop.eup %3752 }
0x136d   :  { %v979_v37 = vadd.f32 1.0, %v3753_v35 }
0x136f   :  { %3754 = vrcp.f32 %v979_v37 }
0x137c   :  { %v3755_v7 = vpop.eup %3754 }
0x137d   :  { %v995_v43 = vsub.f32 1.0, %v3755_v7  ;;  %v1003_v47 = vmul.f32 %v3755_v7, %v1001_v44 }
0x13cf   :  { %v986_v39 = vpop.permute.xlu1 %985 }
0x13d0   :  { %v988_v40 = vmul.f32 %v3755_v7, %v986_v39 }
0x13d2   :  { %990 = vrot.lane.b32.xlu0 %v988_v40, %s3874_s20 }
0x1444   :  { %v991_v11 = vpop.permute.xlu0 %990 }
0x1445   :  { %v993_v41 = vadd.f32 %v991_v11, %v140_v1 }
0x1447   :  { %3756 = vtanh.f32 %v993_v41 }
0x1454   :  { %v3757_v42 = vpop.eup %3756 }
0x1455   :  { %997 = vrot.lane.b32.xlu1 %v3757_v42, %s3875_s3 }
0x14c7   :  { %v998_v45 = vpop.permute.xlu1 %997 }
0x14c8   :  { %v1000_v46 = vmul.f32 %v998_v45, %v995_v43 }
0x14ca   :  { %v4204_v48 = vadd.f32 %v1003_v47, %v1000_v46  ;;  %v1220_v47 = vrot.slane %v3970_v9, 7 }
0x14cc   :  { %v1006_v49 = vrot.slane %v4204_v48, 4  ;;  %3620 = vpush %v1220_v47 }
0x14ce   :  { %1007 = vrot.lane.b32.xlu0 %v1006_v49, %s3875_s3 }
0x14fd   :  { %s3621_s29 = spop %3620 }
0x1540   :  { %v4208_v50 = vpop.permute.xlu0 %1007 }
0x1541   :  { %3450 = vmatmul.mubr.msk.f32.vlgmr.msra.gmra.mxu0 %vm152_vm2, %v4208_v50 }
0x1601   :  { %v1077_v51 = vpop.f32.mrf.mxu0 }
0x1602   :  { %v1088_v52 = vadd.f32 %v1077_v51, %v4013_v14  ;;  %v1081_v56 = vadd.f32 %v1077_v51, %v145_v54 }
0x1603   :  { %v3451_v53 = vpop.f32.mrf.mxu0 }
0x1604   :  { %1090 = vrot.lane.b32.xlu1 %v1088_v52, %s3874_s20  ;;  %v3164_v58 = vmul.f32 -1.442695, %v1081_v56 }
0x1606   :  { %3758 = vpow2.f32 %v3164_v58 }
0x1613   :  { %v3759_v59 = vpop.eup %3758 }
0x1614   :  { %v1085_v61 = vadd.f32 1.0, %v3759_v59 }
0x1616   :  { %3760 = vrcp.f32 %v1085_v61 }
0x1623   :  { %v3761_v1 = vpop.eup %3760 }
0x1624   :  { %v1100_v19 = vsub.f32 1.0, %v3761_v1  ;;  %v1107_v20 = vmul.f32 %v3761_v1, %v1006_v49 }
0x1676   :  { %v1091_v5 = vpop.permute.xlu1 %1090 }
0x1677   :  { %v1093_v10 = vmul.f32 %v3761_v1, %v1091_v5 }
0x1679   :  { %1095 = vrot.lane.b32.xlu0 %v1093_v10, %s3874_s20 }
0x16eb   :  { %v1096_v13 = vpop.permute.xlu0 %1095 }
0x16ec   :  { %v1098_v16 = vadd.f32 %v1096_v13, %v145_v54 }
0x16ee   :  { %3762 = vtanh.f32 %v1098_v16 }
0x16fb   :  { %v3763_v18 = vpop.eup %3762 }
0x16fc   :  { %1102 = vrot.lane.b32.xlu1 %v3763_v18, %s3875_s3 }
0x176e   :  { %v1103_v21 = vpop.permute.xlu1 %1102 }
0x176f   :  { %v1105_v15 = vmul.f32 %v1103_v21, %v1100_v19 }
0x1771   :  { %v4218_v22 = vadd.f32 %v1107_v20, %v1105_v15 }
0x1773   :  { %1110 = vrot.lane.b32.xlu0 %v4218_v22, %s3875_s3  ;;  %v1213_v49 = vrot.slane %v4218_v22, 4 }
0x17e5   :  { %v1111_v23 = vpop.permute.xlu0 %1110 }
0x17e6   :  { %3461 = vmatmul.mubr.msk.f32.vlgmr.msra.gmra.mxu1 %vm152_vm2, %v1111_v23 }
0x17e7   :  { %3489 = vmatprep.mubr.msk.f32.mxu1 %vm3873_vm1, %v3872_v3 }
0x18a6   :  { %v1180_v24 = vpop.f32.mrf.mxu1 }
0x18a7   :  { %v1194_v25 = vadd.f32 %v1180_v24, %v4013_v14  ;;  %v1185_v30 = vrot.slane %v1180_v24, 4 }
0x18a8   :  { %v3462_v12 = vpop.f32.mrf.mxu1 }
0x18a9   :  { %v1196_v27 = vrot.slane %v1194_v25, 4  ;;  %v1187_v32 = vadd.f32 %v1185_v30, %v145_v54 }
0x18ab   :  { %1197 = vrot.lane.b32.xlu1 %v1196_v27, %s3874_s20  ;;  %v3166_v14 = vmul.f32 -1.442695, %v1187_v32  ;;  %v1218_v32 = vand.u32 127, %v38_v2 }
0x18ad   :  { %3764 = vpow2.f32 %v3166_v14  ;;  %vm1242_vm5 = vcmp.eq.s32.totalorder %v1218_v32, 0  ;;  %vm1256_vm6 = vcmp.eq.s32.totalorder %v1218_v32, 1  ;;  %vm1285_vm7 = vcmp.eq.s32.totalorder %v1218_v32, 3 }
0x18ae   :  { %v3167_v14 = vsel %vm1242_vm5, 1.0, %v3872_v3  ;;  %vm1272_vm8 = vcmp.eq.s32.totalorder %v1218_v32, 2  ;;  %vm1314_vm9 = vcmp.eq.s32.totalorder %v1218_v32, 5  ;;  %vm1301_vm10 = vcmp.eq.s32.totalorder %v1218_v32, 4 }
0x18af   :  { %1230 = vrot.lane.b32.xlu1 %v1228_v29, %s3876_s0  ;;  %v3169_v2 = vsel %vm1272_vm8, 1.0, %v3872_v3  ;;  %v3171_v47 = vsel %vm1301_vm10, 1.0, %v3872_v3  ;;  %vm1343_vm11 = vcmp.eq.s32.totalorder %v1218_v32, 7  ;;  %vm1330_vm12 = vcmp.eq.s32.totalorder %v1218_v32, 6 }
0x18b0   :  { %vm1359_vm13 = vcmp.eq.s32.totalorder %v1218_v32, 8  ;;  %vm1372_vm14 = vcmp.eq.s32.totalorder %v1218_v32, 9  ;;  %vm1628_vm5 = vcmask 523264  }
0x18b3   :  { %1505 = vrot.lane.b32.xlu1 %v1503_v0, %s3876_s0 }
0x18ba   :  { %v3765_v33 = vpop.eup %3764 }
0x18bb   :  { %v1191_v34 = vadd.f32 1.0, %v3765_v33 }
0x18bd   :  { %3766 = vrcp.f32 %v1191_v34  ;;  %v3168_v34 = vsel %vm1256_vm6, 1.0, %v3872_v3 }
0x18ca   :  { %v3767_v4 = vpop.eup %3766 }
0x18cb   :  { %v1215_v53 = vmul.f32 %v3767_v4, %v1213_v49 }
0x191d   :  { %v1198_v35 = vpop.permute.xlu1 %1197 }
0x191e   :  { %v1200_v37 = vmul.f32 %v3767_v4, %v1198_v35 }
0x1920   :  { %1202 = vrot.lane.b32.xlu0 %v1200_v37, %s3874_s20  ;;  %v1222_v37 = vstv %s3621_s29 }
0x1921   :  { %v1231_v7 = vpop.permute.xlu1 %1230 }
0x1922   :  { %v1247_v39 = vmul.f32 %v1231_v7, %v4068_v62  ;;  %v1277_v40 = vmul.f32 %v1231_v7, %v4117_v60  ;;  %v1306_v11 = vmul.f32 %v1231_v7, %v4161_v55  ;;  %v1335_v41 = vmul.f32 %v1231_v7, %v4204_v48 }
0x1923   :  { %v1233_v62 = vmul.f32 %v1231_v7, %v4024_v36  ;;  %v1264_v60 = vmul.f32 %v1231_v7, %v4097_v38  ;;  %v1293_v55 = vmul.f32 %v1231_v7, %v4141_v31  ;;  %v1322_v45 = vmul.f32 %v1231_v7, %v4184_v28 }
0x1924   :  { %1249 = vrot.lane.b32.xlu1 %v1247_v39, %s3875_s3  ;;  %v1351_v46 = vmul.f32 %v1231_v7, %v4218_v22  ;;  %v1207_v48 = vsub.f32 1.0, %v3767_v4 }
0x1925   :  { %v4257_v56 = vpop.permute.xlu1 %1505 }
0x1928   :  { %1279 = vrot.lane.b32.xlu1 %v1277_v40, %s3875_s3  ;;  %v3170_v40 = vsel %vm1285_vm7, 1.0, %v3872_v3 }
0x192c   :  { %1308 = vrot.lane.b32.xlu1 %v1306_v11, %s3875_s3 }
0x1930   :  { %1337 = vrot.lane.b32.xlu1 %v1335_v41, %s3875_s3 }
0x1992   :  { %v1203_v42 = vpop.permute.xlu0 %1202 }
0x1993   :  { %v1205_v43 = vadd.f32 %v1203_v42, %v145_v54 }
0x1995   :  { %3768 = vtanh.f32 %v1205_v43 }
0x1996   :  { %v1250_v1 = vpop.permute.xlu1 %1249 }
0x1997   :  { %v1253_v5 = vsel %vm1252_vm3, %v1250_v1, 0.0 }
0x199a   :  { %v1280_v13 = vpop.permute.xlu1 %1279 }
0x199b   :  { %v1282_v15 = vsel %vm1252_vm3, %v1280_v13, 0.0 }
0x199e   :  { %v1309_v21 = vpop.permute.xlu1 %1308 }
0x199f   :  { %v1311_v25 = vsel %vm1252_vm3, %v1309_v21, 0.0 }
0x19a2   :  { %v3769_v44 = vpop.eup %3768  ;;  %v1338_v26 = vpop.permute.xlu1 %1337 }
0x19a3   :  { %1209 = vrot.lane.b32.xlu0 %v3769_v44, %s3875_s3  ;;  %v1340_v27 = vsel %vm1252_vm3, %v1338_v26, 0.0 }
0x19a7   :  { %1235 = vrot.lane.b32.xlu0 %v1233_v62, %s3875_s3 }
0x19ab   :  { %1266 = vrot.lane.b32.xlu0 %v1264_v60, %s3875_s3 }
0x19af   :  { %1295 = vrot.lane.b32.xlu0 %v1293_v55, %s3875_s3 }
0x19b3   :  { %1324 = vrot.lane.b32.xlu0 %v1322_v45, %s3875_s3  ;;  %v3172_v45 = vsel %vm1314_vm9, 1.0, %v3872_v3 }
0x19b7   :  { %1353 = vrot.lane.b32.xlu0 %v1351_v46, %s3875_s3 }
0x1a15   :  { %v1210_v51 = vpop.permute.xlu0 %1209 }
0x1a16   :  { %v1212_v52 = vmul.f32 %v1210_v51, %v1207_v48 }
0x1a18   :  { %v4255_v54 = vadd.f32 %v1215_v53, %v1212_v52 }
0x1a19   :  { %v1236_v9 = vpop.permute.xlu0 %1235 }
0x1a1a   :  { %v1508_v58 = vmul.f32 %v4257_v56, %v4255_v54  ;;  %v1364_v59 = vmul.f32 %v1231_v7, %v4255_v54  ;;  %v1239_v18 = vsel %vm1238_vm4, %v1236_v9, 0.0 }
0x1a1c   :  { %1510 = vrot.lane.b32.xlu0 %v1508_v58, %s3875_s3  ;;  %1366 = vrot.lane.b32.xlu1 %v1364_v59, %s3875_s3  ;;  %v3174_v59 = vsel %vm1343_vm11, 1.0, %v3872_v3 }
0x1a1d   :  { %v1267_v61 = vpop.permute.xlu0 %1266 }
0x1a1e   :  { %v1269_v16 = vsel %vm1238_vm4, %v1267_v61, 0.0  ;;  %v3173_v61 = vsel %vm1330_vm12, 1.0, %v3872_v3 }
0x1a21   :  { %v1296_v10 = vpop.permute.xlu0 %1295 }
0x1a22   :  { %v1298_v20 = vsel %vm1238_vm4, %v1296_v10, 0.0 }
0x1a25   :  { %v1325_v19 = vpop.permute.xlu0 %1324 }
0x1a26   :  { %v1327_v23 = vsel %vm1238_vm4, %v1325_v19, 0.0  ;;  %v3175_v19 = vsel %vm1359_vm13, 1.0, %v3872_v3 }
0x1a29   :  { %v1354_v24 = vpop.permute.xlu0 %1353 }
0x1a2a   :  { %v1356_v12 = vsel %vm1238_vm4, %v1354_v24, 0.0 }
0x1a3b   :  { %1254 = vadd.xlane.f32.xlu0 %v1253_v5 }
0x1a3f   :  { %1270 = vadd.xlane.f32.xlu0 %v1269_v16 }
0x1a40   :  { %1240 = vadd.xlane.f32.xlu1 %v1239_v18 }
0x1a43   :  { %1299 = vadd.xlane.f32.xlu0 %v1298_v20  ;;  %v3176_v20 = vsel %vm1372_vm14, 1.0, %v3872_v3 }
0x1a44   :  { %1283 = vadd.xlane.f32.xlu1 %v1282_v15 }
0x1a47   :  { %1328 = vadd.xlane.f32.xlu0 %v1327_v23 }
0x1a48   :  { %1312 = vadd.xlane.f32.xlu1 %v1311_v25 }
0x1a4b   :  { %1357 = vadd.xlane.f32.xlu0 %v1356_v12 }
0x1a4c   :  { %1341 = vadd.xlane.f32.xlu1 %v1340_v27 }
0x1a8e   :  { %v1511_v29 = vpop.permute.xlu0 %1510  ;;  %v1367_v8 = vpop.permute.xlu1 %1366 }
0x1a8f   :  { %v1513_v0 = vsel %vm1252_vm3, %v1511_v29, 0.0  ;;  %v1369_v30 = vsel %vm1252_vm3, %v1367_v8, 0.0  ;;  %vm1390_vm3 = vcmask 97280  }
0x1a90   :  { %1514 = vadd.xlane.f32.xlu0 %v1513_v0  ;;  %1370 = vadd.xlane.f32.xlu1 %v1369_v30 }
0x1ac4   :  { %v1255_v4 = vpop.xlane.xlu0 %1254 }
0x1ac5   :  { %v1259_v7 = vmul.f32 %v3168_v34, %v1255_v4 }
0x1ac7   :  { %v1261_v41 = vrot.slane %v1259_v7, 4  ;;  %v3878_v7 = vmov 1  }
0x1ac8   :  { %v1271_v42 = vpop.xlane.xlu0 %1270  ;;  %3640 = vset.pattern.permute.xlu1 %v3878_v7 }
0x1ac9   :  { %v1241_v33 = vpop.xlane.xlu1 %1240  ;;  %v1275_v62 = vmul.f32 %v3169_v2, %v1271_v42  ;;  %v3880_v2 = vmov 5   ;;  %v3881_v42 = vmov 7  }
0x1aca   :  { %v1245_v35 = vmul.f32 %v3167_v14, %v1241_v33 }
0x1acc   :  { %v1246_v39 = vadd.f32 %v1245_v35, %v1222_v37  ;;  %v1300_v48 = vpop.xlane.xlu0 %1299  ;;  %v3877_v37 = vmov 3  }
0x1acd   :  { %v1284_v11 = vpop.xlane.xlu1 %1283  ;;  %v1304_v52 = vmul.f32 %v3171_v47, %v1300_v48  ;;  %3641 = vset.pattern.permute.xlu0 %v3877_v37 }
0x1ace   :  { %v1263_v43 = vadd.f32 %v1261_v41, %v1246_v39  ;;  %v1288_v44 = vmul.f32 %v3170_v40, %v1284_v11  ;;  %v3879_v41 = vmov 6  }
0x1ad0   :  { %v1276_v60 = vadd.f32 %v1275_v62, %v1263_v43  ;;  %v1290_v55 = vrot.slane %v1288_v44, 4  ;;  %v1329_v1 = vpop.xlane.xlu0 %1328  ;;  %v3882_v43 = vmov 9   ;;  %v4299_v44 = vrot.slane %v4255_v54, 4 }
0x1ad1   :  { %v1313_v46 = vpop.xlane.xlu1 %1312  ;;  %v1333_v13 = vmul.f32 %v3173_v61, %v1329_v1  ;;  %v3883_v62 = vmov 0   ;;  %v1385_v61 = vld [vmem:[%s4876_s4 + $0x8] sm:$0xf] }
0x1ad2   :  { %v1292_v49 = vadd.f32 %v1290_v55, %v1276_v60  ;;  %v1317_v51 = vmul.f32 %v3172_v45, %v1313_v46  ;;  %v3884_v60 = vmov 2   ;;  %v3885_v55 = vmov 4   ;;  %3463 = vmatprep.subr.msk.mxu0 %vm1403_vm0, %v1385_v61 }
0x1ad3   :  { %v3886_v45 = vmov 8   ;;  %3464 = vmatpush3.msk.msra.mxu0 %vm1403_vm0, %v1385_v61 }
0x1ad4   :  { %v1305_v53 = vadd.f32 %v1304_v52, %v1292_v49  ;;  %v1319_v58 = vrot.slane %v1317_v51, 4  ;;  %v1358_v21 = vpop.xlane.xlu0 %1357 }
0x1ad5   :  { %v1342_v9 = vpop.xlane.xlu1 %1341  ;;  %v1362_v24 = vmul.f32 %v3175_v19, %v1358_v21  ;;  %v1381_v19 = vld [vmem:[%s4873_s1 + $0x8] sm:$0xff]  ;;  %v4363_v21 = vld [vmem:[%s4877_s5 + $0x18] sm:$0xff] }
0x1ad6   :  { %v1321_v5 = vadd.f32 %v1319_v58, %v1305_v53  ;;  %v1346_v10 = vmul.f32 %v3174_v59, %v1342_v9  ;;  %v4319_v59 = vld [vmem:[%s4877_s5 + $0x38] sm:$0xff]  ;;  %v4324_v9 = vld [vmem:[%s4877_s5 + $0x30] sm:$0xff] }
0x1ad7   :  { %3474 = vmatpush3.msra.mxu1 %v4319_v59 }
0x1ad8   :  { %v1334_v16 = vadd.f32 %v1333_v13, %v1321_v5  ;;  %v1348_v18 = vrot.slane %v1346_v10, 4  ;;  %3475 = vmatprep.subr.mxu1 %v3872_v3  ;;  %v4336_v5 = vld [vmem:[%s4877_s5 + $0x28] sm:$0xff]  ;;  %v1384_v10 = vld [vmem:[%s4876_s4] sm:$0xff] }
0x1ad9   :  { %3476 = vmatpush3.msra.mxu1 %v4324_v9  ;;  %3465 = vmatprep.subr.mxu0 %v1384_v10 }
0x1ada   :  { %v1350_v15 = vadd.f32 %v1348_v18, %v1334_v16  ;;  %3477 = vmatprep.subr.mxu1 %v3872_v3  ;;  %v4349_v16 = vld [vmem:[%s4877_s5 + $0x20] sm:$0xff]  ;;  %3466 = vmatpush3.msra.mxu0 %v1384_v10 }
0x1adb   :  { %v1380_v18 = vld [vmem:[%s4873_s1] sm:$0xff]  ;;  %3478 = vmatpush3.msra.mxu1 %v4336_v5  ;;  %3492 = vmatprep.subr.mxu0 %v3872_v3 }
0x1adc   :  { %v1363_v12 = vadd.f32 %v1362_v24, %v1350_v15  ;;  %3479 = vmatprep.subr.mxu1 %v3872_v3  ;;  %3467 = vmatprep.mubr.msk.f32.mxu0 %vm1390_vm3, %v1380_v18  ;;  %v4380_v15 = vld [vmem:[%s4877_s5 + $0x8] sm:$0xff] }
0x1add   :  { %3480 = vmatpush3.msra.mxu1 %v4349_v16  ;;  %3468 = vmatmul.mubr.msk.f32.vlgmr.msra.gmra.mxu0 %vm1390_vm3, %v1381_v19 }
0x1ade   :  { %3481 = vmatprep.subr.mxu1 %v3872_v3  ;;  %3493 = vmatpush3.msra.mxu0 %v4319_v59 }
0x1adf   :  { %3482 = vmatpush3.msra.mxu1 %v4363_v21  ;;  %3494 = vmatprep.subr.mxu0 %v3872_v3 }
0x1ae0   :  { %3483 = vmatprep.subr.mxu1 %v3872_v3  ;;  %3495 = vmatpush3.msra.mxu0 %v4324_v9 }
0x1ae1   :  { %3496 = vmatprep.subr.mxu0 %v3872_v3 }
0x1ae2   :  { %3497 = vmatpush3.msra.mxu0 %v4336_v5 }
0x1ae3   :  { %3498 = vmatprep.subr.mxu0 %v3872_v3 }
0x1ae4   :  { %3499 = vmatpush3.msra.mxu0 %v4349_v16 }
0x1ae5   :  { %3500 = vmatprep.subr.mxu0 %v3872_v3 }
0x1ae6   :  { %3501 = vmatpush3.msra.mxu0 %v4363_v21 }
0x1ae7   :  { %3502 = vmatprep.subr.mxu0 %v3872_v3 }
0x1b19   :  { %v1371_v23 = vpop.xlane.xlu1 %1370  ;;  %v1515_v26 = vpop.xlane.xlu0 %1514 }
0x1b1a   :  { %v1375_v25 = vmul.f32 %v3176_v20, %v1371_v23  ;;  %v1517_v29 = vrot.slane %v1515_v26, 4  ;;  %v4371_v20 = vld [vmem:[%s4877_s5 + $0x10] sm:$0xff] }
0x1b1b   :  { %3484 = vmatpush3.msra.mxu1 %v4371_v20  ;;  %3503 = vmatpush3.msra.mxu0 %v4371_v20 }
0x1b1c   :  { %v1377_v27 = vrot.slane %v1375_v25, 4  ;;  %3485 = vmatprep.subr.mxu1 %v3872_v3  ;;  %3504 = vmatprep.subr.mxu0 %v3872_v3 }
0x1b1d   :  { %3486 = vmatpush3.msra.mxu1 %v4380_v15  ;;  %3505 = vmatpush3.msra.mxu0 %v4380_v15 }
0x1b1e   :  { %v4286_v8 = vadd.f32 %v1377_v27, %v1363_v12  ;;  %3487 = vmatprep.subr.mxu1 %v3872_v3  ;;  %3506 = vmatprep.subr.mxu0 %v3872_v3 }
0x1b20   :  { %v1519_v0 = vadd.f32 %v1517_v29, %v4286_v8 }
0x1b22   :  { %v1520_v30 = vmax.f32 %v1519_v0, 0.0 }
0x1b24   :  { %v1522_v32 = vsel %vm1521_vm15, %v1520_v30, -inf }
0x1b25   :  { %1523 = vmax.xlane.f32.xlu1 %v1522_v32 }
0x1bae   :  { %v1524_v14 = vpop.xlane.xlu1 %1523 }
0x1baf   :  { %v1525_v33 = vsub.f32 %v1520_v30, %v1524_v14 }
0x1bb1   :  { %v1526_v34 = vmul.f32 1.442695, %v1525_v33 }
0x1bb3   :  { %3770 = vpow2.f32 %v1526_v34 }
0x1bc0   :  { %v3771_v4 = vpop.eup %3770 }
0x1bc1   :  { %v1528_v35 = vsel %vm1521_vm15, %v3771_v4, 0.0 }
0x1bc2   :  { %1529 = vadd.xlane.f32.xlu0 %v1528_v35  ;;  %v4406_v35 = vld [vmem:[%s4877_s5] sm:$0xff] }
0x1bc3   :  { %3488 = vmatpush3.msra.mxu1 %v4406_v35  ;;  %3507 = vmatpush3.msra.mxu0 %v4406_v35 }
0x1bc4   :  { %3511 = vmatprep.subr.mxu1 %v3872_v3  ;;  %3530 = vmatprep.subr.mxu0 %v3872_v3 }
0x1c4b   :  { %v1530_v39 = vpop.xlane.xlu0 %1529 }
0x1c4c   :  { %3772 = vrcp.f32 %v1530_v39 }
0x1c59   :  { %v3773_v40 = vpop.eup %3772 }
0x1c5a   :  { %v1532_v11 = vmul.f32 %v3773_v40, %v3771_v4  ;;  %v1711_v40 = vsub.s32 3, %v3955_v6 }
0x1c5c   :  { %1557 = vperm.xlu0 %3641, %v1532_v11   ;;  %1540 = vperm.xlu1 %3640, %v1532_v11  }
0x1c60   :  { %3648 = vset.pattern.permute.xlu0 %v3879_v41  ;;  %3642 = vset.pattern.permute.xlu1 %v3880_v2 }
0x1c61   :  { %1585 = vperm.xlu0 %3648, %v1532_v11   ;;  %1574 = vperm.xlu1 %3642, %v1532_v11  }
0x1c65   :  { %3643 = vset.pattern.permute.xlu1 %v3881_v42  ;;  %3651 = vset.pattern.permute.xlu0 %v3877_v37 }
0x1c66   :  { %1591 = vperm.xlu1 %3643, %v1532_v11  }
0x1c6a   :  { %3644 = vset.pattern.permute.xlu1 %v3882_v43 }
0x1c6b   :  { %1608 = vperm.xlu1 %3644, %v1532_v11  }
0x1c6f   :  { %1613 = vrot.lane.b32.xlu1 %v4299_v44, %s3875_s3 }
0x1c70   :  { %3645 = vset.pattern.permute.xlu1 %v3883_v62 }
0x1c73   :  { %1535 = vperm.xlu1 %3645, %v1532_v11  }
0x1c77   :  { %3646 = vset.pattern.permute.xlu1 %v3884_v60 }
0x1c78   :  { %1551 = vperm.xlu1 %3646, %v1532_v11  }
0x1c7c   :  { %3647 = vset.pattern.permute.xlu1 %v3885_v55 }
0x1c7d   :  { %1568 = vperm.xlu1 %3647, %v1532_v11  }
0x1c81   :  { %3649 = vset.pattern.permute.xlu1 %v3886_v45 }
0x1cd7   :  { %v1541_v54 = vpop.permute.xlu1 %1540  ;;  %v1558_v47 = vpop.permute.xlu0 %1557 }
0x1cd8   :  { %v1544_v46 = vmul.f32 %v1541_v54, %v4078_v17  ;;  %v1561_v48 = vmul.f32 %v1558_v47, %v4121_v63 }
0x1cda   :  { %1546 = vrot.lane.b32.xlu1 %v1544_v46, %s3876_s0  ;;  %v3840_v46 = vld [vmem:[%s4879_s7] sm:$0xff] }
0x1cdb   :  { %v1712_v47 = vrot.slane %v3840_v46, %v1711_v40 }
0x1cdc   :  { %v1575_v49 = vpop.permute.xlu1 %1574  ;;  %v1586_v33 = vpop.permute.xlu0 %1585 }
0x1cdd   :  { %v1578_v51 = vmul.f32 %v1575_v49, %v4165_v57  ;;  %v1588_v54 = vmul.f32 %v1586_v33, %v4184_v28 }
0x1cde   :  { %1563 = vrot.lane.b32.xlu1 %v1561_v48, %s3876_s0 }
0x1cdf   :  { %1580 = vrot.lane.b32.xlu0 %v1578_v51, %s3876_s0 }
0x1ce1   :  { %v1592_v52 = vpop.permute.xlu1 %1591 }
0x1ce2   :  { %1602 = vperm.xlu1 %3649, %v1532_v11   ;;  %v1595_v53 = vmul.f32 %v1592_v52, %v4208_v50 }
0x1ce6   :  { %1597 = vrot.lane.b32.xlu1 %v1595_v53, %s3876_s0  ;;  %v1609_v58 = vpop.permute.xlu1 %1608 }
0x1ce7   :  { %3650 = vset.pattern.permute.xlu1 %v3878_v7 }
0x1cea   :  { %v4330_v1 = vpop.permute.xlu1 %1613 }
0x1ceb   :  { %v1616_v13 = vmul.f32 %v4330_v1, %v1609_v58 }
0x1ced   :  { %1618 = vrot.lane.b32.xlu0 %v1616_v13, %s3876_s0 }
0x1cee   :  { %v1536_v23 = vpop.permute.xlu1 %1535 }
0x1cef   :  { %v1538_v26 = vmul.f32 %v1536_v23, %v4024_v36 }
0x1cf1   :  { %1714 = vrot.lane.b32.xlu0 %v1712_v47, %s3875_s3 }
0x1cf3   :  { %v1552_v24 = vpop.permute.xlu1 %1551 }
0x1cf4   :  { %v1554_v29 = vmul.f32 %v1552_v24, %v4097_v38 }
0x1cf8   :  { %v1569_v25 = vpop.permute.xlu1 %1568 }
0x1cf9   :  { %v1571_v14 = vmul.f32 %v1569_v25, %v4141_v31  ;;  %v1388_v25 = vsub.s32 1, %v3955_v6 }
0x1d4c   :  { %v1547_v12 = vpop.permute.xlu1 %1546 }
0x1d4d   :  { %v1549_v27 = vadd.f32 %v1547_v12, %v1538_v26  ;;  %v4446_v26 = vpop.f32.mrf.mxu0  ;;  %v4448_v12 = vrot.slane %v3840_v46, %v1388_v25 }
0x1d4f   :  { %v1555_v0 = vadd.f32 %v1554_v29, %v1549_v27  ;;  %v1473_v27 = vpop.f32.mrf.mxu0 }
0x1d50   :  { %v1564_v30 = vpop.permute.xlu1 %1563  ;;  %v4451_v29 = vadd.f32 %v1473_v27, %v4448_v12 }
0x1d51   :  { %v1566_v32 = vadd.f32 %v1564_v30, %v1555_v0  ;;  %v1581_v4 = vpop.permute.xlu0 %1580 }
0x1d53   :  { %v1572_v34 = vadd.f32 %v1571_v14, %v1566_v32 }
0x1d55   :  { %v1583_v39 = vadd.f32 %v1581_v4, %v1572_v34 }
0x1d57   :  { %v1589_v48 = vadd.f32 %v1588_v54, %v1583_v39 }
0x1d5d   :  { %v1603_v11 = vpop.permute.xlu1 %1602 }
0x1d5e   :  { %v1605_v51 = vmul.f32 %v1603_v11, %v4218_v22 }
0x1d5f   :  { %v1619_v58 = vpop.permute.xlu0 %1618 }
0x1d61   :  { %v1598_v49 = vpop.permute.xlu1 %1597 }
0x1d62   :  { %v1600_v52 = vadd.f32 %v1598_v49, %v1589_v48 }
0x1d63   :  { %v4441_v18 = vpop.permute.xlu0 %1714 }
0x1d64   :  { %v1606_v53 = vadd.f32 %v1605_v51, %v1600_v52 }
0x1d66   :  { %v1621_v61 = vadd.f32 %v1619_v58, %v1606_v53 }
0x1d68   :  { %1623 = vrot.lane.b32.xlu1 %v1621_v61, %s3875_s3 }
0x1dda   :  { %v1624_v10 = vpop.permute.xlu1 %1623 }
0x1ddb   :  { %v1627_v13 = vsel %vm152_vm2, %v1624_v10, %v4299_v44 }
0x1ddc   :  { %3490 = vmatmul.mubr.msk.f32.vlgmr.msra.gmra.mxu1 %vm1628_vm5, %v1627_v13 }
0x1ddd   :  { %3512 = vmatpush3.msra.mxu1 %v4319_v59  ;;  %3527 = vmatprep.mubr.msk.f32.mxu1 %vm3873_vm1, %v3872_v3 }
0x1dde   :  { %3513 = vmatprep.subr.mxu1 %v3872_v3 }
0x1ddf   :  { %3514 = vmatpush3.msra.mxu1 %v4324_v9 }
0x1de0   :  { %3515 = vmatprep.subr.mxu1 %v3872_v3 }
0x1de1   :  { %3516 = vmatpush3.msra.mxu1 %v4336_v5 }
0x1de2   :  { %3517 = vmatprep.subr.mxu1 %v3872_v3 }
0x1de3   :  { %3518 = vmatpush3.msra.mxu1 %v4349_v16 }
0x1de4   :  { %3519 = vmatprep.subr.mxu1 %v3872_v3 }
0x1de5   :  { %3520 = vmatpush3.msra.mxu1 %v4363_v21 }
0x1de6   :  { %3521 = vmatprep.subr.mxu1 %v3872_v3 }
0x1de7   :  { %3522 = vmatpush3.msra.mxu1 %v4371_v20 }
0x1de8   :  { %3523 = vmatprep.subr.mxu1 %v3872_v3 }
0x1de9   :  { %3524 = vmatpush3.msra.mxu1 %v4380_v15 }
0x1dea   :  { %3525 = vmatprep.subr.mxu1 %v3872_v3 }
0x1deb   :  { %3526 = vmatpush3.msra.mxu1 %v4406_v35 }
0x1dec   :  { %3549 = vmatprep.subr.mxu1 %v3872_v3 }
0x1e9c   :  { %v1698_v19 = vpop.f32.mrf.mxu1 }
0x1e9d   :  { %v1717_v23 = vadd.f32 %v4441_v18, %v1698_v19  ;;  %v1702_v0 = vadd.f32 %v1698_v19, %v4451_v29 }
0x1e9e   :  { %v3491_v24 = vpop.f32.mrf.mxu1 }
0x1e9f   :  { %1719 = vrot.lane.b32.xlu1 %v1717_v23, %s3876_s0  ;;  %v3183_v30 = vmul.f32 -1.442695, %v1702_v0 }
0x1ea1   :  { %3774 = vpow2.f32 %v3183_v30 }
0x1eae   :  { %v3775_v32 = vpop.eup %3774 }
0x1eaf   :  { %v1706_v14 = vadd.f32 1.0, %v3775_v32 }
0x1eb1   :  { %3776 = vrcp.f32 %v1706_v14 }
0x1ebe   :  { %v3777_v33 = vpop.eup %3776 }
0x1ebf   :  { %v1729_v54 = vsub.f32 1.0, %v3777_v33  ;;  %v1735_v47 = vmul.f32 %v3777_v33, %v4299_v44 }
0x1f11   :  { %v1720_v34 = vpop.permute.xlu1 %1719 }
0x1f12   :  { %v1722_v4 = vmul.f32 %v3777_v33, %v1720_v34 }
0x1f14   :  { %1724 = vrot.lane.b32.xlu0 %v1722_v4, %s3874_s20 }
0x1f86   :  { %v1725_v39 = vpop.permute.xlu0 %1724 }
0x1f87   :  { %v1727_v40 = vadd.f32 %v1725_v39, %v1702_v0 }
0x1f89   :  { %3778 = vtanh.f32 %v1727_v40 }
0x1f96   :  { %v3779_v11 = vpop.eup %3778 }
0x1f97   :  { %1731 = vrot.lane.b32.xlu1 %v3779_v11, %s3875_s3 }
0x2009   :  { %v1732_v46 = vpop.permute.xlu1 %1731 }
0x200a   :  { %v1734_v48 = vmul.f32 %v1732_v46, %v1729_v54 }
0x200c   :  { %v4457_v49 = vadd.f32 %v1735_v47, %v1734_v48  ;;  %v1382_v47 = vld [vmem:[%s4873_s1 + $0x10] sm:$0xff]  ;;  %v1383_v48 = vld [vmem:[%s4873_s1 + $0x18] sm:$0xf] }
0x200d   :  { %3470 = vmatprep.mubr.msk.f32.mxu0 %vm1390_vm3, %v1382_v47 }
0x200e   :  { %v1737_v51 = vmul.f32 %v4457_v49, %v4257_v56  ;;  %3471 = vmatmul.mubr.msk.f32.gmra.mxu0 %vm1390_vm3, %v1383_v48 }
0x200f   :  { %3508 = vmatprep.mubr.msk.f32.mxu0 %vm3873_vm1, %v3872_v3 }
0x2010   :  { %1739 = vrot.lane.b32.xlu0 %v1737_v51, %s3875_s3 }
0x2082   :  { %v1740_v52 = vpop.permute.xlu0 %1739 }
0x2083   :  { %v1742_v53 = vsel %vm1238_vm4, %v1740_v52, 0.0 }
0x2084   :  { %1743 = vadd.xlane.f32.xlu1 %v1742_v53 }
0x20ce   :  { %v4523_v48 = vpop.f32.mrf.mxu0 }
0x210d   :  { %v1744_v58 = vpop.xlane.xlu1 %1743 }
0x210e   :  { %v1745_v61 = vadd.f32 %v1744_v58, %v4286_v8 }
0x2110   :  { %v1746_v10 = vmax.f32 %v1745_v61, 0.0 }
0x2112   :  { %v1747_v13 = vsel %vm1521_vm15, %v1746_v10, -inf }
0x2113   :  { %1748 = vmax.xlane.f32.xlu0 %v1747_v13 }
0x219c   :  { %v1749_v44 = vpop.xlane.xlu0 %1748 }
0x219d   :  { %v1750_v19 = vsub.f32 %v1746_v10, %v1749_v44 }
0x219f   :  { %v1751_v23 = vmul.f32 1.442695, %v1750_v19 }
0x21a1   :  { %3780 = vpow2.f32 %v1751_v23 }
0x21ae   :  { %v3781_v24 = vpop.eup %3780 }
0x21af   :  { %v1753_v25 = vsel %vm1521_vm15, %v3781_v24, 0.0 }
0x21b0   :  { %1754 = vadd.xlane.f32.xlu0 %v1753_v25 }
0x2239   :  { %v1755_v27 = vpop.xlane.xlu0 %1754 }
0x223a   :  { %3782 = vrcp.f32 %v1755_v27 }
0x2247   :  { %v3783_v0 = vpop.eup %3782 }
0x2248   :  { %v1757_v30 = vmul.f32 %v3783_v0, %v3781_v24 }
0x224a   :  { %1781 = vperm.xlu0 %3651, %v1757_v30   ;;  %1765 = vperm.xlu1 %3650, %v1757_v30  }
0x224e   :  { %3658 = vset.pattern.permute.xlu0 %v3879_v41  ;;  %3652 = vset.pattern.permute.xlu1 %v3880_v2 }
0x224f   :  { %1807 = vperm.xlu0 %3658, %v1757_v30   ;;  %1797 = vperm.xlu1 %3652, %v1757_v30  }
0x2253   :  { %3653 = vset.pattern.permute.xlu1 %v3881_v42  ;;  %3660 = vset.pattern.permute.xlu0 %v3878_v7 }
0x2254   :  { %1813 = vperm.xlu1 %3653, %v1757_v30  }
0x2258   :  { %3654 = vset.pattern.permute.xlu1 %v3882_v43 }
0x2259   :  { %1829 = vperm.xlu1 %3654, %v1757_v30  }
0x225d   :  { %3655 = vset.pattern.permute.xlu1 %v3883_v62 }
0x225e   :  { %1760 = vperm.xlu1 %3655, %v1757_v30  }
0x2262   :  { %3656 = vset.pattern.permute.xlu1 %v3884_v60 }
0x2263   :  { %1775 = vperm.xlu1 %3656, %v1757_v30  }
0x2267   :  { %3657 = vset.pattern.permute.xlu1 %v3885_v55 }
0x2268   :  { %1791 = vperm.xlu1 %3657, %v1757_v30  }
0x226c   :  { %3659 = vset.pattern.permute.xlu1 %v3886_v45 }
0x22c5   :  { %v1766_v32 = vpop.permute.xlu1 %1765  ;;  %v1782_v33 = vpop.permute.xlu0 %1781 }
0x22c6   :  { %v1768_v14 = vmul.f32 %v1766_v32, %v4078_v17  ;;  %v1784_v34 = vmul.f32 %v1782_v33, %v4121_v63 }
0x22c8   :  { %1770 = vrot.lane.b32.xlu1 %v1768_v14, %s3876_s0 }
0x22ca   :  { %v1798_v4 = vpop.permute.xlu1 %1797  ;;  %v1808_v25 = vpop.permute.xlu0 %1807 }
0x22cb   :  { %v1800_v39 = vmul.f32 %v1798_v4, %v4165_v57  ;;  %v1810_v14 = vmul.f32 %v1808_v25, %v4184_v28 }
0x22cc   :  { %1786 = vrot.lane.b32.xlu1 %v1784_v34, %s3876_s0 }
0x22cd   :  { %1802 = vrot.lane.b32.xlu0 %v1800_v39, %s3876_s0 }
0x22cf   :  { %v1814_v40 = vpop.permute.xlu1 %1813 }
0x22d0   :  { %1823 = vperm.xlu1 %3659, %v1757_v30   ;;  %v1816_v11 = vmul.f32 %v1814_v40, %v4208_v50 }
0x22d4   :  { %1818 = vrot.lane.b32.xlu1 %v1816_v11, %s3876_s0  ;;  %v1830_v54 = vpop.permute.xlu1 %1829 }
0x22d5   :  { %v1832_v46 = vmul.f32 %v1830_v54, %v4330_v1  ;;  %3661 = vset.pattern.permute.xlu1 %v3877_v37 }
0x22d7   :  { %1834 = vrot.lane.b32.xlu0 %v1832_v46, %s3876_s0 }
0x22d9   :  { %v1761_v51 = vpop.permute.xlu1 %1760 }
0x22da   :  { %v1763_v58 = vmul.f32 %v1761_v51, %v4024_v36  ;;  %v4525_v51 = vpop.f32.mrf.mxu0 }
0x22de   :  { %v1776_v52 = vpop.permute.xlu1 %1775 }
0x22df   :  { %v1778_v13 = vmul.f32 %v1776_v52, %v4097_v38 }
0x22e3   :  { %v1792_v53 = vpop.permute.xlu1 %1791 }
0x22e4   :  { %v1794_v24 = vmul.f32 %v1792_v53, %v4141_v31 }
0x233a   :  { %v1771_v61 = vpop.permute.xlu1 %1770 }
0x233b   :  { %v1773_v10 = vadd.f32 %v1771_v61, %v1763_v58  ;;  %v1917_v61 = vrot.slane %v4451_v29, 4 }
0x233d   :  { %v1779_v44 = vadd.f32 %v1778_v13, %v1773_v10 }
0x233e   :  { %v1787_v19 = vpop.permute.xlu1 %1786 }
0x233f   :  { %v1789_v23 = vadd.f32 %v1787_v19, %v1779_v44  ;;  %v1803_v0 = vpop.permute.xlu0 %1802 }
0x2341   :  { %v1795_v27 = vadd.f32 %v1794_v24, %v1789_v23 }
0x2343   :  { %v1805_v30 = vadd.f32 %v1803_v0, %v1795_v27 }
0x2345   :  { %v1811_v33 = vadd.f32 %v1810_v14, %v1805_v30 }
0x2349   :  { %v1835_v11 = vpop.permute.xlu0 %1834 }
0x234b   :  { %v1824_v32 = vpop.permute.xlu1 %1823 }
0x234c   :  { %v1826_v4 = vmul.f32 %v1824_v32, %v4218_v22 }
0x234f   :  { %v1819_v34 = vpop.permute.xlu1 %1818 }
0x2350   :  { %v1821_v39 = vadd.f32 %v1819_v34, %v1811_v33 }
0x2352   :  { %v1827_v40 = vadd.f32 %v1826_v4, %v1821_v39 }
0x2354   :  { %v1837_v54 = vadd.f32 %v1835_v11, %v1827_v40 }
0x2356   :  { %1839 = vrot.lane.b32.xlu1 %v1837_v54, %s3875_s3 }
0x23c8   :  { %v1840_v46 = vpop.permute.xlu1 %1839 }
0x23c9   :  { %v1842_v47 = vsel %vm152_vm2, %v1840_v46, %v4457_v49 }
0x23ca   :  { %3509 = vmatmul.mubr.msk.f32.vlgmr.msra.gmra.mxu0 %vm1628_vm5, %v1842_v47 }
0x23cb   :  { %3531 = vmatpush3.msra.mxu0 %v4319_v59  ;;  %3546 = vmatprep.mubr.msk.f32.mxu0 %vm3873_vm1, %v3872_v3 }
0x23cc   :  { %3532 = vmatprep.subr.mxu0 %v3872_v3 }
0x23cd   :  { %3533 = vmatpush3.msra.mxu0 %v4324_v9 }
0x23ce   :  { %3534 = vmatprep.subr.mxu0 %v3872_v3 }
0x23cf   :  { %3535 = vmatpush3.msra.mxu0 %v4336_v5 }
0x23d0   :  { %3536 = vmatprep.subr.mxu0 %v3872_v3 }
0x23d1   :  { %3537 = vmatpush3.msra.mxu0 %v4349_v16 }
0x23d2   :  { %3538 = vmatprep.subr.mxu0 %v3872_v3 }
0x23d3   :  { %3539 = vmatpush3.msra.mxu0 %v4363_v21 }
0x23d4   :  { %3540 = vmatprep.subr.mxu0 %v3872_v3 }
0x23d5   :  { %3541 = vmatpush3.msra.mxu0 %v4371_v20 }
0x23d6   :  { %3542 = vmatprep.subr.mxu0 %v3872_v3 }
0x23d7   :  { %3543 = vmatpush3.msra.mxu0 %v4380_v15 }
0x23d8   :  { %3544 = vmatprep.subr.mxu0 %v3872_v3 }
0x23d9   :  { %3545 = vmatpush3.msra.mxu0 %v4406_v35 }
0x23da   :  { %3568 = vmatprep.subr.mxu0 %v3872_v3 }
0x248a   :  { %v1912_v52 = vpop.f32.mrf.mxu0 }
0x248b   :  { %v1926_v53 = vadd.f32 %v1912_v52, %v4441_v18  ;;  %v1919_v10 = vadd.f32 %v1917_v61, %v1912_v52 }
0x248c   :  { %v3510_v58 = vpop.f32.mrf.mxu0 }
0x248d   :  { %1928 = vrot.lane.b32.xlu0 %v1926_v53, %s3876_s0  ;;  %v3185_v13 = vmul.f32 -1.442695, %v1919_v10 }
0x248f   :  { %3784 = vpow2.f32 %v3185_v13 }
0x249c   :  { %v3785_v44 = vpop.eup %3784 }
0x249d   :  { %v1923_v19 = vadd.f32 1.0, %v3785_v44 }
0x249f   :  { %3786 = vrcp.f32 %v1923_v19 }
0x24ac   :  { %v3787_v23 = vpop.eup %3786 }
0x24ad   :  { %v1938_v32 = vsub.f32 1.0, %v3787_v23  ;;  %v1944_v29 = vmul.f32 %v3787_v23, %v4457_v49 }
0x24ff   :  { %v1929_v24 = vpop.permute.xlu0 %1928 }
0x2500   :  { %v1931_v25 = vmul.f32 %v3787_v23, %v1929_v24 }
0x2502   :  { %1933 = vrot.lane.b32.xlu1 %v1931_v25, %s3874_s20 }
0x2574   :  { %v1934_v27 = vpop.permute.xlu1 %1933 }
0x2575   :  { %v1936_v0 = vadd.f32 %v1934_v27, %v1919_v10 }
0x2577   :  { %3788 = vtanh.f32 %v1936_v0 }
0x2584   :  { %v3789_v30 = vpop.eup %3788 }
0x2585   :  { %1940 = vrot.lane.b32.xlu0 %v3789_v30, %s3875_s3 }
0x25f7   :  { %v1941_v14 = vpop.permute.xlu0 %1940 }
0x25f8   :  { %v1943_v33 = vmul.f32 %v1941_v14, %v1938_v32 }
0x25fa   :  { %v4533_v34 = vadd.f32 %v1944_v29, %v1943_v33 }
0x25fc   :  { %v1946_v4 = vmul.f32 %v4533_v34, %v4257_v56 }
0x25fe   :  { %1948 = vrot.lane.b32.xlu1 %v1946_v4, %s3875_s3 }
0x2670   :  { %v1949_v39 = vpop.permute.xlu1 %1948 }
0x2671   :  { %v1951_v40 = vsel %vm1238_vm4, %v1949_v39, 0.0 }
0x2672   :  { %1952 = vadd.xlane.f32.xlu0 %v1951_v40 }
0x26fb   :  { %v1953_v11 = vpop.xlane.xlu0 %1952 }
0x26fc   :  { %v1954_v54 = vadd.f32 %v1953_v11, %v4286_v8 }
0x26fe   :  { %v1955_v46 = vmax.f32 %v1954_v54, 0.0 }
0x2700   :  { %v1956_v47 = vsel %vm1521_vm15, %v1955_v46, -inf }
0x2701   :  { %1957 = vmax.xlane.f32.xlu1 %v1956_v47 }
0x278a   :  { %v1958_v52 = vpop.xlane.xlu1 %1957 }
0x278b   :  { %v1959_v53 = vsub.f32 %v1955_v46, %v1958_v52 }
0x278d   :  { %v1960_v58 = vmul.f32 1.442695, %v1959_v53 }
0x278f   :  { %3790 = vpow2.f32 %v1960_v58 }
0x279c   :  { %v3791_v61 = vpop.eup %3790 }
0x279d   :  { %v1962_v10 = vsel %vm1521_vm15, %v3791_v61, 0.0 }
0x279e   :  { %1963 = vadd.xlane.f32.xlu0 %v1962_v10 }
0x2827   :  { %v1964_v13 = vpop.xlane.xlu0 %1963 }
0x2828   :  { %3792 = vrcp.f32 %v1964_v13 }
0x2835   :  { %v3793_v44 = vpop.eup %3792 }
0x2836   :  { %v1966_v19 = vmul.f32 %v3793_v44, %v3791_v61 }
0x2838   :  { %1990 = vperm.xlu1 %3661, %v1966_v19   ;;  %1974 = vperm.xlu0 %3660, %v1966_v19  }
0x283c   :  { %3662 = vset.pattern.permute.xlu1 %v3880_v2  ;;  %3668 = vset.pattern.permute.xlu0 %v3879_v41 }
0x283d   :  { %2006 = vperm.xlu1 %3662, %v1966_v19   ;;  %2016 = vperm.xlu0 %3668, %v1966_v19  }
0x2841   :  { %3663 = vset.pattern.permute.xlu1 %v3881_v42  ;;  %3670 = vset.pattern.permute.xlu0 %v3878_v7 }
0x2842   :  { %2022 = vperm.xlu1 %3663, %v1966_v19  }
0x2846   :  { %3664 = vset.pattern.permute.xlu1 %v3882_v43 }
0x2847   :  { %2038 = vperm.xlu1 %3664, %v1966_v19  }
0x284b   :  { %3665 = vset.pattern.permute.xlu1 %v3883_v62 }
0x284c   :  { %1969 = vperm.xlu1 %3665, %v1966_v19  }
0x2850   :  { %3666 = vset.pattern.permute.xlu1 %v3884_v60 }
0x2851   :  { %1984 = vperm.xlu1 %3666, %v1966_v19  }
0x2855   :  { %3667 = vset.pattern.permute.xlu1 %v3885_v55 }
0x2856   :  { %2000 = vperm.xlu1 %3667, %v1966_v19  }
0x285a   :  { %3669 = vset.pattern.permute.xlu1 %v3886_v45 }
0x28b3   :  { %v1991_v23 = vpop.permute.xlu1 %1990  ;;  %v1975_v24 = vpop.permute.xlu0 %1974 }
0x28b4   :  { %v1977_v25 = vmul.f32 %v1975_v24, %v4078_v17  ;;  %v1993_v27 = vmul.f32 %v1991_v23, %v4121_v63 }
0x28b6   :  { %1979 = vrot.lane.b32.xlu1 %v1977_v25, %s3876_s0 }
0x28b8   :  { %v2007_v0 = vpop.permute.xlu1 %2006  ;;  %v2017_v10 = vpop.permute.xlu0 %2016 }
0x28b9   :  { %v2009_v30 = vmul.f32 %v2007_v0, %v4165_v57  ;;  %v2019_v24 = vmul.f32 %v2017_v10, %v4184_v28 }
0x28ba   :  { %1995 = vrot.lane.b32.xlu1 %v1993_v27, %s3876_s0 }
0x28bb   :  { %2011 = vrot.lane.b32.xlu0 %v2009_v30, %s3876_s0 }
0x28bd   :  { %v2023_v32 = vpop.permute.xlu1 %2022 }
0x28be   :  { %2032 = vperm.xlu1 %3669, %v1966_v19   ;;  %v2025_v14 = vmul.f32 %v2023_v32, %v4208_v50 }
0x28c2   :  { %v2039_v29 = vpop.permute.xlu1 %2038  ;;  %2027 = vrot.lane.b32.xlu1 %v2025_v14, %s3876_s0 }
0x28c3   :  { %v2041_v33 = vmul.f32 %v2039_v29, %v4330_v1  ;;  %3671 = vset.pattern.permute.xlu1 %v3877_v37 }
0x28c5   :  { %2043 = vrot.lane.b32.xlu0 %v2041_v33, %s3876_s0 }
0x28c7   :  { %v1970_v4 = vpop.permute.xlu1 %1969 }
0x28c8   :  { %v1972_v11 = vmul.f32 %v1970_v4, %v4024_v36 }
0x28cc   :  { %v1985_v39 = vpop.permute.xlu1 %1984 }
0x28cd   :  { %v1987_v47 = vmul.f32 %v1985_v39, %v4097_v38 }
0x28d1   :  { %v2001_v40 = vpop.permute.xlu1 %2000 }
0x28d2   :  { %v2003_v61 = vmul.f32 %v2001_v40, %v4141_v31 }
0x2928   :  { %v1980_v54 = vpop.permute.xlu1 %1979 }
0x2929   :  { %v1982_v46 = vadd.f32 %v1980_v54, %v1972_v11  ;;  %v4593_v54 = vadd.f32 %v4446_v26, %v4448_v12 }
0x292b   :  { %v1988_v52 = vadd.f32 %v1987_v47, %v1982_v46 }
0x292c   :  { %v1996_v53 = vpop.permute.xlu1 %1995 }
0x292d   :  { %v1998_v58 = vadd.f32 %v1996_v53, %v1988_v52  ;;  %v2012_v44 = vpop.permute.xlu0 %2011 }
0x292f   :  { %v2004_v13 = vadd.f32 %v2003_v61, %v1998_v58 }
0x2931   :  { %v2014_v19 = vadd.f32 %v2012_v44, %v2004_v13 }
0x2933   :  { %v2020_v25 = vadd.f32 %v2019_v24, %v2014_v19 }
0x2937   :  { %v2044_v14 = vpop.permute.xlu0 %2043 }
0x2939   :  { %v2033_v23 = vpop.permute.xlu1 %2032 }
0x293a   :  { %v2035_v0 = vmul.f32 %v2033_v23, %v4218_v22 }
0x293d   :  { %v2028_v27 = vpop.permute.xlu1 %2027 }
0x293e   :  { %v2030_v30 = vadd.f32 %v2028_v27, %v2020_v25 }
0x2940   :  { %v2036_v32 = vadd.f32 %v2035_v0, %v2030_v30 }
0x2942   :  { %v2046_v29 = vadd.f32 %v2044_v14, %v2036_v32 }
0x2944   :  { %2048 = vrot.lane.b32.xlu1 %v2046_v29, %s3875_s3 }
0x29b6   :  { %v2049_v33 = vpop.permute.xlu1 %2048 }
0x29b7   :  { %v2051_v4 = vsel %vm152_vm2, %v2049_v33, %v4533_v34 }
0x29b8   :  { %3528 = vmatmul.mubr.msk.f32.vlgmr.msra.gmra.mxu1 %vm1628_vm5, %v2051_v4 }
0x29b9   :  { %3550 = vmatpush3.msra.mxu1 %v4319_v59  ;;  %3565 = vmatprep.mubr.msk.f32.mxu1 %vm3873_vm1, %v3872_v3 }
0x29ba   :  { %3551 = vmatprep.subr.mxu1 %v3872_v3 }
0x29bb   :  { %3552 = vmatpush3.msra.mxu1 %v4324_v9 }
0x29bc   :  { %3553 = vmatprep.subr.mxu1 %v3872_v3 }
0x29bd   :  { %3554 = vmatpush3.msra.mxu1 %v4336_v5 }
0x29be   :  { %3555 = vmatprep.subr.mxu1 %v3872_v3 }
0x29bf   :  { %3556 = vmatpush3.msra.mxu1 %v4349_v16 }
0x29c0   :  { %3557 = vmatprep.subr.mxu1 %v3872_v3 }
0x29c1   :  { %3558 = vmatpush3.msra.mxu1 %v4363_v21 }
0x29c2   :  { %3559 = vmatprep.subr.mxu1 %v3872_v3 }
0x29c3   :  { %3560 = vmatpush3.msra.mxu1 %v4371_v20 }
0x29c4   :  { %3561 = vmatprep.subr.mxu1 %v3872_v3 }
0x29c5   :  { %3562 = vmatpush3.msra.mxu1 %v4380_v15 }
0x29c6   :  { %3563 = vmatprep.subr.mxu1 %v3872_v3 }
0x29c7   :  { %3564 = vmatpush3.msra.mxu1 %v4406_v35 }
0x29c8   :  { %3587 = vmatprep.subr.mxu1 %v3872_v3 }
0x2a78   :  { %v2121_v39 = vpop.f32.mrf.mxu1 }
0x2a79   :  { %v2132_v40 = vadd.f32 %v2121_v39, %v4441_v18  ;;  %v2125_v46 = vadd.f32 %v2121_v39, %v4593_v54 }
0x2a7a   :  { %v3529_v11 = vpop.f32.mrf.mxu1 }
0x2a7b   :  { %2134 = vrot.lane.b32.xlu0 %v2132_v40, %s3876_s0  ;;  %v3187_v47 = vmul.f32 -1.442695, %v2125_v46 }
0x2a7d   :  { %3794 = vpow2.f32 %v3187_v47 }
0x2a8a   :  { %v3795_v52 = vpop.eup %3794 }
0x2a8b   :  { %v2129_v53 = vadd.f32 1.0, %v3795_v52 }
0x2a8d   :  { %3796 = vrcp.f32 %v2129_v53 }
0x2a9a   :  { %v3797_v58 = vpop.eup %3796 }
0x2a9b   :  { %v2144_v26 = vsub.f32 1.0, %v3797_v58  ;;  %v2150_v24 = vmul.f32 %v3797_v58, %v4533_v34 }
0x2aed   :  { %v2135_v61 = vpop.permute.xlu0 %2134 }
0x2aee   :  { %v2137_v10 = vmul.f32 %v3797_v58, %v2135_v61 }
0x2af0   :  { %2139 = vrot.lane.b32.xlu1 %v2137_v10, %s3874_s20 }
0x2b62   :  { %v2140_v13 = vpop.permute.xlu1 %2139 }
0x2b63   :  { %v2142_v44 = vadd.f32 %v2140_v13, %v2125_v46 }
0x2b65   :  { %3798 = vtanh.f32 %v2142_v44 }
0x2b72   :  { %v3799_v19 = vpop.eup %3798 }
0x2b73   :  { %2146 = vrot.lane.b32.xlu0 %v3799_v19, %s3875_s3 }
0x2be5   :  { %v2147_v23 = vpop.permute.xlu0 %2146 }
0x2be6   :  { %v2149_v25 = vmul.f32 %v2147_v23, %v2144_v26 }
0x2be8   :  { %v4599_v27 = vadd.f32 %v2150_v24, %v2149_v25 }
0x2bea   :  { %v2152_v0 = vmul.f32 %v4599_v27, %v4257_v56 }
0x2bec   :  { %2154 = vrot.lane.b32.xlu1 %v2152_v0, %s3875_s3 }
0x2c5e   :  { %v2155_v30 = vpop.permute.xlu1 %2154 }
0x2c5f   :  { %v2157_v32 = vsel %vm1238_vm4, %v2155_v30, 0.0 }
0x2c60   :  { %2158 = vadd.xlane.f32.xlu0 %v2157_v32 }
0x2ce9   :  { %v2159_v14 = vpop.xlane.xlu0 %2158 }
0x2cea   :  { %v2160_v29 = vadd.f32 %v2159_v14, %v4286_v8 }
0x2cec   :  { %v2161_v33 = vmax.f32 %v2160_v29, 0.0 }
0x2cee   :  { %v2162_v4 = vsel %vm1521_vm15, %v2161_v33, -inf }
0x2cef   :  { %2163 = vmax.xlane.f32.xlu1 %v2162_v4 }
0x2d78   :  { %v2164_v39 = vpop.xlane.xlu1 %2163 }
0x2d79   :  { %v2165_v40 = vsub.f32 %v2161_v33, %v2164_v39 }
0x2d7b   :  { %v2166_v11 = vmul.f32 1.442695, %v2165_v40 }
0x2d7d   :  { %3800 = vpow2.f32 %v2166_v11 }
0x2d8a   :  { %v3801_v46 = vpop.eup %3800 }
0x2d8b   :  { %v2168_v47 = vsel %vm1521_vm15, %v3801_v46, 0.0 }
0x2d8c   :  { %2169 = vadd.xlane.f32.xlu0 %v2168_v47 }
0x2e15   :  { %v2170_v52 = vpop.xlane.xlu0 %2169 }
0x2e16   :  { %3802 = vrcp.f32 %v2170_v52 }
0x2e23   :  { %v3803_v53 = vpop.eup %3802 }
0x2e24   :  { %v2172_v58 = vmul.f32 %v3803_v53, %v3801_v46 }
0x2e26   :  { %2196 = vperm.xlu1 %3671, %v2172_v58   ;;  %2180 = vperm.xlu0 %3670, %v2172_v58  }
0x2e2a   :  { %3672 = vset.pattern.permute.xlu1 %v3880_v2 }
0x2e2b   :  { %2212 = vperm.xlu1 %3672, %v2172_v58  }
0x2e2f   :  { %3673 = vset.pattern.permute.xlu1 %v3881_v42 }
0x2e30   :  { %2228 = vperm.xlu1 %3673, %v2172_v58  }
0x2e34   :  { %3674 = vset.pattern.permute.xlu1 %v3882_v43 }
0x2e35   :  { %2244 = vperm.xlu1 %3674, %v2172_v58  }
0x2e39   :  { %3675 = vset.pattern.permute.xlu1 %v3883_v62 }
0x2e3a   :  { %2175 = vperm.xlu1 %3675, %v2172_v58  }
0x2e3e   :  { %3676 = vset.pattern.permute.xlu1 %v3884_v60 }
0x2e3f   :  { %2190 = vperm.xlu1 %3676, %v2172_v58  }
0x2e43   :  { %3677 = vset.pattern.permute.xlu1 %v3885_v55 }
0x2e44   :  { %2206 = vperm.xlu1 %3677, %v2172_v58  }
0x2e48   :  { %3678 = vset.pattern.permute.xlu1 %v3879_v41 }
0x2e49   :  { %2222 = vperm.xlu1 %3678, %v2172_v58  }
0x2e4d   :  { %3679 = vset.pattern.permute.xlu1 %v3886_v45 }
0x2e4e   :  { %2238 = vperm.xlu1 %3679, %v2172_v58  }
0x2e52   :  { %3680 = vset.pattern.permute.xlu1 %v3877_v37 }
0x2ea1   :  { %v2197_v61 = vpop.permute.xlu1 %2196  ;;  %v2181_v10 = vpop.permute.xlu0 %2180 }
0x2ea2   :  { %v2183_v13 = vmul.f32 %v2181_v10, %v4078_v17  ;;  %v2199_v44 = vmul.f32 %v2197_v61, %v4121_v63 }
0x2ea4   :  { %2185 = vrot.lane.b32.xlu0 %v2183_v13, %s3876_s0 }
0x2ea6   :  { %v2213_v19 = vpop.permute.xlu1 %2212 }
0x2ea7   :  { %v2215_v26 = vmul.f32 %v2213_v19, %v4165_v57 }
0x2ea8   :  { %2201 = vrot.lane.b32.xlu0 %v2199_v44, %s3876_s0 }
0x2eab   :  { %v2229_v23 = vpop.permute.xlu1 %2228 }
0x2eac   :  { %v2231_v24 = vmul.f32 %v2229_v23, %v4208_v50  ;;  %2217 = vrot.lane.b32.xlu0 %v2215_v26, %s3876_s0 }
0x2eae   :  { %2233 = vrot.lane.b32.xlu1 %v2231_v24, %s3876_s0 }
0x2eb0   :  { %v2245_v25 = vpop.permute.xlu1 %2244 }
0x2eb1   :  { %v2247_v0 = vmul.f32 %v2245_v25, %v4330_v1 }
0x2eb3   :  { %2249 = vrot.lane.b32.xlu0 %v2247_v0, %s3876_s0 }
0x2eb5   :  { %v2176_v30 = vpop.permute.xlu1 %2175 }
0x2eb6   :  { %v2178_v29 = vmul.f32 %v2176_v30, %v4024_v36 }
0x2eba   :  { %v2191_v32 = vpop.permute.xlu1 %2190 }
0x2ebb   :  { %v2193_v4 = vmul.f32 %v2191_v32, %v4097_v38 }
0x2ebf   :  { %v2207_v14 = vpop.permute.xlu1 %2206 }
0x2ec0   :  { %v2209_v47 = vmul.f32 %v2207_v14, %v4141_v31 }
0x2ec4   :  { %v2223_v40 = vpop.permute.xlu1 %2222 }
0x2ec5   :  { %v2225_v10 = vmul.f32 %v2223_v40, %v4184_v28 }
0x2ec9   :  { %v2239_v58 = vpop.permute.xlu1 %2238 }
0x2eca   :  { %v2241_v26 = vmul.f32 %v2239_v58, %v4218_v22 }
0x2f16   :  { %v2186_v33 = vpop.permute.xlu0 %2185 }
0x2f17   :  { %v2188_v39 = vadd.f32 %v2186_v33, %v2178_v29 }
0x2f19   :  { %v2194_v11 = vadd.f32 %v2193_v4, %v2188_v39 }
0x2f1a   :  { %v2202_v46 = vpop.permute.xlu0 %2201 }
0x2f1b   :  { %v2204_v52 = vadd.f32 %v2202_v46, %v2194_v11 }
0x2f1d   :  { %v2210_v53 = vadd.f32 %v2209_v47, %v2204_v52 }
0x2f1e   :  { %v2218_v61 = vpop.permute.xlu0 %2217 }
0x2f1f   :  { %v2220_v13 = vadd.f32 %v2218_v61, %v2210_v53 }
0x2f20   :  { %v2234_v19 = vpop.permute.xlu1 %2233 }
0x2f21   :  { %v2226_v44 = vadd.f32 %v2225_v10, %v2220_v13 }
0x2f23   :  { %v2236_v23 = vadd.f32 %v2234_v19, %v2226_v44 }
0x2f25   :  { %v2242_v24 = vadd.f32 %v2241_v26, %v2236_v23  ;;  %v2250_v25 = vpop.permute.xlu0 %2249 }
0x2f27   :  { %v2252_v0 = vadd.f32 %v2250_v25, %v2242_v24 }
0x2f29   :  { %2254 = vrot.lane.b32.xlu1 %v2252_v0, %s3875_s3 }
0x2f9b   :  { %v2255_v30 = vpop.permute.xlu1 %2254 }
0x2f9c   :  { %v2257_v32 = vsel %vm152_vm2, %v2255_v30, %v4599_v27 }
0x2f9d   :  { %3547 = vmatmul.mubr.msk.f32.vlgmr.msra.gmra.mxu0 %vm1628_vm5, %v2257_v32 }
0x2f9e   :  { %3569 = vmatpush3.msra.mxu0 %v4319_v59  ;;  %3584 = vmatprep.mubr.msk.f32.mxu0 %vm3873_vm1, %v3872_v3 }
0x2f9f   :  { %3570 = vmatprep.subr.mxu0 %v3872_v3 }
0x2fa0   :  { %3571 = vmatpush3.msra.mxu0 %v4324_v9 }
0x2fa1   :  { %3572 = vmatprep.subr.mxu0 %v3872_v3 }
0x2fa2   :  { %3573 = vmatpush3.msra.mxu0 %v4336_v5 }
0x2fa3   :  { %3574 = vmatprep.subr.mxu0 %v3872_v3 }
0x2fa4   :  { %3575 = vmatpush3.msra.mxu0 %v4349_v16  ;;  %v2332_v16 = vrot.slane %v4593_v54, 4 }
0x2fa5   :  { %3576 = vmatprep.subr.mxu0 %v3872_v3 }
0x2fa6   :  { %3577 = vmatpush3.msra.mxu0 %v4363_v21 }
0x2fa7   :  { %3578 = vmatprep.subr.mxu0 %v3872_v3 }
0x2fa8   :  { %3579 = vmatpush3.msra.mxu0 %v4371_v20 }
0x2fa9   :  { %3580 = vmatprep.subr.mxu0 %v3872_v3 }
0x2faa   :  { %3581 = vmatpush3.msra.mxu0 %v4380_v15 }
0x2fab   :  { %3582 = vmatprep.subr.mxu0 %v3872_v3 }
0x2fac   :  { %3583 = vmatpush3.msra.mxu0 %v4406_v35 }
0x305d   :  { %v2327_v59 = vpop.f32.mrf.mxu0 }
0x305e   :  { %v2341_v9 = vadd.f32 %v2327_v59, %v4441_v18  ;;  %v2334_v21 = vadd.f32 %v2332_v16, %v2327_v59 }
0x305f   :  { %v3548_v5 = vpop.f32.mrf.mxu0 }
0x3060   :  { %2343 = vrot.lane.b32.xlu0 %v2341_v9, %s3876_s0  ;;  %v3189_v14 = vmul.f32 -1.442695, %v2334_v21 }
0x3062   :  { %3804 = vpow2.f32 %v3189_v14 }
0x306f   :  { %v3805_v20 = vpop.eup %3804 }
0x3070   :  { %v2338_v29 = vadd.f32 1.0, %v3805_v20 }
0x3072   :  { %3806 = vrcp.f32 %v2338_v29 }
0x307f   :  { %v3807_v33 = vpop.eup %3806 }
0x3080   :  { %v2353_v11 = vsub.f32 1.0, %v3807_v33  ;;  %v2359_v54 = vmul.f32 %v3807_v33, %v4599_v27 }
0x30d2   :  { %v2344_v15 = vpop.permute.xlu0 %2343 }
0x30d3   :  { %v2346_v4 = vmul.f32 %v3807_v33, %v2344_v15 }
0x30d5   :  { %2348 = vrot.lane.b32.xlu1 %v2346_v4, %s3874_s20 }
0x3147   :  { %v2349_v35 = vpop.permute.xlu1 %2348 }
0x3148   :  { %v2351_v39 = vadd.f32 %v2349_v35, %v2334_v21 }
0x314a   :  { %3808 = vtanh.f32 %v2351_v39 }
0x3157   :  { %v3809_v40 = vpop.eup %3808 }
0x3158   :  { %2355 = vrot.lane.b32.xlu0 %v3809_v40, %s3875_s3 }
0x31ca   :  { %v2356_v46 = vpop.permute.xlu0 %2355 }
0x31cb   :  { %v2358_v47 = vmul.f32 %v2356_v46, %v2353_v11 }
0x31cd   :  { %v4659_v52 = vadd.f32 %v2359_v54, %v2358_v47 }
0x31cf   :  { %v2361_v53 = vmul.f32 %v4659_v52, %v4257_v56 }
0x31d1   :  { %2363 = vrot.lane.b32.xlu1 %v2361_v53, %s3875_s3 }
0x3243   :  { %v2364_v58 = vpop.permute.xlu1 %2363 }
0x3244   :  { %v2366_v61 = vsel %vm1238_vm4, %v2364_v58, 0.0 }
0x3245   :  { %2367 = vadd.xlane.f32.xlu0 %v2366_v61 }
0x32ce   :  { %v2368_v10 = vpop.xlane.xlu0 %2367 }
0x32cf   :  { %v2369_v13 = vadd.f32 %v2368_v10, %v4286_v8 }
0x32d1   :  { %v2370_v44 = vmax.f32 %v2369_v13, 0.0 }
0x32d3   :  { %v2371_v19 = vsel %vm1521_vm15, %v2370_v44, -inf }
0x32d4   :  { %2372 = vmax.xlane.f32.xlu1 %v2371_v19 }
0x335d   :  { %v2373_v26 = vpop.xlane.xlu1 %2372 }
0x335e   :  { %v2374_v23 = vsub.f32 %v2370_v44, %v2373_v26 }
0x3360   :  { %v2375_v24 = vmul.f32 1.442695, %v2374_v23 }
0x3362   :  { %3810 = vpow2.f32 %v2375_v24 }
0x336f   :  { %v3811_v25 = vpop.eup %3810 }
0x3370   :  { %v2377_v0 = vsel %vm1521_vm15, %v3811_v25, 0.0 }
0x3371   :  { %2378 = vadd.xlane.f32.xlu0 %v2377_v0 }
0x33fa   :  { %v2379_v30 = vpop.xlane.xlu0 %2378 }
0x33fb   :  { %3812 = vrcp.f32 %v2379_v30 }
0x3408   :  { %v3813_v32 = vpop.eup %3812 }
0x3409   :  { %v2381_v59 = vmul.f32 %v3813_v32, %v3811_v25 }
0x340b   :  { %2405 = vperm.xlu1 %3680, %v2381_v59   ;;  %2389 = vperm.xlu0 %3670, %v2381_v59  }
0x340f   :  { %3681 = vset.pattern.permute.xlu1 %v3880_v2  ;;  %3682 = vset.pattern.permute.xlu0 %v3881_v42 }
0x3410   :  { %2421 = vperm.xlu1 %3681, %v2381_v59   ;;  %2437 = vperm.xlu0 %3682, %v2381_v59  }
0x3414   :  { %3683 = vset.pattern.permute.xlu1 %v3882_v43  ;;  %3685 = vset.pattern.permute.xlu0 %v3884_v60 }
0x3415   :  { %2453 = vperm.xlu1 %3683, %v2381_v59   ;;  %2399 = vperm.xlu0 %3685, %v2381_v59  }
0x3419   :  { %3684 = vset.pattern.permute.xlu1 %v3883_v62  ;;  %3687 = vset.pattern.permute.xlu0 %v3879_v41 }
0x341a   :  { %2384 = vperm.xlu1 %3684, %v2381_v59   ;;  %2431 = vperm.xlu0 %3687, %v2381_v59  }
0x341e   :  { %3686 = vset.pattern.permute.xlu1 %v3885_v55  ;;  %3689 = vset.pattern.permute.xlu0 %v3878_v7 }
0x341f   :  { %2415 = vperm.xlu1 %3686, %v2381_v59  }
0x3423   :  { %3688 = vset.pattern.permute.xlu1 %v3886_v45 }
0x3486   :  { %v2406_v9 = vpop.permute.xlu1 %2405  ;;  %v2390_v5 = vpop.permute.xlu0 %2389 }
0x3487   :  { %v2392_v16 = vmul.f32 %v2390_v5, %v4078_v17  ;;  %v2408_v21 = vmul.f32 %v2406_v9, %v4121_v63 }
0x3489   :  { %2394 = vrot.lane.b32.xlu1 %v2392_v16, %s3876_s0 }
0x348b   :  { %v2422_v14 = vpop.permute.xlu1 %2421  ;;  %v2438_v29 = vpop.permute.xlu0 %2437 }
0x348c   :  { %v2424_v20 = vmul.f32 %v2422_v14, %v4165_v57  ;;  %v2440_v4 = vmul.f32 %v2438_v29, %v4208_v50  ;;  %v3841_v14 = vld [vmem:[%s4877_s5 + $0x38] sm:$0xff]  ;;  %v3843_v29 = vld [vmem:[%s4877_s5 + $0x28] sm:$0xff] }
0x348d   :  { %2410 = vrot.lane.b32.xlu1 %v2408_v21, %s3876_s0 }
0x348e   :  { %2426 = vrot.lane.b32.xlu0 %v2424_v20, %s3876_s0  ;;  %v3842_v20 = vld [vmem:[%s4877_s5 + $0x30] sm:$0xff] }
0x3490   :  { %v2454_v33 = vpop.permute.xlu1 %2453  ;;  %v2400_v40 = vpop.permute.xlu0 %2399 }
0x3491   :  { %v2456_v15 = vmul.f32 %v2454_v33, %v4330_v1  ;;  %2447 = vperm.xlu1 %3688, %v2381_v59   ;;  %v2402_v47 = vmul.f32 %v2400_v40, %v4097_v38  ;;  %v3844_v33 = vld [vmem:[%s4877_s5 + $0x20] sm:$0xff] }
0x3493   :  { %2458 = vrot.lane.b32.xlu0 %v2456_v15, %s3876_s0  ;;  %v3845_v15 = vld [vmem:[%s4877_s5 + $0x18] sm:$0xff] }
0x3495   :  { %2442 = vrot.lane.b32.xlu1 %v2440_v4, %s3876_s0  ;;  %v2385_v35 = vpop.permute.xlu1 %2384  ;;  %v2432_v13 = vpop.permute.xlu0 %2431  ;;  %v3846_v4 = vld [vmem:[%s4877_s5 + $0x10] sm:$0xff] }
0x3496   :  { %3690 = vset.pattern.permute.xlu1 %v3877_v37  ;;  %v2387_v11 = vmul.f32 %v2385_v35, %v4024_v36  ;;  %v2434_v24 = vmul.f32 %v2432_v13, %v4184_v28  ;;  %v3847_v35 = vld [vmem:[%s4877_s5 + $0x8] sm:$0xff] }
0x349a   :  { %v2416_v39 = vpop.permute.xlu1 %2415 }
0x349b   :  { %v2418_v10 = vmul.f32 %v2416_v39, %v4141_v31  ;;  %v3848_v39 = vld [vmem:[%s4877_s5] sm:$0xff] }
0x34fb   :  { %v2395_v46 = vpop.permute.xlu1 %2394 }
0x34fc   :  { %v2397_v54 = vadd.f32 %v2395_v46, %v2387_v11 }
0x34fe   :  { %v2403_v53 = vadd.f32 %v2402_v47, %v2397_v54  ;;  %v4734_v54 = vadd.f32 %v4525_v51, %v4448_v12 }
0x34ff   :  { %v2411_v58 = vpop.permute.xlu1 %2410 }
0x3500   :  { %v2413_v61 = vadd.f32 %v2411_v58, %v2403_v53  ;;  %v2427_v19 = vpop.permute.xlu0 %2426 }
0x3502   :  { %v2419_v44 = vadd.f32 %v2418_v10, %v2413_v61 }
0x3504   :  { %v2429_v26 = vadd.f32 %v2427_v19, %v2419_v44 }
0x3505   :  { %v2459_v9 = vpop.permute.xlu0 %2458 }
0x3506   :  { %v2435_v25 = vadd.f32 %v2434_v24, %v2429_v26 }
0x350c   :  { %v2448_v23 = vpop.permute.xlu1 %2447 }
0x350d   :  { %v2450_v30 = vmul.f32 %v2448_v23, %v4218_v22 }
0x3510   :  { %v2443_v0 = vpop.permute.xlu1 %2442 }
0x3511   :  { %v2445_v32 = vadd.f32 %v2443_v0, %v2435_v25 }
0x3513   :  { %v2451_v59 = vadd.f32 %v2450_v30, %v2445_v32 }
0x3515   :  { %v2461_v5 = vadd.f32 %v2459_v9, %v2451_v59 }
0x3517   :  { %2463 = vrot.lane.b32.xlu1 %v2461_v5, %s3875_s3 }
0x3589   :  { %v2464_v16 = vpop.permute.xlu1 %2463 }
0x358a   :  { %v2466_v21 = vsel %vm152_vm2, %v2464_v16, %v4659_v52 }
0x358b   :  { %3566 = vmatmul.mubr.msk.f32.vlgmr.msra.gmra.mxu1 %vm1628_vm5, %v2466_v21 }
0x358c   :  { %3588 = vmatpush3.msra.mxu1 %v3841_v14  ;;  %3603 = vmatprep.mubr.msk.f32.mxu1 %vm3873_vm1, %v3872_v3 }
0x358d   :  { %3589 = vmatprep.subr.mxu1 %v3872_v3 }
0x358e   :  { %3590 = vmatpush3.msra.mxu1 %v3842_v20 }
0x358f   :  { %3591 = vmatprep.subr.mxu1 %v3872_v3 }
0x3590   :  { %3592 = vmatpush3.msra.mxu1 %v3843_v29 }
0x3591   :  { %3593 = vmatprep.subr.mxu1 %v3872_v3 }
0x3592   :  { %3594 = vmatpush3.msra.mxu1 %v3844_v33 }
0x3593   :  { %3595 = vmatprep.subr.mxu1 %v3872_v3 }
0x3594   :  { %3596 = vmatpush3.msra.mxu1 %v3845_v15 }
0x3595   :  { %3597 = vmatprep.subr.mxu1 %v3872_v3 }
0x3596   :  { %3598 = vmatpush3.msra.mxu1 %v3846_v4 }
0x3597   :  { %3599 = vmatprep.subr.mxu1 %v3872_v3 }
0x3598   :  { %3600 = vmatpush3.msra.mxu1 %v3847_v35 }
0x3599   :  { %3601 = vmatprep.subr.mxu1 %v3872_v3 }
0x359a   :  { %3602 = vmatpush3.msra.mxu1 %v3848_v39 }
0x364b   :  { %v2536_v40 = vpop.f32.mrf.mxu1 }
0x364c   :  { %v2547_v11 = vadd.f32 %v2536_v40, %v4441_v18  ;;  %v2540_v47 = vadd.f32 %v2536_v40, %v4734_v54 }
0x364d   :  { %v3567_v46 = vpop.f32.mrf.mxu1 }
0x364e   :  { %2549 = vrot.lane.b32.xlu0 %v2547_v11, %s3876_s0  ;;  %v3191_v53 = vmul.f32 -1.442695, %v2540_v47 }
0x3650   :  { %3814 = vpow2.f32 %v3191_v53 }
0x365d   :  { %v3815_v3 = vpop.eup %3814 }
0x365e   :  { %v2544_v58 = vadd.f32 1.0, %v3815_v3 }
0x3660   :  { %3816 = vrcp.f32 %v2544_v58 }
0x366d   :  { %v3817_v61 = vpop.eup %3816 }
0x366e   :  { %v2559_v51 = vsub.f32 1.0, %v3817_v61  ;;  %v2565_v24 = vmul.f32 %v3817_v61, %v4659_v52 }
0x36c0   :  { %v2550_v10 = vpop.permute.xlu0 %2549 }
0x36c1   :  { %v2552_v13 = vmul.f32 %v3817_v61, %v2550_v10 }
0x36c3   :  { %2554 = vrot.lane.b32.xlu1 %v2552_v13, %s3874_s20 }
0x3735   :  { %v2555_v44 = vpop.permute.xlu1 %2554 }
0x3736   :  { %v2557_v19 = vadd.f32 %v2555_v44, %v2540_v47 }
0x3738   :  { %3818 = vtanh.f32 %v2557_v19 }
0x3745   :  { %v3819_v26 = vpop.eup %3818 }
0x3746   :  { %2561 = vrot.lane.b32.xlu0 %v3819_v26, %s3875_s3 }
0x37b8   :  { %v2562_v23 = vpop.permute.xlu0 %2561 }
0x37b9   :  { %v2564_v25 = vmul.f32 %v2562_v23, %v2559_v51 }
0x37bb   :  { %v4740_v0 = vadd.f32 %v2565_v24, %v2564_v25 }
0x37bd   :  { %v2567_v30 = vmul.f32 %v4740_v0, %v4257_v56 }
0x37bf   :  { %2569 = vrot.lane.b32.xlu1 %v2567_v30, %s3875_s3 }
0x3831   :  { %v2570_v32 = vpop.permute.xlu1 %2569 }
0x3832   :  { %v2572_v59 = vsel %vm1238_vm4, %v2570_v32, 0.0 }
0x3833   :  { %2573 = vadd.xlane.f32.xlu0 %v2572_v59 }
0x38bc   :  { %v2574_v9 = vpop.xlane.xlu0 %2573 }
0x38bd   :  { %v2575_v5 = vadd.f32 %v2574_v9, %v4286_v8 }
0x38bf   :  { %v2576_v16 = vmax.f32 %v2575_v5, 0.0 }
0x38c1   :  { %v2577_v21 = vsel %vm1521_vm15, %v2576_v16, -inf }
0x38c2   :  { %2578 = vmax.xlane.f32.xlu1 %v2577_v21 }
0x394b   :  { %v2579_v14 = vpop.xlane.xlu1 %2578 }
0x394c   :  { %v2580_v20 = vsub.f32 %v2576_v16, %v2579_v14 }
0x394e   :  { %v2581_v29 = vmul.f32 1.442695, %v2580_v20 }
0x3950   :  { %3820 = vpow2.f32 %v2581_v29 }
0x395d   :  { %v3821_v33 = vpop.eup %3820 }
0x395e   :  { %v2583_v15 = vsel %vm1521_vm15, %v3821_v33, 0.0 }
0x395f   :  { %2584 = vadd.xlane.f32.xlu0 %v2583_v15 }
0x39e8   :  { %v2585_v4 = vpop.xlane.xlu0 %2584 }
0x39e9   :  { %3822 = vrcp.f32 %v2585_v4 }
0x39f6   :  { %v3823_v35 = vpop.eup %3822 }
0x39f7   :  { %v2587_v39 = vmul.f32 %v3823_v35, %v3821_v33 }
0x39f9   :  { %2611 = vperm.xlu1 %3690, %v2587_v39   ;;  %2595 = vperm.xlu0 %3689, %v2587_v39  }
0x39fd   :  { %3691 = vset.pattern.permute.xlu1 %v3880_v2  ;;  %3697 = vset.pattern.permute.xlu0 %v3879_v41 }
0x39fe   :  { %2627 = vperm.xlu1 %3691, %v2587_v39   ;;  %2637 = vperm.xlu0 %3697, %v2587_v39  }
0x3a02   :  { %3692 = vset.pattern.permute.xlu1 %v3881_v42  ;;  %3699 = vset.pattern.permute.xlu0 %v3878_v7 }
0x3a03   :  { %2643 = vperm.xlu1 %3692, %v2587_v39  }
0x3a07   :  { %3693 = vset.pattern.permute.xlu1 %v3882_v43 }
0x3a08   :  { %2659 = vperm.xlu1 %3693, %v2587_v39  }
0x3a0c   :  { %3694 = vset.pattern.permute.xlu1 %v3883_v62 }
0x3a0d   :  { %2590 = vperm.xlu1 %3694, %v2587_v39  }
0x3a11   :  { %3695 = vset.pattern.permute.xlu1 %v3884_v60 }
0x3a12   :  { %2605 = vperm.xlu1 %3695, %v2587_v39  }
0x3a16   :  { %3696 = vset.pattern.permute.xlu1 %v3885_v55 }
0x3a17   :  { %2621 = vperm.xlu1 %3696, %v2587_v39  }
0x3a1b   :  { %3698 = vset.pattern.permute.xlu1 %v3886_v45 }
0x3a74   :  { %v2612_v40 = vpop.permute.xlu1 %2611  ;;  %v2596_v11 = vpop.permute.xlu0 %2595 }
0x3a75   :  { %v2598_v46 = vmul.f32 %v2596_v11, %v4078_v17  ;;  %v2614_v7 = vmul.f32 %v2612_v40, %v4121_v63 }
0x3a77   :  { %2600 = vrot.lane.b32.xlu1 %v2598_v46, %s3876_s0 }
0x3a79   :  { %v2628_v47 = vpop.permute.xlu1 %2627  ;;  %v2638_v9 = vpop.permute.xlu0 %2637 }
0x3a7a   :  { %v2630_v53 = vmul.f32 %v2628_v47, %v4165_v57  ;;  %v2640_v14 = vmul.f32 %v2638_v9, %v4184_v28 }
0x3a7b   :  { %2616 = vrot.lane.b32.xlu1 %v2614_v7, %s3876_s0 }
0x3a7c   :  { %2632 = vrot.lane.b32.xlu0 %v2630_v53, %s3876_s0  ;;  %v2747_v53 = vrot.slane %v4734_v54, 4 }
0x3a7e   :  { %v2644_v3 = vpop.permute.xlu1 %2643 }
0x3a7f   :  { %2653 = vperm.xlu1 %3698, %v2587_v39   ;;  %v2646_v58 = vmul.f32 %v2644_v3, %v4208_v50 }
0x3a83   :  { %v2660_v61 = vpop.permute.xlu1 %2659  ;;  %2648 = vrot.lane.b32.xlu1 %v2646_v58, %s3876_s0 }
0x3a84   :  { %v2662_v10 = vmul.f32 %v2660_v61, %v4330_v1  ;;  %3700 = vset.pattern.permute.xlu1 %v3877_v37 }
0x3a86   :  { %2664 = vrot.lane.b32.xlu0 %v2662_v10, %s3876_s0 }
0x3a88   :  { %v2591_v13 = vpop.permute.xlu1 %2590 }
0x3a89   :  { %v2593_v26 = vmul.f32 %v2591_v13, %v4024_v36 }
0x3a8d   :  { %v2606_v44 = vpop.permute.xlu1 %2605 }
0x3a8e   :  { %v2608_v24 = vmul.f32 %v2606_v44, %v4097_v38 }
0x3a92   :  { %v2622_v19 = vpop.permute.xlu1 %2621 }
0x3a93   :  { %v2624_v59 = vmul.f32 %v2622_v19, %v4141_v31 }
0x3ae9   :  { %v2601_v51 = vpop.permute.xlu1 %2600 }
0x3aea   :  { %v2603_v23 = vadd.f32 %v2601_v51, %v2593_v26 }
0x3aec   :  { %v2609_v25 = vadd.f32 %v2608_v24, %v2603_v23 }
0x3aed   :  { %v2617_v30 = vpop.permute.xlu1 %2616 }
0x3aee   :  { %v2619_v32 = vadd.f32 %v2617_v30, %v2609_v25  ;;  %v2633_v16 = vpop.permute.xlu0 %2632 }
0x3af0   :  { %v2625_v5 = vadd.f32 %v2624_v59, %v2619_v32 }
0x3af2   :  { %v2635_v37 = vadd.f32 %v2633_v16, %v2625_v5 }
0x3af4   :  { %v2641_v20 = vadd.f32 %v2640_v14, %v2635_v37 }
0x3af8   :  { %v2665_v35 = vpop.permute.xlu0 %2664 }
0x3afa   :  { %v2654_v21 = vpop.permute.xlu1 %2653 }
0x3afb   :  { %v2656_v33 = vmul.f32 %v2654_v21, %v4218_v22 }
0x3afe   :  { %v2649_v29 = vpop.permute.xlu1 %2648 }
0x3aff   :  { %v2651_v15 = vadd.f32 %v2649_v29, %v2641_v20 }
0x3b01   :  { %v2657_v4 = vadd.f32 %v2656_v33, %v2651_v15 }
0x3b03   :  { %v2667_v39 = vadd.f32 %v2665_v35, %v2657_v4 }
0x3b05   :  { %2669 = vrot.lane.b32.xlu1 %v2667_v39, %s3875_s3 }
0x3b77   :  { %v2670_v40 = vpop.permute.xlu1 %2669 }
0x3b78   :  { %v2672_v11 = vsel %vm152_vm2, %v2670_v40, %v4740_v0 }
0x3b79   :  { %3585 = vmatmul.mubr.msk.f32.vlgmr.msra.gmra.mxu0 %vm1628_vm5, %v2672_v11 }
0x3c39   :  { %v2742_v46 = vpop.f32.mrf.mxu0 }
0x3c3a   :  { %v2756_v7 = vadd.f32 %v2742_v46, %v4441_v18  ;;  %v2749_v3 = vadd.f32 %v2747_v53, %v2742_v46 }
0x3c3b   :  { %v3586_v47 = vpop.f32.mrf.mxu0 }
0x3c3c   :  { %2758 = vrot.lane.b32.xlu0 %v2756_v7, %s3876_s0  ;;  %v3193_v58 = vmul.f32 -1.442695, %v2749_v3 }
0x3c3e   :  { %3824 = vpow2.f32 %v3193_v58 }
0x3c4b   :  { %v3825_v61 = vpop.eup %3824 }
0x3c4c   :  { %v2753_v10 = vadd.f32 1.0, %v3825_v61 }
0x3c4e   :  { %3826 = vrcp.f32 %v2753_v10 }
0x3c5b   :  { %v3827_v13 = vpop.eup %3826 }
0x3c5c   :  { %v2768_v24 = vsub.f32 1.0, %v3827_v13  ;;  %v2774_v54 = vmul.f32 %v3827_v13, %v4740_v0 }
0x3cae   :  { %v2759_v44 = vpop.permute.xlu0 %2758 }
0x3caf   :  { %v2761_v19 = vmul.f32 %v3827_v13, %v2759_v44 }
0x3cb1   :  { %2763 = vrot.lane.b32.xlu1 %v2761_v19, %s3874_s20 }
0x3d23   :  { %v2764_v26 = vpop.permute.xlu1 %2763 }
0x3d24   :  { %v2766_v51 = vadd.f32 %v2764_v26, %v2749_v3 }
0x3d26   :  { %3828 = vtanh.f32 %v2766_v51 }
0x3d33   :  { %v3829_v23 = vpop.eup %3828 }
0x3d34   :  { %2770 = vrot.lane.b32.xlu0 %v3829_v23, %s3875_s3 }
0x3da6   :  { %v2771_v25 = vpop.permute.xlu0 %2770 }
0x3da7   :  { %v2773_v30 = vmul.f32 %v2771_v25, %v2768_v24 }
0x3da9   :  { %v4784_v32 = vadd.f32 %v2774_v54, %v2773_v30 }
0x3dab   :  { %v2776_v59 = vmul.f32 %v4784_v32, %v4257_v56 }
0x3dad   :  { %2778 = vrot.lane.b32.xlu1 %v2776_v59, %s3875_s3 }
0x3e1f   :  { %v2779_v9 = vpop.permute.xlu1 %2778 }
0x3e20   :  { %v2781_v5 = vsel %vm1238_vm4, %v2779_v9, 0.0 }
0x3e21   :  { %2782 = vadd.xlane.f32.xlu0 %v2781_v5 }
0x3eaa   :  { %v2783_v16 = vpop.xlane.xlu0 %2782 }
0x3eab   :  { %v2784_v37 = vadd.f32 %v2783_v16, %v4286_v8 }
0x3ead   :  { %v2785_v21 = vmax.f32 %v2784_v37, 0.0 }
0x3eaf   :  { %v2786_v14 = vsel %vm1521_vm15, %v2785_v21, -inf }
0x3eb0   :  { %2787 = vmax.xlane.f32.xlu1 %v2786_v14 }
0x3f39   :  { %v2788_v20 = vpop.xlane.xlu1 %2787 }
0x3f3a   :  { %v2789_v29 = vsub.f32 %v2785_v21, %v2788_v20 }
0x3f3c   :  { %v2790_v33 = vmul.f32 1.442695, %v2789_v29  ;;  %v2983_v29 = vrot.slane %v4533_v34, 4  ;;  %v2996_v34 = vld [vmem:[%s4878_s6 + $0x10] sm:$0xff] }
0x3f3e   :  { %3830 = vpow2.f32 %v2790_v33  ;;  %v2997_v33 = vld [vmem:[%s4878_s6 + $0x18] sm:$0xff] }
0x3f3f   :  { %3606 = vmatprep.subr.mxu0 %v2997_v33 }
0x3f40   :  { %3607 = vmatpush3.msra.mxu0 %v2997_v33 }
0x3f41   :  { %3608 = vmatprep.subr.mxu0 %v2996_v34 }
0x3f42   :  { %3609 = vmatpush3.msra.mxu0 %v2996_v34 }
0x3f4b   :  { %v3831_v15 = vpop.eup %3830 }
0x3f4c   :  { %v2792_v56 = vsel %vm1521_vm15, %v3831_v15, 0.0 }
0x3f4d   :  { %2793 = vadd.xlane.f32.xlu0 %v2792_v56 }
0x3fd6   :  { %v2794_v4 = vpop.xlane.xlu0 %2793 }
0x3fd7   :  { %3832 = vrcp.f32 %v2794_v4  ;;  %v2994_v4 = vld [vmem:[%s4878_s6] sm:$0xff] }
0x3fe4   :  { %v3833_v35 = vpop.eup %3832 }
0x3fe5   :  { %v2796_v39 = vmul.f32 %v3833_v35, %v3831_v15 }
0x3fe7   :  { %2820 = vperm.xlu1 %3700, %v2796_v39   ;;  %2804 = vperm.xlu0 %3699, %v2796_v39  }
0x3feb   :  { %3701 = vset.pattern.permute.xlu1 %v3880_v2  ;;  %3709 = vset.pattern.permute.xlu0 %v3882_v43 }
0x3fec   :  { %2836 = vperm.xlu1 %3701, %v2796_v39  }
0x3ff0   :  { %3702 = vset.pattern.permute.xlu1 %v3881_v42 }
0x3ff1   :  { %2852 = vperm.xlu1 %3702, %v2796_v39  }
0x3ff5   :  { %3703 = vset.pattern.permute.xlu1 %v3882_v43 }
0x3ff6   :  { %2868 = vperm.xlu1 %3703, %v2796_v39  }
0x3ffa   :  { %3704 = vset.pattern.permute.xlu1 %v3883_v62 }
0x3ffb   :  { %2799 = vperm.xlu1 %3704, %v2796_v39  }
0x3fff   :  { %3705 = vset.pattern.permute.xlu1 %v3884_v60 }
0x4000   :  { %2814 = vperm.xlu1 %3705, %v2796_v39  }
0x4004   :  { %3706 = vset.pattern.permute.xlu1 %v3885_v55 }
0x4005   :  { %2830 = vperm.xlu1 %3706, %v2796_v39  }
0x4009   :  { %3707 = vset.pattern.permute.xlu1 %v3879_v41 }
0x400a   :  { %2846 = vperm.xlu1 %3707, %v2796_v39  }
0x400e   :  { %3708 = vset.pattern.permute.xlu1 %v3886_v45 }
0x400f   :  { %2862 = vperm.xlu1 %3708, %v2796_v39   ;;  %v2986_v39 = vrot.slane %v4659_v52, 4 }
0x4062   :  { %v2821_v8 = vpop.permute.xlu1 %2820  ;;  %v2805_v2 = vpop.permute.xlu0 %2804 }
0x4063   :  { %v2807_v42 = vmul.f32 %v2805_v2, %v4078_v17  ;;  %v2823_v43 = vmul.f32 %v2821_v8, %v4121_v63  ;;  %v2992_v8 = vsel %vm1403_vm0, %v4599_v27, %v2986_v39  ;;  %v3000_v27 = vsub.s32 6, %v3955_v6 }
0x4065   :  { %2809 = vrot.lane.b32.xlu0 %v2807_v42, %s3876_s0 }
0x4067   :  { %v2837_v62 = vpop.permute.xlu1 %2836 }
0x4068   :  { %v2839_v60 = vmul.f32 %v2837_v62, %v4165_v57 }
0x4069   :  { %2825 = vrot.lane.b32.xlu0 %v2823_v43, %s3876_s0 }
0x406c   :  { %v2853_v55 = vpop.permute.xlu1 %2852 }
0x406d   :  { %v2855_v41 = vmul.f32 %v2853_v55, %v4208_v50  ;;  %2841 = vrot.lane.b32.xlu0 %v2839_v60, %s3876_s0 }
0x406f   :  { %2857 = vrot.lane.b32.xlu1 %v2855_v41, %s3876_s0 }
0x4071   :  { %v2869_v45 = vpop.permute.xlu1 %2868 }
0x4072   :  { %v2871_v40 = vmul.f32 %v2869_v45, %v4330_v1  ;;  %v3849_v45 = vld [vmem:[%s4879_s7] sm:$0xff]  ;;  %s3887_s7 = smov [#allocation2]  }
0x4074   :  { %2873 = vrot.lane.b32.xlu0 %v2871_v40, %s3876_s0 }
0x4076   :  { %v2800_v17 = vpop.permute.xlu1 %2799 }
0x4077   :  { %v2802_v46 = vmul.f32 %v2800_v17, %v4024_v36 }
0x407b   :  { %v2815_v11 = vpop.permute.xlu1 %2814 }
0x407c   :  { %v2817_v57 = vmul.f32 %v2815_v11, %v4097_v38 }
0x4080   :  { %v2831_v63 = vpop.permute.xlu1 %2830 }
0x4081   :  { %v2833_v58 = vmul.f32 %v2831_v63, %v4141_v31 }
0x4085   :  { %v2847_v53 = vpop.permute.xlu1 %2846 }
0x4086   :  { %v2849_v44 = vmul.f32 %v2847_v53, %v4184_v28  ;;  %v1489_v28 = vadd.f32 %v4523_v48, %v4448_v12  ;;  %v2991_v12 = vsel %vm1403_vm0, %v4457_v49, %v2983_v29 }
0x408a   :  { %v2863_v13 = vpop.permute.xlu1 %2862 }
0x408b   :  { %v2865_v36 = vmul.f32 %v2863_v13, %v4218_v22 }
0x40d7   :  { %v2810_v7 = vpop.permute.xlu0 %2809 }
0x40d8   :  { %v2812_v47 = vadd.f32 %v2810_v7, %v2802_v46 }
0x40da   :  { %v2818_v50 = vadd.f32 %v2817_v57, %v2812_v47 }
0x40db   :  { %v2826_v3 = vpop.permute.xlu0 %2825 }
0x40dc   :  { %v2828_v61 = vadd.f32 %v2826_v3, %v2818_v50 }
0x40de   :  { %v2834_v10 = vadd.f32 %v2833_v58, %v2828_v61 }
0x40df   :  { %v2842_v1 = vpop.permute.xlu0 %2841 }
0x40e0   :  { %v2844_v19 = vadd.f32 %v2842_v1, %v2834_v10 }
0x40e1   :  { %v2858_v51 = vpop.permute.xlu1 %2857 }
0x40e2   :  { %v2850_v26 = vadd.f32 %v2849_v44, %v2844_v19 }
0x40e4   :  { %v2860_v23 = vadd.f32 %v2858_v51, %v2850_v26 }
0x40e6   :  { %v2866_v24 = vadd.f32 %v2865_v36, %v2860_v23  ;;  %v2874_v38 = vpop.permute.xlu0 %2873 }
0x40e8   :  { %v2876_v25 = vadd.f32 %v2874_v38, %v2866_v24 }
0x40ea   :  { %2878 = vrot.lane.b32.xlu1 %v2876_v25, %s3875_s3 }
0x415c   :  { %v2879_v54 = vpop.permute.xlu1 %2878 }
0x415d   :  { %v2881_v31 = vsel %vm152_vm2, %v2879_v54, %v4784_v32 }
0x415e   :  { %3604 = vmatmul.mubr.msk.f32.vlgmr.msra.gmra.mxu1 %vm1628_vm5, %v2881_v31 }
0x421e   :  { %v2951_v30 = vpop.f32.mrf.mxu1 }
0x421f   :  { %v2955_v59 = vadd.f32 %v2951_v30, %v1489_v28  ;;  %v2962_v9 = vadd.f32 %v2951_v30, %v4441_v18  ;;  %v2989_v18 = vrot.slane %v4784_v32, 4 }
0x4220   :  { %v3605_v22 = vpop.f32.mrf.mxu1 }
0x4221   :  { %2964 = vrot.lane.b32.xlu0 %v2962_v9, %s3876_s0  ;;  %v3195_v5 = vmul.f32 -1.442695, %v2955_v59  ;;  %v2993_v48 = vsel %vm1403_vm0, %v4740_v0, %v2989_v18  ;;  %v2995_v0 = vld [vmem:[%s4878_s6 + $0x8] sm:$0xff] }
0x4222   :  { %3610 = vmatprep.subr.mxu0 %v2995_v0 }
0x4223   :  { %3834 = vpow2.f32 %v3195_v5  ;;  %3611 = vmatpush3.msra.mxu0 %v2995_v0 }
0x4224   :  { %3612 = vmatprep.subr.mxu0 %v2994_v4 }
0x4225   :  { %3613 = vmatpush3.msra.mxu0 %v2994_v4 }
0x4230   :  { %v3835_v16 = vpop.eup %3834 }
0x4231   :  { %v2959_v37 = vadd.f32 1.0, %v3835_v16 }
0x4233   :  { %3836 = vrcp.f32 %v2959_v37 }
0x4240   :  { %v3837_v21 = vpop.eup %3836 }
0x4241   :  { %v2974_v2 = vsub.f32 1.0, %v3837_v21  ;;  %v2980_v43 = vmul.f32 %v3837_v21, %v4784_v32  ;;  %v3001_v32 = vrot.slane %v3849_v45, %v3000_v27 }
0x4293   :  { %v2965_v14 = vpop.permute.xlu0 %2964 }
0x4294   :  { %v2967_v20 = vmul.f32 %v3837_v21, %v2965_v14 }
0x4296   :  { %2969 = vrot.lane.b32.xlu1 %v2967_v20, %s3874_s20 }
0x429a   :  { %3006 = vrot.lane.b32.xlu1 %v2991_v12, %s3875_s3 }
0x429e   :  { %3010 = vrot.lane.b32.xlu1 %v2993_v48, %s3875_s3 }
0x4308   :  { %v2970_v49 = vpop.permute.xlu1 %2969 }
0x4309   :  { %v2972_v15 = vadd.f32 %v2970_v49, %v2955_v59 }
0x430b   :  { %3838 = vtanh.f32 %v2972_v15 }
0x430c   :  { %v3007_v56 = vpop.permute.xlu1 %3006 }
0x430d   :  { %3614 = vmatprep.mubr.msk.f32.mxu0 %vm152_vm2, %v3007_v56 }
0x4310   :  { %v3011_v41 = vpop.permute.xlu1 %3010 }
0x4318   :  { %v3839_v35 = vpop.eup %3838 }
0x4319   :  { %2976 = vrot.lane.b32.xlu0 %v3839_v35, %s3875_s3 }
0x431d   :  { %3008 = vrot.lane.b32.xlu0 %v2992_v8, %s3875_s3 }
0x438b   :  { %v2977_v42 = vpop.permute.xlu0 %2976 }
0x438c   :  { %v2979_v62 = vmul.f32 %v2977_v42, %v2974_v2 }
0x438e   :  { %v2981_v60 = vadd.f32 %v2980_v43, %v2979_v62 }
0x438f   :  { %v3009_v55 = vpop.permute.xlu0 %3008 }
0x4390   :  { %3012 = vrot.lane.b32.xlu0 %v2981_v60, %s3875_s3  ;;  %3615 = vmatmul.mubr.msk.f32.vlgmr.msra.gmra.mxu0 %vm152_vm2, %v3009_v55  ;;  %s3132_s3 = sshll.u32 %s3887_s7, 4  ;;  %s3133_s3 = int_to_ptr.vmem [resolvable:$true] %s3132_s3 }
0x4391   :  { %3617 = vmatprep.mubr.msk.f32.mxu0 %vm152_vm2, %v3011_v41  ;;  %s3850_s13 = scalar_lea.vmem %s3133_s3, 512  ;;  %p3855_p1 = scmp.lt.s32.totalorder %s3133_s3, %s3133_s3 }
0x4392   :  { %p3851_p0 = scmp.ne.s32.totalorder %s3133_s3, %s3850_s13  ;;  %p3856_p2 = scmp.lt.s32.totalorder %s3850_s13, %s3850_s13 }
0x4394   :  { %p3857_p3 = por %p3856_p2, %p3855_p1 }
0x4396   :  { %p3858_p4 = pnand %p3857_p3, %p3851_p0 }
0x4402   :  { %v3013_v52 = vpop.permute.xlu0 %3012 }
0x4403   :  { %3618 = vmatmul.mubr.msk.f32.gmra.mxu0 %vm152_vm2, %v3013_v52 }
0x4450   :  { %v3616_v40 = vpop.f32.mrf.mxu0 }
0x4451   :  { %v3094_v17 = vadd.f32 %v3616_v40, %v3001_v32 }
0x4452   :  { %v3088_v11 = vpop.f32.mrf.mxu0 }
0x4453   :  { %v3089_v63 = vadd.f32 %v3088_v11, %v3001_v32  ;;  %v3112_v46 = vrot.slane %v3094_v17, 4 }
0x4455   :  { %v3111_v7 = vrot.slane %v3089_v63, 4 }
0x4457   :  { %v3113_v57 = vsel %vm1403_vm0, %v3111_v7, %v3112_v46  ;;  %v3122_v47 = vsel %vm1403_vm0, 0.0, %v3111_v7 }
0x4458   :  { %3123 = vst.msk [vmem:[#allocation2] sm:$0xff] %vm1390_vm3, %v3122_v47  ;;  %3124 = vst.msk [vmem:[#allocation2 + $0x8] sm:$0xff] %vm1390_vm3, %v3113_v57 }
0x44c3   :  { %v3619_v6 = vpop.f32.mrf.mxu0 }
0x44c4   :  { %v3104_v53 = vadd.f32 %v3619_v6, %v3001_v32 }
0x44c5   :  { %v3098_v50 = vpop.f32.mrf.mxu0 }
0x44c6   :  { %v3099_v3 = vadd.f32 %v3098_v50, %v3001_v32  ;;  %v3116_v58 = vrot.slane %v3104_v53, 4 }
0x44c8   :  { %v3114_v61 = vrot.slane %v3099_v3, 4 }
0x44ca   :  { %v3115_v10 = vsel %vm1403_vm0, %v3112_v46, %v3114_v61  ;;  %v3117_v13 = vsel %vm1403_vm0, %v3114_v61, %v3116_v58 }
0x44cb   :  { %3125 = vst.msk [vmem:[#allocation2 + $0x10] sm:$0xff] %vm1390_vm3, %v3115_v10  ;;  %3126 = vst.msk [vmem:[#allocation2 + $0x18] sm:$0xff] %vm1390_vm3, %v3117_v13 }
0x44cc   :  { %3861 = shalt.err (!%p3858_p4)
}
0x44cd   :  { %s3888_s14 = smov 128   ;;  %s3889_s1 = smov 8  }
0x44ce   :  { %3138 = dma.vmem_to_hbm [thread:$0]  %s3133_s3, 512, %s4880_s8, [#allocation3], %s3888_s14, %s3888_s14, %s3889_s1  }
0x44cf   :  { %3870 = dma.done.wait [#allocation3], 512  }
0x44d0   :  { %3871 = vsyncadd [#allocation3], 4294966784 }
0x44d1   :  { %3142 = vsyncpa [#allocation3], 1 }

</bundles_post_ra>
